<compile_context>
chip_gen: v7x
topology: tpu7x:2x2x1
jax: 0.10.0
libtpu: 0.0.40
codegen_flags: <defaults>
</compile_context>

<pallas_src>
import jax
import jax.numpy as jnp
from jax import lax
from jax.experimental import pallas as pl
from jax.experimental.pallas import tpu as pltpu

LEAKY_SLOPE = 0.1
GN_EPS = 1e-5
LANE = 128


def _leaky_relu(z):
    return jnp.where(z > 0, z, LEAKY_SLOPE * z)


def _round_up(v, m):
    return ((v + m - 1) // m) * m


def gnn_solver_kernel(
    h0_ref, adj_ref, bmat_ref, bts_ref,
    vecs_ref, mats_ref,
    reg_w1_ref, reg_b1_ref, reg_w2t_ref, reg_b2_ref,
    out_ref,
    h_ref,
):
    f32 = jnp.float32
    bf16 = jnp.bfloat16
    d = pl.program_id(0)
    last = pl.num_programs(0) - 1

    # --- initialize residual stream from the (wrapper-computed) embedder output ---
    @pl.when(d == 0)
    def _():
        h_ref[...] = h0_ref[...]

    h = h_ref[...]                  # [N, W] f32 residual stream
    adj = adj_ref[...]              # [N, N] bf16 weighted adjacency (dst, src)
    bmat = bmat_ref[...]            # [N, G] bf16 graph one-hot (0/1)
    bts = bts_ref[...]              # [G, N] bf16 = diag(1/count) @ B^T

    v = vecs_ref[0]                 # [8, W] stacked per-block vectors (f32)
    gn_w, gn_b, gn_s = v[0:1], v[1:2], v[2:3]
    c1_b, c2_b = v[3:4], v[4:5]

    # --- GraphNorm, factored per-graph averaging: mean_n = B @ (Bt_s @ h) ---
    g_mean = jnp.dot(bts, h.astype(bf16), preferred_element_type=f32)          # [G, W]
    mean_n = jnp.dot(bmat, g_mean.astype(bf16), preferred_element_type=f32)    # [N, W]
    cen = h - mean_n * gn_s
    # NOTE: variance is E[cen^2] of the mean_scale-shifted values WITHOUT re-centering;
    # this matches PyG GraphNorm (not a missing mean subtraction).
    g_msq = jnp.dot(bts, (cen * cen).astype(bf16), preferred_element_type=f32)
    msq_n = jnp.dot(bmat, g_msq.astype(bf16), preferred_element_type=f32)
    xx = gn_w * cen * lax.rsqrt(msq_n + GN_EPS) + gn_b

    # --- GraphConv 1: fused  [agg | x] @ [[rel_w];[root_w]]  (single K=2W matmul) ---
    xb = xx.astype(bf16)
    agg = jnp.dot(adj, xb, preferred_element_type=f32)
    cat = jnp.concatenate([agg.astype(bf16), xb], axis=-1)                     # [N, 2W]
    xx = jnp.dot(cat, mats_ref[0, 0], preferred_element_type=f32) + c1_b
    xx = _leaky_relu(xx)

    # --- GraphConv 2 ---
    xb = xx.astype(bf16)
    agg = jnp.dot(adj, xb, preferred_element_type=f32)
    cat = jnp.concatenate([agg.astype(bf16), xb], axis=-1)
    xx = jnp.dot(cat, mats_ref[0, 1], preferred_element_type=f32) + c2_b

    # residual
    h_ref[...] = h + xx

    # --- regressor (last grid step only), lane-dense [1, N] output, no [N,W] transpose ---
    @pl.when(d == last)
    def _():
        hn = h_ref[...].astype(bf16)
        r = _leaky_relu(jnp.dot(hn, reg_w1_ref[...], preferred_element_type=f32)
                        + reg_b1_ref[...])                                     # [N, W] f32
        out_ref[...] = (
            lax.dot_general(reg_w2t_ref[...], r.astype(bf16),
                            dimension_numbers=(((1,), (1,)), ((), ())),
                            preferred_element_type=f32)
            + reg_b2_ref[0, 0])


def init_params(key, n_features, depth, width):
    ks = jax.random.split(key, 8)

    def lin_w(k, fan_in, fan_out):
        return (jax.random.normal(k, (fan_in, fan_out), jnp.float32)
                / jnp.sqrt(jnp.float32(fan_in)))

    def stacked(k, fan_in, fan_out):
        return (jax.random.normal(k, (depth, fan_in, fan_out), jnp.float32)
                / jnp.sqrt(jnp.float32(fan_in)))

    return {
        # node embedder
        "emb_w": lin_w(ks[0], n_features, width),
        "emb_b": jnp.zeros((1, width), jnp.float32),
        # GraphNorm params (PyG defaults: weight=1, bias=0, mean_scale=1), stacked per block
        "gn_w": jnp.ones((depth, 1, width), jnp.float32),
        "gn_b": jnp.zeros((depth, 1, width), jnp.float32),
        "gn_s": jnp.ones((depth, 1, width), jnp.float32),
        # GraphConv 1 (lin_rel has bias, lin_root has no bias)
        "c1_rel_w": stacked(ks[1], width, width),
        "c1_rel_b": jnp.zeros((depth, 1, width), jnp.float32),
        "c1_root_w": stacked(ks[2], width, width),
        # GraphConv 2
        "c2_rel_w": stacked(ks[3], width, width),
        "c2_rel_b": jnp.zeros((depth, 1, width), jnp.float32),
        "c2_root_w": stacked(ks[4], width, width),
        # regressor
        "reg_w1": lin_w(ks[5], width, width),
        "reg_b1": jnp.zeros((1, width), jnp.float32),
        "reg_w2": lin_w(ks[6], width, 1),
        "reg_b2": jnp.zeros((1, 1), jnp.float32),
    }


def gnn_solver_forward(params, x, edge_index, edge_weight, batch_map, num_graphs):
    """Returns solution of shape [N] (== torch forward output after squeeze(-1))."""
    f32, bf16 = jnp.float32, jnp.bfloat16
    n, _ = x.shape
    depth = params["gn_w"].shape[0]
    w = params["emb_w"].shape[1]

    n_pad = _round_up(n, LANE)
    w_pad = _round_up(w, LANE)
    g_pad = _round_up(num_graphs, LANE)

    # TODO(synk): cache adj / bmat / bts across calls for static graphs (wrapper-side
    # construction is on the critical path), and replace the dense adjacency with a
    # row-tiled / scalar-prefetch sparse gather for production N.
    src, dst = edge_index[0], edge_index[1]
    adj = (jnp.zeros((n_pad, n_pad), f32)
           .at[dst, src].add(edge_weight.astype(f32))).astype(bf16)

    # Factored per-graph averaging: mean_n = B @ (Bt_scaled @ h).
    bmat_ng = jax.nn.one_hot(batch_map, num_graphs, dtype=f32)                 # [N, G]
    counts = jnp.maximum(jnp.sum(bmat_ng, axis=0, keepdims=True), 1.0)         # [1, G]
    bts_gn = (bmat_ng / counts).T                                              # [G, N]
    bmat = jnp.pad(bmat_ng, ((0, n_pad - n), (0, g_pad - num_graphs))).astype(bf16)
    bts = jnp.pad(bts_gn, ((0, g_pad - num_graphs), (0, n_pad - n))).astype(bf16)

    def pad2(a, rows, cols, dtype=f32):
        return jnp.pad(a, ((0, rows - a.shape[0]), (0, cols - a.shape[1]))).astype(dtype)

    # Embedder hoisted to the wrapper: one XLA matmul; frees x / emb_w VMEM for the depth loop.
    h0 = pad2(x.astype(f32) @ params["emb_w"] + params["emb_b"], n_pad, w_pad)

    # Consolidated per-block vectors [D, 8, W_pad] f32.
    vecs = jnp.concatenate([params["gn_w"], params["gn_b"], params["gn_s"],
                            params["c1_rel_b"], params["c2_rel_b"]], axis=1)   # [D, 5, W]
    vecs = jnp.pad(vecs, ((0, 0), (0, 8 - vecs.shape[1]), (0, w_pad - w)))

    # Fused conv weights [D, 2, 2*W_pad, W_pad] bf16: rows [0:W_pad]=rel_w, [W_pad:]=root_w.
    def pad_mats(a):
        return jnp.pad(a, ((0, 0), (0, w_pad - w), (0, w_pad - w)))
    c1 = jnp.concatenate([pad_mats(params["c1_rel_w"]), pad_mats(params["c1_root_w"])], axis=1)
    c2 = jnp.concatenate([pad_mats(params["c2_rel_w"]), pad_mats(params["c2_root_w"])], axis=1)
    mats = jnp.stack([c1, c2], axis=1).astype(bf16)                            # [D, 2, 2W, W]

    reg_w1 = pad2(params["reg_w1"], w_pad, w_pad, bf16)
    reg_b1 = pad2(params["reg_b1"], 1, w_pad)
    reg_w2t = pad2(params["reg_w2"].T, 1, w_pad, bf16)   # row vector -> lane-dense output
    reg_b2 = params["reg_b2"].astype(f32)                # [1, 1] -> SMEM scalar

    args = (h0, adj, bmat, bts, vecs, mats, reg_w1, reg_b1, reg_w2t, reg_b2)

    def nbytes(a):
        return int(a.size) * a.dtype.itemsize

    # Per-buffer VMEM accounting: x1 for single-buffered constant-index inputs, x2 for the
    # depth-indexed per-block slices, + residual scratch + double-buffered output block.
    consts = (h0, adj, bmat, bts, reg_w1, reg_b1, reg_w2t)
    need = (sum(nbytes(a) for a in consts)
            + 2 * (nbytes(vecs) + nbytes(mats)) // depth
            + n_pad * w_pad * 4
            + 2 * n_pad * 4)
    try:
        phys_vmem = int(pltpu.get_tpu_info().vmem_capacity_bytes)
    except Exception:
        phys_vmem = 64 * 1024 * 1024          # conservative (v7x per-TC size)
    cap = min(phys_vmem * 3 // 4, 100 * 1024 * 1024)
    vmem_limit = int(min(cap, max(need + (2 << 20), 16 * 1024 * 1024)))

    def run(single_buffer_consts):
        def const_spec(a):
            kw = {}
            if single_buffer_consts:
                # Constant block index across the grid -> one VMEM buffer is enough.
                kw["pipeline_mode"] = pl.Buffered(1)
            return pl.BlockSpec(a.shape, lambda d, nd=a.ndim: (0,) * nd, **kw)

        in_specs = [
            const_spec(h0), const_spec(adj), const_spec(bmat), const_spec(bts),
            pl.BlockSpec((1,) + vecs.shape[1:], lambda d: (d, 0, 0)),
            pl.BlockSpec((1,) + mats.shape[1:], lambda d: (d, 0, 0, 0)),
            const_spec(reg_w1), const_spec(reg_b1), const_spec(reg_w2t),
            pl.BlockSpec(memory_space=pltpu.MemorySpace.SMEM),
        ]
        return pl.pallas_call(
            gnn_solver_kernel,
            out_shape=jax.ShapeDtypeStruct((1, n_pad), f32),
            grid_spec=pltpu.PrefetchScalarGridSpec(
                num_scalar_prefetch=0,
                grid=(depth,),                      # depth axis: sequential residual carry
                in_specs=in_specs,
                out_specs=pl.BlockSpec((1, n_pad), lambda d: (0, 0)),
                scratch_shapes=[pltpu.VMEM((n_pad, w_pad), f32)],
            ),
            compiler_params=pltpu.CompilerParams(
                dimension_semantics=("arbitrary",),
                vmem_limit_bytes=vmem_limit,
            ),
        )(*args)

    try:
        out = run(True)
    except Exception:
        # TODO(synk): pipeline_mode=pl.Buffered(1) unsupported on this jax/backend; fall back
        # to default double-buffering of the constant-index inputs.
        out = run(False)
    return out[0, :n]


def _reference_forward(params, x, edge_index, edge_weight, batch_map, num_graphs,
                       *, mixed=True):
    """Pure-JAX reference.  mixed=True mirrors the kernel's bf16-operand / f32-accumulate
    math exactly; mixed=False is the original full-f32 module semantics."""
    f32, bf16 = jnp.float32, jnp.bfloat16
    n = x.shape[0]
    adj = (jnp.zeros((n, n), f32)
           .at[edge_index[1], edge_index[0]].add(edge_weight.astype(f32)))
    bmat = jax.nn.one_hot(batch_map, num_graphs, dtype=f32)                    # [N, G]
    counts = jnp.maximum(jnp.sum(bmat, axis=0, keepdims=True), 1.0)
    bts = (bmat / counts).T                                                    # [G, N]

    if mixed:
        def mm(a, b):
            return jnp.dot(a.astype(bf16), b.astype(bf16), preferred_element_type=f32)
    else:
        def mm(a, b):
            return jnp.dot(a, b, preferred_element_type=f32)

    h = x @ params["emb_w"] + params["emb_b"]
    depth = params["gn_w"].shape[0]
    for d in range(depth):
        mean_n = mm(bmat, mm(bts, h))
        cen = h - mean_n * params["gn_s"][d]
        msq_n = mm(bmat, mm(bts, cen * cen))
        xx = params["gn_w"][d] * cen * lax.rsqrt(msq_n + GN_EPS) + params["gn_b"][d]

        w1 = jnp.concatenate([params["c1_rel_w"][d], params["c1_root_w"][d]], axis=0)
        xx = mm(jnp.concatenate([mm(adj, xx), xx], axis=-1), w1) + params["c1_rel_b"][d]
        xx = _leaky_relu(xx)
        w2 = jnp.concatenate([params["c2_rel_w"][d], params["c2_root_w"][d]], axis=0)
        xx = mm(jnp.concatenate([mm(adj, xx), xx], axis=-1), w2) + params["c2_rel_b"][d]
        h = h + xx

    r = _leaky_relu(mm(h, params["reg_w1"]) + params["reg_b1"])
    return (mm(r, params["reg_w2"]) + params["reg_b2"])[:, 0]


if __name__ == "__main__":
    N_NODES, N_FEATURES, DEPTH, WIDTH = 64, 8, 2, 32
    N_EDGES, N_GRAPHS = 192, 2

    key = jax.random.PRNGKey(0)
    k_x, k_src, k_dst, k_w, k_params = jax.random.split(key, 5)

    x = jax.random.normal(k_x, (N_NODES, N_FEATURES), jnp.float32)
    edge_index = jnp.stack([
        jax.random.randint(k_src, (N_EDGES,), 0, N_NODES),
        jax.random.randint(k_dst, (N_EDGES,), 0, N_NODES),
    ], axis=0)                                                    # [2, E]
    edge_weight = jax.random.uniform(k_w, (N_EDGES,), jnp.float32)
    batch_map = jnp.concatenate([
        jnp.zeros((N_NODES // 2,), jnp.int32),
        jnp.ones((N_NODES - N_NODES // 2,), jnp.int32),
    ])                                                            # [N]

    params = init_params(k_params, N_FEATURES, DEPTH, WIDTH)

    solution = gnn_solver_forward(params, x, edge_index, edge_weight, batch_map, N_GRAPHS)
    solution = jax.block_until_ready(solution)
    assert solution.shape == (N_NODES,)
    assert bool(jnp.all(jnp.isfinite(solution)))

    # Same-math reference (bf16 MXU operands, f32 accumulation) -> tight tolerance.
    ref_same = _reference_forward(params, x, edge_index, edge_weight, batch_map, N_GRAPHS,
                                  mixed=True)
    assert jnp.allclose(solution, ref_same, atol=5e-3, rtol=5e-3), (
        float(jnp.max(jnp.abs(solution - ref_same))))

    # Original full-f32 module semantics -> looser tolerance for the bf16 operand casts.
    ref_f32 = _reference_forward(params, x, edge_index, edge_weight, batch_map, N_GRAPHS,
                                 mixed=False)
    assert jnp.allclose(solution, ref_f32, atol=1e-1, rtol=1e-1), (
        float(jnp.max(jnp.abs(solution - ref_f32))))

    print("KERNEL_OK")
</pallas_src>

<mosaic_0001>
module attributes {stable_mosaic.version = 11 : i64} {
  func.func @gnn_solver_kernel(%arg0: i32, %arg1: memref<128x128xf32, #tpu.memory_space<vmem>>, %arg2: memref<128x128xbf16, #tpu.memory_space<vmem>>, %arg3: memref<128x128xbf16, #tpu.memory_space<vmem>>, %arg4: memref<128x128xbf16, #tpu.memory_space<vmem>>, %arg5: memref<1x8x128xf32, #tpu.memory_space<vmem>>, %arg6: memref<1x2x256x128xbf16, #tpu.memory_space<vmem>>, %arg7: memref<128x128xbf16, #tpu.memory_space<vmem>>, %arg8: memref<1x128xf32, #tpu.memory_space<vmem>>, %arg9: memref<1x128xbf16, #tpu.memory_space<vmem>>, %arg10: memref<1x1xf32, #tpu.memory_space<smem>>, %arg11: memref<1x128xf32, #tpu.memory_space<vmem>>, %arg12: memref<128x128xf32, #tpu.memory_space<vmem>>) attributes {dimension_semantics = [#tpu.dimension_semantics<arbitrary>], iteration_bounds = array<i64: 2>, scalar_prefetch = 0 : i64, scratch_operands = 1 : i64, tpu.core_type = #tpu.core_type<tc>, window_params = [{pipeline_mode = #tpu.pipeline_mode<synchronous>, transform_indices = @transform_0, window_bounds = array<i64: 128, 128>}, {pipeline_mode = #tpu.pipeline_mode<synchronous>, transform_indices = @transform_1, window_bounds = array<i64: 128, 128>}, {pipeline_mode = #tpu.pipeline_mode<synchronous>, transform_indices = @transform_2, window_bounds = array<i64: 128, 128>}, {pipeline_mode = #tpu.pipeline_mode<synchronous>, transform_indices = @transform_3, window_bounds = array<i64: 128, 128>}, {transform_indices = @transform_4, window_bounds = array<i64: 1, 8, 128>}, {transform_indices = @transform_5, window_bounds = array<i64: 1, 2, 256, 128>}, {pipeline_mode = #tpu.pipeline_mode<synchronous>, transform_indices = @transform_6, window_bounds = array<i64: 128, 128>}, {pipeline_mode = #tpu.pipeline_mode<synchronous>, transform_indices = @transform_7, window_bounds = array<i64: 1, 128>}, {pipeline_mode = #tpu.pipeline_mode<synchronous>, transform_indices = @transform_8, window_bounds = array<i64: 1, 128>}, {transform_indices = @transform_9, window_bounds = array<i64: 1, 1>}, {pipeline_mode = #tpu.pipeline_mode<synchronous>, transform_indices = @transform_10, window_bounds = array<i64: 1, 128>}]} {
    %c0_i32 = arith.constant 0 : i32
    %0 = arith.cmpi eq, %arg0, %c0_i32 : i32
    %1 = arith.extui %0 : i1 to i32
    %c0_i32_0 = arith.constant 0 : i32
    %2 = arith.cmpi ne, %1, %c0_i32_0 : i32
    scf.if %2 {
      %c0_31 = arith.constant 0 : index
      %c0_32 = arith.constant 0 : index
      %62 = vector.load %arg1[%c0_31, %c0_32] : memref<128x128xf32, #tpu.memory_space<vmem>>, vector<128x128xf32>
      %c0_33 = arith.constant 0 : index
      %c0_34 = arith.constant 0 : index
      %63 = vector.load %arg12[%c0_33, %c0_34] : memref<128x128xf32, #tpu.memory_space<vmem>>, vector<128x128xf32>
      tpu.vector_store %arg12[%c0_33, %c0_34], %62 {strides = array<i32>} : memref<128x128xf32, #tpu.memory_space<vmem>>, vector<128x128xf32>,
    } else {
    }
    %c0 = arith.constant 0 : index
    %c0_1 = arith.constant 0 : index
    %3 = vector.load %arg12[%c0, %c0_1] : memref<128x128xf32, #tpu.memory_space<vmem>>, vector<128x128xf32>
    %c0_2 = arith.constant 0 : index
    %c0_3 = arith.constant 0 : index
    %4 = vector.load %arg2[%c0_2, %c0_3] : memref<128x128xbf16, #tpu.memory_space<vmem>>, vector<128x128xbf16>
    %c0_4 = arith.constant 0 : index
    %c0_5 = arith.constant 0 : index
    %5 = vector.load %arg3[%c0_4, %c0_5] : memref<128x128xbf16, #tpu.memory_space<vmem>>, vector<128x128xbf16>
    %c0_6 = arith.constant 0 : index
    %c0_7 = arith.constant 0 : index
    %6 = vector.load %arg4[%c0_6, %c0_7] : memref<128x128xbf16, #tpu.memory_space<vmem>>, vector<128x128xbf16>
    %c0_8 = arith.constant 0 : index
    %c0_9 = arith.constant 0 : index
    %c0_10 = arith.constant 0 : index
    %7 = vector.load %arg5[%c0_8, %c0_9, %c0_10] : memref<1x8x128xf32, #tpu.memory_space<vmem>>, vector<1x8x128xf32>
    %8 = vector.shape_cast %7 : vector<1x8x128xf32> to vector<8x128xf32>
    %9 = vector.extract_strided_slice %8 {offsets = [0, 0], sizes = [1, 128], strides = [1, 1]} : vector<8x128xf32> to vector<1x128xf32>
    %10 = vector.extract_strided_slice %8 {offsets = [1, 0], sizes = [1, 128], strides = [1, 1]} : vector<8x128xf32> to vector<1x128xf32>
    %11 = vector.extract_strided_slice %8 {offsets = [2, 0], sizes = [1, 128], strides = [1, 1]} : vector<8x128xf32> to vector<1x128xf32>
    %12 = vector.extract_strided_slice %8 {offsets = [3, 0], sizes = [1, 128], strides = [1, 1]} : vector<8x128xf32> to vector<1x128xf32>
    %13 = vector.extract_strided_slice %8 {offsets = [4, 0], sizes = [1, 128], strides = [1, 1]} : vector<8x128xf32> to vector<1x128xf32>
    %14 = arith.truncf %3 : vector<128x128xf32> to vector<128x128xbf16>
    %cst = arith.constant dense<0.000000e+00> : vector<128x128xf32>
    %15 = tpu.matmul %6, %14, %cst {dimension_numbers = #tpu.dot_dimension_numbers<[1], [0], [0], [1], [0, 0, 1, 1], [], []>} : vector<128x128xbf16>, vector<128x128xbf16>, vector<128x128xf32> -> vector<128x128xf32>
    %16 = arith.truncf %15 : vector<128x128xf32> to vector<128x128xbf16>
    %cst_11 = arith.constant dense<0.000000e+00> : vector<128x128xf32>
    %17 = tpu.matmul %5, %16, %cst_11 {dimension_numbers = #tpu.dot_dimension_numbers<[1], [0], [0], [1], [0, 0, 1, 1], [], []>} : vector<128x128xbf16>, vector<128x128xbf16>, vector<128x128xf32> -> vector<128x128xf32>
    %18 = vector.broadcast %11 : vector<1x128xf32> to vector<128x128xf32>
    %19 = arith.mulf %17, %18 : vector<128x128xf32>
    %20 = arith.subf %3, %19 : vector<128x128xf32>
    %21 = arith.mulf %20, %20 : vector<128x128xf32>
    %22 = arith.truncf %21 : vector<128x128xf32> to vector<128x128xbf16>
    %cst_12 = arith.constant dense<0.000000e+00> : vector<128x128xf32>
    %23 = tpu.matmul %6, %22, %cst_12 {dimension_numbers = #tpu.dot_dimension_numbers<[1], [0], [0], [1], [0, 0, 1, 1], [], []>} : vector<128x128xbf16>, vector<128x128xbf16>, vector<128x128xf32> -> vector<128x128xf32>
    %24 = arith.truncf %23 : vector<128x128xf32> to vector<128x128xbf16>
    %cst_13 = arith.constant dense<0.000000e+00> : vector<128x128xf32>
    %25 = tpu.matmul %5, %24, %cst_13 {dimension_numbers = #tpu.dot_dimension_numbers<[1], [0], [0], [1], [0, 0, 1, 1], [], []>} : vector<128x128xbf16>, vector<128x128xbf16>, vector<128x128xf32> -> vector<128x128xf32>
    %26 = vector.broadcast %9 : vector<1x128xf32> to vector<128x128xf32>
    %27 = arith.mulf %26, %20 : vector<128x128xf32>
    %cst_14 = arith.constant 9.99999974E-6 : f32
    %28 = vector.broadcast %cst_14 : f32 to vector<128x128xf32>
    %29 = arith.addf %25, %28 : vector<128x128xf32>
    %30 = math.rsqrt %29 : vector<128x128xf32>
    %31 = arith.mulf %27, %30 : vector<128x128xf32>
    %32 = vector.broadcast %10 : vector<1x128xf32> to vector<128x128xf32>
    %33 = arith.addf %31, %32 : vector<128x128xf32>
    %34 = arith.truncf %33 : vector<128x128xf32> to vector<128x128xbf16>
    %cst_15 = arith.constant dense<0.000000e+00> : vector<128x128xf32>
    %35 = tpu.matmul %4, %34, %cst_15 {dimension_numbers = #tpu.dot_dimension_numbers<[1], [0], [0], [1], [0, 0, 1, 1], [], []>} : vector<128x128xbf16>, vector<128x128xbf16>, vector<128x128xf32> -> vector<128x128xf32>
    %36 = arith.truncf %35 : vector<128x128xf32> to vector<128x128xbf16>
    %37 = tpu.concatenate %36, %34 in 1 : vector<128x128xbf16>, vector<128x128xbf16> -> vector<128x256xbf16>
    %c0_16 = arith.constant 0 : index
    %c0_17 = arith.constant 0 : index
    %c0_18 = arith.constant 0 : index
    %c0_19 = arith.constant 0 : index
    %38 = vector.load %arg6[%c0_16, %c0_17, %c0_18, %c0_19] : memref<1x2x256x128xbf16, #tpu.memory_space<vmem>>, vector<1x1x256x128xbf16>
    %39 = vector.shape_cast %38 : vector<1x1x256x128xbf16> to vector<256x128xbf16>
    %cst_20 = arith.constant dense<0.000000e+00> : vector<128x128xf32>
    %40 = tpu.matmul %37, %39, %cst_20 {dimension_numbers = #tpu.dot_dimension_numbers<[1], [0], [0], [1], [0, 0, 1, 1], [], []>} : vector<128x256xbf16>, vector<256x128xbf16>, vector<128x128xf32> -> vector<128x128xf32>
    %41 = vector.broadcast %12 : vector<1x128xf32> to vector<128x128xf32>
    %42 = arith.addf %40, %41 : vector<128x128xf32>
    %cst_21 = arith.constant 0.000000e+00 : f32
    %43 = vector.broadcast %cst_21 : f32 to vector<128x128xf32>
    %44 = arith.cmpf ogt, %42, %43 : vector<128x128xf32>
    %cst_22 = arith.constant 1.000000e-01 : f32
    %45 = vector.broadcast %cst_22 : f32 to vector<128x128xf32>
    %46 = arith.mulf %45, %42 : vector<128x128xf32>
    %47 = arith.select %44, %42, %46 : vector<128x128xi1>, vector<128x128xf32>
    %48 = arith.truncf %47 : vector<128x128xf32> to vector<128x128xbf16>
    %cst_23 = arith.constant dense<0.000000e+00> : vector<128x128xf32>
    %49 = tpu.matmul %4, %48, %cst_23 {dimension_numbers = #tpu.dot_dimension_numbers<[1], [0], [0], [1], [0, 0, 1, 1], [], []>} : vector<128x128xbf16>, vector<128x128xbf16>, vector<128x128xf32> -> vector<128x128xf32>
    %50 = arith.truncf %49 : vector<128x128xf32> to vector<128x128xbf16>
    %51 = tpu.concatenate %50, %48 in 1 : vector<128x128xbf16>, vector<128x128xbf16> -> vector<128x256xbf16>
    %c0_24 = arith.constant 0 : index
    %c1 = arith.constant 1 : index
    %c0_25 = arith.constant 0 : index
    %c0_26 = arith.constant 0 : index
    %52 = vector.load %arg6[%c0_24, %c1, %c0_25, %c0_26] : memref<1x2x256x128xbf16, #tpu.memory_space<vmem>>, vector<1x1x256x128xbf16>
    %53 = vector.shape_cast %52 : vector<1x1x256x128xbf16> to vector<256x128xbf16>
    %cst_27 = arith.constant dense<0.000000e+00> : vector<128x128xf32>
    %54 = tpu.matmul %51, %53, %cst_27 {dimension_numbers = #tpu.dot_dimension_numbers<[1], [0], [0], [1], [0, 0, 1, 1], [], []>} : vector<128x256xbf16>, vector<256x128xbf16>, vector<128x128xf32> -> vector<128x128xf32>
    %55 = vector.broadcast %13 : vector<1x128xf32> to vector<128x128xf32>
    %56 = arith.addf %54, %55 : vector<128x128xf32>
    %57 = arith.addf %3, %56 : vector<128x128xf32>
    %c0_28 = arith.constant 0 : index
    %c0_29 = arith.constant 0 : index
    %58 = vector.load %arg12[%c0_28, %c0_29] : memref<128x128xf32, #tpu.memory_space<vmem>>, vector<128x128xf32>
    tpu.vector_store %arg12[%c0_28, %c0_29], %57 {strides = array<i32>} : memref<128x128xf32, #tpu.memory_space<vmem>>, vector<128x128xf32>,
    %c1_i32 = arith.constant 1 : i32
    %59 = arith.cmpi eq, %arg0, %c1_i32 : i32
    %60 = arith.extui %59 : i1 to i32
    %c0_i32_30 = arith.constant 0 : i32
    %61 = arith.cmpi ne, %60, %c0_i32_30 : i32
    scf.if %61 {
      %c0_31 = arith.constant 0 : index
      %c0_32 = arith.constant 0 : index
      %62 = vector.load %arg12[%c0_31, %c0_32] : memref<128x128xf32, #tpu.memory_space<vmem>>, vector<128x128xf32>
      %63 = arith.truncf %62 : vector<128x128xf32> to vector<128x128xbf16>
      %c0_33 = arith.constant 0 : index
      %c0_34 = arith.constant 0 : index
      %64 = vector.load %arg7[%c0_33, %c0_34] : memref<128x128xbf16, #tpu.memory_space<vmem>>, vector<128x128xbf16>
      %cst_35 = arith.constant dense<0.000000e+00> : vector<128x128xf32>
      %65 = tpu.matmul %63, %64, %cst_35 {dimension_numbers = #tpu.dot_dimension_numbers<[1], [0], [0], [1], [0, 0, 1, 1], [], []>} : vector<128x128xbf16>, vector<128x128xbf16>, vector<128x128xf32> -> vector<128x128xf32>
      %c0_36 = arith.constant 0 : index
      %c0_37 = arith.constant 0 : index
      %66 = vector.load %arg8[%c0_36, %c0_37] : memref<1x128xf32, #tpu.memory_space<vmem>>, vector<1x128xf32>
      %67 = vector.broadcast %66 : vector<1x128xf32> to vector<128x128xf32>
      %68 = arith.addf %65, %67 : vector<128x128xf32>
      %cst_38 = arith.constant 0.000000e+00 : f32
      %69 = vector.broadcast %cst_38 : f32 to vector<128x128xf32>
      %70 = arith.cmpf ogt, %68, %69 : vector<128x128xf32>
      %cst_39 = arith.constant 1.000000e-01 : f32
      %71 = vector.broadcast %cst_39 : f32 to vector<128x128xf32>
      %72 = arith.mulf %71, %68 : vector<128x128xf32>
      %73 = arith.select %70, %68, %72 : vector<128x128xi1>, vector<128x128xf32>
      %c0_40 = arith.constant 0 : index
      %c0_41 = arith.constant 0 : index
      %74 = vector.load %arg9[%c0_40, %c0_41] : memref<1x128xbf16, #tpu.memory_space<vmem>>, vector<1x128xbf16>
      %75 = arith.truncf %73 : vector<128x128xf32> to vector<128x128xbf16>
      %cst_42 = arith.constant dense<0.000000e+00> : vector<1x128xf32>
      %76 = tpu.matmul %74, %75, %cst_42 {dimension_numbers = #tpu.dot_dimension_numbers<[1], [1], [0], [0], [0, 0, 1, 0], [], []>} : vector<1x128xbf16>, vector<128x128xbf16>, vector<1x128xf32> -> vector<1x128xf32>
      %c0_43 = arith.constant 0 : index
      %c0_44 = arith.constant 0 : index
      %77 = memref.load %arg10[%c0_43, %c0_44] : memref<1x1xf32, #tpu.memory_space<smem>>
      %78 = vector.broadcast %77 : f32 to vector<1x128xf32>
      %79 = arith.addf %76, %78 : vector<1x128xf32>
      %c0_45 = arith.constant 0 : index
      %c0_46 = arith.constant 0 : index
      %80 = vector.load %arg11[%c0_45, %c0_46] : memref<1x128xf32, #tpu.memory_space<vmem>>, vector<1x128xf32>
      tpu.vector_store %arg11[%c0_45, %c0_46], %79 {strides = array<i32>} : memref<1x128xf32, #tpu.memory_space<vmem>>, vector<1x128xf32>,
    } else {
    }
    return
  }
  func.func @transform_0(%arg0: i32) -> (i32, i32) {
    %c0_i32 = arith.constant 0 : i32
    %c0_i32_0 = arith.constant 0 : i32
    %c0_i32_1 = arith.constant 0 : i32
    return %c0_i32, %c0_i32_0 : i32, i32
  }
  func.func @transform_1(%arg0: i32) -> (i32, i32) {
    %c0_i32 = arith.constant 0 : i32
    %c0_i32_0 = arith.constant 0 : i32
    %c0_i32_1 = arith.constant 0 : i32
    return %c0_i32, %c0_i32_0 : i32, i32
  }
  func.func @transform_2(%arg0: i32) -> (i32, i32) {
    %c0_i32 = arith.constant 0 : i32
    %c0_i32_0 = arith.constant 0 : i32
    %c0_i32_1 = arith.constant 0 : i32
    return %c0_i32, %c0_i32_0 : i32, i32
  }
  func.func @transform_3(%arg0: i32) -> (i32, i32) {
    %c0_i32 = arith.constant 0 : i32
    %c0_i32_0 = arith.constant 0 : i32
    %c0_i32_1 = arith.constant 0 : i32
    return %c0_i32, %c0_i32_0 : i32, i32
  }
  func.func @transform_4(%arg0: i32) -> (i32, i32, i32) {
    %c0_i32 = arith.constant 0 : i32
    %c0_i32_0 = arith.constant 0 : i32
    %c0_i32_1 = arith.constant 0 : i32
    return %arg0, %c0_i32, %c0_i32_0 : i32, i32, i32
  }
  func.func @transform_5(%arg0: i32) -> (i32, i32, i32, i32) {
    %c0_i32 = arith.constant 0 : i32
    %c0_i32_0 = arith.constant 0 : i32
    %c0_i32_1 = arith.constant 0 : i32
    %c0_i32_2 = arith.constant 0 : i32
    return %arg0, %c0_i32, %c0_i32_0, %c0_i32_1 : i32, i32, i32, i32
  }
  func.func @transform_6(%arg0: i32) -> (i32, i32) {
    %c0_i32 = arith.constant 0 : i32
    %c0_i32_0 = arith.constant 0 : i32
    %c0_i32_1 = arith.constant 0 : i32
    return %c0_i32, %c0_i32_0 : i32, i32
  }
  func.func @transform_7(%arg0: i32) -> (i32, i32) {
    %c0_i32 = arith.constant 0 : i32
    %c0_i32_0 = arith.constant 0 : i32
    %c0_i32_1 = arith.constant 0 : i32
    return %c0_i32, %c0_i32_0 : i32, i32
  }
  func.func @transform_8(%arg0: i32) -> (i32, i32) {
    %c0_i32 = arith.constant 0 : i32
    %c0_i32_0 = arith.constant 0 : i32
    %c0_i32_1 = arith.constant 0 : i32
    return %c0_i32, %c0_i32_0 : i32, i32
  }
  func.func @transform_9(%arg0: i32) -> (i32, i32) {
    %c0_i32 = arith.constant 0 : i32
    %c0_i32_0 = arith.constant 0 : i32
    %c0_i32_1 = arith.constant 0 : i32
    return %c0_i32, %c0_i32_0 : i32, i32
  }
  func.func @transform_10(%arg0: i32) -> (i32, i32) {
    %c0_i32 = arith.constant 0 : i32
    %c0_i32_0 = arith.constant 0 : i32
    %c0_i32_1 = arith.constant 0 : i32
    return %c0_i32, %c0_i32_0 : i32, i32
  }
}

module attributes {stable_mosaic.version = 11 : i64} {
  func.func @gnn_solver_kernel(%arg0: i32, %arg1: memref<128x128xf32, #tpu.memory_space<vmem>>, %arg2: memref<128x128xbf16, #tpu.memory_space<vmem>>, %arg3: memref<128x128xbf16, #tpu.memory_space<vmem>>, %arg4: memref<128x128xbf16, #tpu.memory_space<vmem>>, %arg5: memref<1x8x128xf32, #tpu.memory_space<vmem>>, %arg6: memref<1x2x256x128xbf16, #tpu.memory_space<vmem>>, %arg7: memref<128x128xbf16, #tpu.memory_space<vmem>>, %arg8: memref<1x128xf32, #tpu.memory_space<vmem>>, %arg9: memref<1x128xbf16, #tpu.memory_space<vmem>>, %arg10: memref<1x1xf32, #tpu.memory_space<smem>>, %arg11: memref<1x128xf32, #tpu.memory_space<vmem>>, %arg12: memref<128x128xf32, #tpu.memory_space<vmem>>) attributes {dimension_semantics = [#tpu.dimension_semantics<arbitrary>], iteration_bounds = array<i64: 2>, scalar_prefetch = 0 : i64, scratch_operands = 1 : i64, tpu.core_type = #tpu.core_type<tc>, window_params = [{pipeline_mode = #tpu.pipeline_mode<synchronous>, transform_indices = @transform_0, window_bounds = array<i64: 128, 128>}, {pipeline_mode = #tpu.pipeline_mode<synchronous>, transform_indices = @transform_1, window_bounds = array<i64: 128, 128>}, {pipeline_mode = #tpu.pipeline_mode<synchronous>, transform_indices = @transform_2, window_bounds = array<i64: 128, 128>}, {pipeline_mode = #tpu.pipeline_mode<synchronous>, transform_indices = @transform_3, window_bounds = array<i64: 128, 128>}, {transform_indices = @transform_4, window_bounds = array<i64: 1, 8, 128>}, {transform_indices = @transform_5, window_bounds = array<i64: 1, 2, 256, 128>}, {pipeline_mode = #tpu.pipeline_mode<synchronous>, transform_indices = @transform_6, window_bounds = array<i64: 128, 128>}, {pipeline_mode = #tpu.pipeline_mode<synchronous>, transform_indices = @transform_7, window_bounds = array<i64: 1, 128>}, {pipeline_mode = #tpu.pipeline_mode<synchronous>, transform_indices = @transform_8, window_bounds = array<i64: 1, 128>}, {transform_indices = @transform_9, window_bounds = array<i64: 1, 1>}, {pipeline_mode = #tpu.pipeline_mode<synchronous>, transform_indices = @transform_10, window_bounds = array<i64: 1, 128>}]} {
    %c0_i32 = arith.constant 0 : i32
    %0 = arith.cmpi eq, %arg0, %c0_i32 : i32
    %1 = arith.extui %0 : i1 to i32
    %c0_i32_0 = arith.constant 0 : i32
    %2 = arith.cmpi ne, %1, %c0_i32_0 : i32
    scf.if %2 {
      %c0_31 = arith.constant 0 : index
      %c0_32 = arith.constant 0 : index
      %62 = vector.load %arg1[%c0_31, %c0_32] : memref<128x128xf32, #tpu.memory_space<vmem>>, vector<128x128xf32>
      %c0_33 = arith.constant 0 : index
      %c0_34 = arith.constant 0 : index
      %63 = vector.load %arg12[%c0_33, %c0_34] : memref<128x128xf32, #tpu.memory_space<vmem>>, vector<128x128xf32>
      tpu.vector_store %arg12[%c0_33, %c0_34], %62 {strides = array<i32>} : memref<128x128xf32, #tpu.memory_space<vmem>>, vector<128x128xf32>,
    } else {
    }
    %c0 = arith.constant 0 : index
    %c0_1 = arith.constant 0 : index
    %3 = vector.load %arg12[%c0, %c0_1] : memref<128x128xf32, #tpu.memory_space<vmem>>, vector<128x128xf32>
    %c0_2 = arith.constant 0 : index
    %c0_3 = arith.constant 0 : index
    %4 = vector.load %arg2[%c0_2, %c0_3] : memref<128x128xbf16, #tpu.memory_space<vmem>>, vector<128x128xbf16>
    %c0_4 = arith.constant 0 : index
    %c0_5 = arith.constant 0 : index
    %5 = vector.load %arg3[%c0_4, %c0_5] : memref<128x128xbf16, #tpu.memory_space<vmem>>, vector<128x128xbf16>
    %c0_6 = arith.constant 0 : index
    %c0_7 = arith.constant 0 : index
    %6 = vector.load %arg4[%c0_6, %c0_7] : memref<128x128xbf16, #tpu.memory_space<vmem>>, vector<128x128xbf16>
    %c0_8 = arith.constant 0 : index
    %c0_9 = arith.constant 0 : index
    %c0_10 = arith.constant 0 : index
    %7 = vector.load %arg5[%c0_8, %c0_9, %c0_10] : memref<1x8x128xf32, #tpu.memory_space<vmem>>, vector<1x8x128xf32>
    %8 = vector.shape_cast %7 : vector<1x8x128xf32> to vector<8x128xf32>
    %9 = vector.extract_strided_slice %8 {offsets = [0, 0], sizes = [1, 128], strides = [1, 1]} : vector<8x128xf32> to vector<1x128xf32>
    %10 = vector.extract_strided_slice %8 {offsets = [1, 0], sizes = [1, 128], strides = [1, 1]} : vector<8x128xf32> to vector<1x128xf32>
    %11 = vector.extract_strided_slice %8 {offsets = [2, 0], sizes = [1, 128], strides = [1, 1]} : vector<8x128xf32> to vector<1x128xf32>
    %12 = vector.extract_strided_slice %8 {offsets = [3, 0], sizes = [1, 128], strides = [1, 1]} : vector<8x128xf32> to vector<1x128xf32>
    %13 = vector.extract_strided_slice %8 {offsets = [4, 0], sizes = [1, 128], strides = [1, 1]} : vector<8x128xf32> to vector<1x128xf32>
    %14 = arith.truncf %3 : vector<128x128xf32> to vector<128x128xbf16>
    %cst = arith.constant dense<0.000000e+00> : vector<128x128xf32>
    %15 = tpu.matmul %6, %14, %cst {dimension_numbers = #tpu.dot_dimension_numbers<[1], [0], [0], [1], [0, 0, 1, 1], [], []>} : vector<128x128xbf16>, vector<128x128xbf16>, vector<128x128xf32> -> vector<128x128xf32>
    %16 = arith.truncf %15 : vector<128x128xf32> to vector<128x128xbf16>
    %cst_11 = arith.constant dense<0.000000e+00> : vector<128x128xf32>
    %17 = tpu.matmul %5, %16, %cst_11 {dimension_numbers = #tpu.dot_dimension_numbers<[1], [0], [0], [1], [0, 0, 1, 1], [], []>} : vector<128x128xbf16>, vector<128x128xbf16>, vector<128x128xf32> -> vector<128x128xf32>
    %18 = vector.broadcast %11 : vector<1x128xf32> to vector<128x128xf32>
    %19 = arith.mulf %17, %18 : vector<128x128xf32>
    %20 = arith.subf %3, %19 : vector<128x128xf32>
    %21 = arith.mulf %20, %20 : vector<128x128xf32>
    %22 = arith.truncf %21 : vector<128x128xf32> to vector<128x128xbf16>
    %cst_12 = arith.constant dense<0.000000e+00> : vector<128x128xf32>
    %23 = tpu.matmul %6, %22, %cst_12 {dimension_numbers = #tpu.dot_dimension_numbers<[1], [0], [0], [1], [0, 0, 1, 1], [], []>} : vector<128x128xbf16>, vector<128x128xbf16>, vector<128x128xf32> -> vector<128x128xf32>
    %24 = arith.truncf %23 : vector<128x128xf32> to vector<128x128xbf16>
    %cst_13 = arith.constant dense<0.000000e+00> : vector<128x128xf32>
    %25 = tpu.matmul %5, %24, %cst_13 {dimension_numbers = #tpu.dot_dimension_numbers<[1], [0], [0], [1], [0, 0, 1, 1], [], []>} : vector<128x128xbf16>, vector<128x128xbf16>, vector<128x128xf32> -> vector<128x128xf32>
    %26 = vector.broadcast %9 : vector<1x128xf32> to vector<128x128xf32>
    %27 = arith.mulf %26, %20 : vector<128x128xf32>
    %cst_14 = arith.constant 9.99999974E-6 : f32
    %28 = vector.broadcast %cst_14 : f32 to vector<128x128xf32>
    %29 = arith.addf %25, %28 : vector<128x128xf32>
    %30 = math.rsqrt %29 : vector<128x128xf32>
    %31 = arith.mulf %27, %30 : vector<128x128xf32>
    %32 = vector.broadcast %10 : vector<1x128xf32> to vector<128x128xf32>
    %33 = arith.addf %31, %32 : vector<128x128xf32>
    %34 = arith.truncf %33 : vector<128x128xf32> to vector<128x128xbf16>
    %cst_15 = arith.constant dense<0.000000e+00> : vector<128x128xf32>
    %35 = tpu.matmul %4, %34, %cst_15 {dimension_numbers = #tpu.dot_dimension_numbers<[1], [0], [0], [1], [0, 0, 1, 1], [], []>} : vector<128x128xbf16>, vector<128x128xbf16>, vector<128x128xf32> -> vector<128x128xf32>
    %36 = arith.truncf %35 : vector<128x128xf32> to vector<128x128xbf16>
    %37 = tpu.concatenate %36, %34 in 1 : vector<128x128xbf16>, vector<128x128xbf16> -> vector<128x256xbf16>
    %c0_16 = arith.constant 0 : index
    %c0_17 = arith.constant 0 : index
    %c0_18 = arith.constant 0 : index
    %c0_19 = arith.constant 0 : index
    %38 = vector.load %arg6[%c0_16, %c0_17, %c0_18, %c0_19] : memref<1x2x256x128xbf16, #tpu.memory_space<vmem>>, vector<1x1x256x128xbf16>
    %39 = vector.shape_cast %38 : vector<1x1x256x128xbf16> to vector<256x128xbf16>
    %cst_20 = arith.constant dense<0.000000e+00> : vector<128x128xf32>
    %40 = tpu.matmul %37, %39, %cst_20 {dimension_numbers = #tpu.dot_dimension_numbers<[1], [0], [0], [1], [0, 0, 1, 1], [], []>} : vector<128x256xbf16>, vector<256x128xbf16>, vector<128x128xf32> -> vector<128x128xf32>
    %41 = vector.broadcast %12 : vector<1x128xf32> to vector<128x128xf32>
    %42 = arith.addf %40, %41 : vector<128x128xf32>
    %cst_21 = arith.constant 0.000000e+00 : f32
    %43 = vector.broadcast %cst_21 : f32 to vector<128x128xf32>
    %44 = arith.cmpf ogt, %42, %43 : vector<128x128xf32>
    %cst_22 = arith.constant 1.000000e-01 : f32
    %45 = vector.broadcast %cst_22 : f32 to vector<128x128xf32>
    %46 = arith.mulf %45, %42 : vector<128x128xf32>
    %47 = arith.select %44, %42, %46 : vector<128x128xi1>, vector<128x128xf32>
    %48 = arith.truncf %47 : vector<128x128xf32> to vector<128x128xbf16>
    %cst_23 = arith.constant dense<0.000000e+00> : vector<128x128xf32>
    %49 = tpu.matmul %4, %48, %cst_23 {dimension_numbers = #tpu.dot_dimension_numbers<[1], [0], [0], [1], [0, 0, 1, 1], [], []>} : vector<128x128xbf16>, vector<128x128xbf16>, vector<128x128xf32> -> vector<128x128xf32>
    %50 = arith.truncf %49 : vector<128x128xf32> to vector<128x128xbf16>
    %51 = tpu.concatenate %50, %48 in 1 : vector<128x128xbf16>, vector<128x128xbf16> -> vector<128x256xbf16>
    %c0_24 = arith.constant 0 : index
    %c1 = arith.constant 1 : index
    %c0_25 = arith.constant 0 : index
    %c0_26 = arith.constant 0 : index
    %52 = vector.load %arg6[%c0_24, %c1, %c0_25, %c0_26] : memref<1x2x256x128xbf16, #tpu.memory_space<vmem>>, vector<1x1x256x128xbf16>
    %53 = vector.shape_cast %52 : vector<1x1x256x128xbf16> to vector<256x128xbf16>
    %cst_27 = arith.constant dense<0.000000e+00> : vector<128x128xf32>
    %54 = tpu.matmul %51, %53, %cst_27 {dimension_numbers = #tpu.dot_dimension_numbers<[1], [0], [0], [1], [0, 0, 1, 1], [], []>} : vector<128x256xbf16>, vector<256x128xbf16>, vector<128x128xf32> -> vector<128x128xf32>
    %55 = vector.broadcast %13 : vector<1x128xf32> to vector<128x128xf32>
    %56 = arith.addf %54, %55 : vector<128x128xf32>
    %57 = arith.addf %3, %56 : vector<128x128xf32>
    %c0_28 = arith.constant 0 : index
    %c0_29 = arith.constant 0 : index
    %58 = vector.load %arg12[%c0_28, %c0_29] : memref<128x128xf32, #tpu.memory_space<vmem>>, vector<128x128xf32>
    tpu.vector_store %arg12[%c0_28, %c0_29], %57 {strides = array<i32>} : memref<128x128xf32, #tpu.memory_space<vmem>>, vector<128x128xf32>,
    %c1_i32 = arith.constant 1 : i32
    %59 = arith.cmpi eq, %arg0, %c1_i32 : i32
    %60 = arith.extui %59 : i1 to i32
    %c0_i32_30 = arith.constant 0 : i32
    %61 = arith.cmpi ne, %60, %c0_i32_30 : i32
    scf.if %61 {
      %c0_31 = arith.constant 0 : index
      %c0_32 = arith.constant 0 : index
      %62 = vector.load %arg12[%c0_31, %c0_32] : memref<128x128xf32, #tpu.memory_space<vmem>>, vector<128x128xf32>
      %63 = arith.truncf %62 : vector<128x128xf32> to vector<128x128xbf16>
      %c0_33 = arith.constant 0 : index
      %c0_34 = arith.constant 0 : index
      %64 = vector.load %arg7[%c0_33, %c0_34] : memref<128x128xbf16, #tpu.memory_space<vmem>>, vector<128x128xbf16>
      %cst_35 = arith.constant dense<0.000000e+00> : vector<128x128xf32>
      %65 = tpu.matmul %63, %64, %cst_35 {dimension_numbers = #tpu.dot_dimension_numbers<[1], [0], [0], [1], [0, 0, 1, 1], [], []>} : vector<128x128xbf16>, vector<128x128xbf16>, vector<128x128xf32> -> vector<128x128xf32>
      %c0_36 = arith.constant 0 : index
      %c0_37 = arith.constant 0 : index
      %66 = vector.load %arg8[%c0_36, %c0_37] : memref<1x128xf32, #tpu.memory_space<vmem>>, vector<1x128xf32>
      %67 = vector.broadcast %66 : vector<1x128xf32> to vector<128x128xf32>
      %68 = arith.addf %65, %67 : vector<128x128xf32>
      %cst_38 = arith.constant 0.000000e+00 : f32
      %69 = vector.broadcast %cst_38 : f32 to vector<128x128xf32>
      %70 = arith.cmpf ogt, %68, %69 : vector<128x128xf32>
      %cst_39 = arith.constant 1.000000e-01 : f32
      %71 = vector.broadcast %cst_39 : f32 to vector<128x128xf32>
      %72 = arith.mulf %71, %68 : vector<128x128xf32>
      %73 = arith.select %70, %68, %72 : vector<128x128xi1>, vector<128x128xf32>
      %c0_40 = arith.constant 0 : index
      %c0_41 = arith.constant 0 : index
      %74 = vector.load %arg9[%c0_40, %c0_41] : memref<1x128xbf16, #tpu.memory_space<vmem>>, vector<1x128xbf16>
      %75 = arith.truncf %73 : vector<128x128xf32> to vector<128x128xbf16>
      %cst_42 = arith.constant dense<0.000000e+00> : vector<1x128xf32>
      %76 = tpu.matmul %74, %75, %cst_42 {dimension_numbers = #tpu.dot_dimension_numbers<[1], [1], [0], [0], [0, 0, 1, 0], [], []>} : vector<1x128xbf16>, vector<128x128xbf16>, vector<1x128xf32> -> vector<1x128xf32>
      %c0_43 = arith.constant 0 : index
      %c0_44 = arith.constant 0 : index
      %77 = memref.load %arg10[%c0_43, %c0_44] : memref<1x1xf32, #tpu.memory_space<smem>>
      %78 = vector.broadcast %77 : f32 to vector<1x128xf32>
      %79 = arith.addf %76, %78 : vector<1x128xf32>
      %c0_45 = arith.constant 0 : index
      %c0_46 = arith.constant 0 : index
      %80 = vector.load %arg11[%c0_45, %c0_46] : memref<1x128xf32, #tpu.memory_space<vmem>>, vector<1x128xf32>
      tpu.vector_store %arg11[%c0_45, %c0_46], %79 {strides = array<i32>} : memref<1x128xf32, #tpu.memory_space<vmem>>, vector<1x128xf32>,
    } else {
    }
    return
  }
  func.func @transform_0(%arg0: i32) -> (i32, i32) {
    %c0_i32 = arith.constant 0 : i32
    %c0_i32_0 = arith.constant 0 : i32
    %c0_i32_1 = arith.constant 0 : i32
    return %c0_i32, %c0_i32_0 : i32, i32
  }
  func.func @transform_1(%arg0: i32) -> (i32, i32) {
    %c0_i32 = arith.constant 0 : i32
    %c0_i32_0 = arith.constant 0 : i32
    %c0_i32_1 = arith.constant 0 : i32
    return %c0_i32, %c0_i32_0 : i32, i32
  }
  func.func @transform_2(%arg0: i32) -> (i32, i32) {
    %c0_i32 = arith.constant 0 : i32
    %c0_i32_0 = arith.constant 0 : i32
    %c0_i32_1 = arith.constant 0 : i32
    return %c0_i32, %c0_i32_0 : i32, i32
  }
  func.func @transform_3(%arg0: i32) -> (i32, i32) {
    %c0_i32 = arith.constant 0 : i32
    %c0_i32_0 = arith.constant 0 : i32
    %c0_i32_1 = arith.constant 0 : i32
    return %c0_i32, %c0_i32_0 : i32, i32
  }
  func.func @transform_4(%arg0: i32) -> (i32, i32, i32) {
    %c0_i32 = arith.constant 0 : i32
    %c0_i32_0 = arith.constant 0 : i32
    %c0_i32_1 = arith.constant 0 : i32
    return %arg0, %c0_i32, %c0_i32_0 : i32, i32, i32
  }
  func.func @transform_5(%arg0: i32) -> (i32, i32, i32, i32) {
    %c0_i32 = arith.constant 0 : i32
    %c0_i32_0 = arith.constant 0 : i32
    %c0_i32_1 = arith.constant 0 : i32
    %c0_i32_2 = arith.constant 0 : i32
    return %arg0, %c0_i32, %c0_i32_0, %c0_i32_1 : i32, i32, i32, i32
  }
  func.func @transform_6(%arg0: i32) -> (i32, i32) {
    %c0_i32 = arith.constant 0 : i32
    %c0_i32_0 = arith.constant 0 : i32
    %c0_i32_1 = arith.constant 0 : i32
    return %c0_i32, %c0_i32_0 : i32, i32
  }
  func.func @transform_7(%arg0: i32) -> (i32, i32) {
    %c0_i32 = arith.constant 0 : i32
    %c0_i32_0 = arith.constant 0 : i32
    %c0_i32_1 = arith.constant 0 : i32
    return %c0_i32, %c0_i32_0 : i32, i32
  }
  func.func @transform_8(%arg0: i32) -> (i32, i32) {
    %c0_i32 = arith.constant 0 : i32
    %c0_i32_0 = arith.constant 0 : i32
    %c0_i32_1 = arith.constant 0 : i32
    return %c0_i32, %c0_i32_0 : i32, i32
  }
  func.func @transform_9(%arg0: i32) -> (i32, i32) {
    %c0_i32 = arith.constant 0 : i32
    %c0_i32_0 = arith.constant 0 : i32
    %c0_i32_1 = arith.constant 0 : i32
    return %c0_i32, %c0_i32_0 : i32, i32
  }
  func.func @transform_10(%arg0: i32) -> (i32, i32) {
    %c0_i32 = arith.constant 0 : i32
    %c0_i32_0 = arith.constant 0 : i32
    %c0_i32_1 = arith.constant 0 : i32
    return %c0_i32, %c0_i32_0 : i32, i32
  }
}

</mosaic_0001>

<bundles_post_ra>
// kernel: tpu_custom_call.1
= control target key start
LH: loop header
LB: loop body
LE: loop exit
PB: predicated region body
PF: predicated region fallthrough
CT: control target
= control target key end

     0   :  { %s4339_s0 = inlined_call_operand.hbm [shape: f32[128,128], index: 0, kind: input, shape index: {}]   ;;  %s4340_s1 = inlined_call_operand.hbm [shape: bf16[128,128], index: 1, kind: input, shape index: {}]   ;;  %s4341_s2 = inlined_call_operand.hbm [shape: bf16[128,128], index: 2, kind: input, shape index: {}]   ;;  %s4342_s3 = inlined_call_operand.hbm [shape: bf16[128,128], index: 3, kind: input, shape index: {}]   ;;  %s4343_s4 = inlined_call_operand.vmem [shape: f32[2,8,128], index: 4, kind: input, shape index: {}]   ;;  %s4344_s5 = inlined_call_operand.hbm [shape: bf16[2,2,256,128], index: 5, kind: input, shape index: {}]   ;;  %s4345_s6 = inlined_call_operand.hbm [shape: bf16[128,128], index: 6, kind: input, shape index: {}]   ;;  %s4346_s7 = inlined_call_operand.vmem [shape: f32[1,128], index: 7, kind: input, shape index: {}]   ;;  %s4347_s8 = inlined_call_operand.vmem [shape: bf16[1,128], index: 8, kind: input, shape index: {}]   ;;  %s4348_s9 = inlined_call_operand.<no memory space> [shape: f32[1,1], index: 9, kind: input, shape index: {}]   ;;  %s4349_s10 = inlined_call_operand.hbm [shape: f32[1,128], index: 10, kind: output, shape index: {}]  }
   0x1   :  { %4357 = sst [smem:[#allocation21_spill]] %s4340_s1 }
   0x2   :  { %15 = sst [smem:[#allocation3]] %s4348_s9 }
   0x3   :  { %16 = vsyncpa [#allocation5], 0 }
   0x4   :  { %17 = vsyncpa [#allocation8], 0 }
   0x5   :  { %18 = vsyncpa [#allocation11], 0 }
   0x6   :  { %19 = vsyncpa [#allocation6], 0  ;;  %s3576_s15 = smov 0   ;;  %s3578_s16 = smov 0  }
   0x7   :  { %s3580_s17 = smov 0   ;;  %s3582_s18 = smov 0  }
   0x8 LB: > { %s3595_s9 = sadd.s32 4294967295, %s3503_s18   ;;  %p155_p0 = scmp.ne.s32.totalorder %s3495_s16, %s3491_s15  ;;  %s3503_s18 = sphi %s3582_s18, %s4380_s18   ;;  %s3499_s17 = sphi %s3580_s17, %s4379_s17   ;;  %s3495_s16 = sphi %s3578_s16, %s4378_s16   ;;  %s3491_s15 = sphi %s3576_s15, %s4377_s15  }
   0x9   : > { %p4350_p1 = scmp.eq.s32.totalorder %s3595_s9, 0  ;;  %p2422_p2 = scmp.ge.s32.totalorder %s3503_s18, 1 }
   0xa   : > { %p271_p3 = scmp.lt.s32.totalorder %s3503_s18, 3  ;;  %s3505_s21 = smov [#allocation7]  }
   0xb   : > { %p3604_p5 = por %p4350_p1, %p155_p0  ;;  %s296_s22 = sshll.u32 %s3505_s21, 4  ;;  %s297_s22 = int_to_ptr.vmem [resolvable:$true] %s296_s22 }
   0xc   : > { %p3608_p6 = pnand %p2422_p2, %p271_p3  ;;  %s3506_s24 = smov [#allocation4]  }
   0xd   : > { %s4358_s19 = scalar_select %p3604_p5, 1, 0 }
   0xe   : > { %s4359_s20 = scalar_select %p3608_p6, 1, 0 }
   0xf   : > { %p3063_p7 = pneg %p3608_p6  ;;  %s283_s25 = sshll.u32 %s3506_s24, 4  ;;  %s3620_s25 = int_to_ptr.vmem [resolvable:$true] %s283_s25 }
  0x10   : > { %s4361_s1 = sld [smem:[#allocation21_spill]] }
  0x11   : > { %p3616_p8 = pnand %p3063_p7, %p4350_p1 }
  0x13   : > { %p3630_p10 = pneg %p3616_p8 }
  0x16   : > { %s3253_s28 = scalar_lea.hbm %s4361_s1, 1024 }
  0x17   : > { %p3254_p9 = scmp.ne.s32.totalorder %s4361_s1, %s3253_s28  ;;  %p3260_p13 = scmp.lt.u32.totalorder %s3253_s28, %s4361_s1 }
  0x19   : > { %p3256_p11 = pnand %p3630_p10, %p3254_p9 }
  0x1b   : > { %p3257_p12 = pneg %p3256_p11 }
  0x1d   : > { %p3262_p0 = pnand %p3260_p13, %p3257_p12 }
  0x1f   : > { %3265 = shalt.err (!%p3262_p0)
}
  0x20   : > { %s3266_s14 = scalar_lea.vmem %s297_s22, 1024  ;;  %p3274_p4 = scmp.lt.s32.totalorder %s297_s22, %s297_s22 }
  0x21   : > { %p3267_p2 = scmp.ne.s32.totalorder %s297_s22, %s3266_s14  ;;  %p3275_p1 = scmp.lt.s32.totalorder %s3266_s14, %s3266_s14 }
  0x23   : > { %p3269_p3 = pnand %p3267_p2, %p3630_p10  ;;  %p3276_p5 = por %p3275_p1, %p3274_p4 }
  0x25   : > { %p3270_p7 = pneg %p3269_p3 }
  0x27   : > { %p3277_p6 = pnand %p3276_p5, %p3270_p7 }
  0x29   : > { %3280 = shalt.err (!%p3277_p6)
}
  0x2a   : > { %s4353_s15 = smov 64   ;;  %s4355_s21 = smov 4  }
  0x2b   : > { %3069 = dma.hbm_to_vmem [thread:$0]  (!%p3616_p8), %s4361_s1, 1024, %s297_s22, [#allocation8], %s4353_s15, %s4353_s15, %s4355_s21  }
  0x2c   : > { %s3281_s29 = scalar_lea.hbm %s4339_s0, 2048 }
  0x2d   : > { %p3282_p1 = scmp.ne.s32.totalorder %s4339_s0, %s3281_s29  ;;  %p3288_p6 = scmp.lt.u32.totalorder %s3281_s29, %s4339_s0 }
  0x2f   : > { %p3284_p4 = pnand %p3282_p1, %p3630_p10 }
  0x31   : > { %p3285_p5 = pneg %p3284_p4 }
  0x33   : > { %p3290_p9 = pnand %p3288_p6, %p3285_p5 }
  0x35   : > { %3293 = shalt.err (!%p3290_p9)
}
  0x36   : > { %s3294_s22 = scalar_lea.vmem %s3620_s25, 2048  ;;  %p3302_p0 = scmp.lt.s32.totalorder %s3620_s25, %s3620_s25 }
  0x37   : > { %p3295_p11 = scmp.ne.s32.totalorder %s3620_s25, %s3294_s22  ;;  %p3303_p2 = scmp.lt.s32.totalorder %s3294_s22, %s3294_s22 }
  0x39   : > { %p3297_p12 = pnand %p3295_p11, %p3630_p10  ;;  %p3304_p3 = por %p3303_p2, %p3302_p0 }
  0x3b   : > { %p3298_p13 = pneg %p3297_p12 }
  0x3d   : > { %p3305_p7 = pnand %p3304_p3, %p3298_p13 }
  0x3f   : > { %3308 = shalt.err (!%p3305_p7)
}
  0x40   : > { %s3509_s24 = smov 128   ;;  %s3510_s26 = smov 8  }
  0x41   : > { %3066 = dma.hbm_to_vmem [thread:$0]  (!%p3616_p8), %s4339_s0, 2048, %s3620_s25, [#allocation5], %s3509_s24, %s3509_s24, %s3510_s26  }
  0x42   : > { %s3511_s29 = smov [#allocation9]   ;;  %s3512_s12 = smov [#allocation10]  }
  0x43   : > { %s309_s30 = sshll.u32 %s3511_s29, 4  ;;  %s322_s13 = sshll.u32 %s3512_s12, 4  ;;  %s310_s30 = int_to_ptr.vmem [resolvable:$true] %s309_s30  ;;  %s3672_s13 = int_to_ptr.vmem [resolvable:$true] %s322_s13 }
  0x44   : > { %s3309_s15 = scalar_lea.hbm %s4341_s2, 1024 }
  0x45   : > { %p3310_p1 = scmp.ne.s32.totalorder %s4341_s2, %s3309_s15  ;;  %p3316_p6 = scmp.lt.u32.totalorder %s3309_s15, %s4341_s2 }
  0x47   : > { %p3312_p4 = pnand %p3310_p1, %p3630_p10 }
  0x49   : > { %p3313_p5 = pneg %p3312_p4 }
  0x4b   : > { %p3318_p9 = pnand %p3316_p6, %p3313_p5 }
  0x4d   : > { %3321 = shalt.err (!%p3318_p9)
}
  0x4e   : > { %s3322_s24 = scalar_lea.vmem %s310_s30, 1024  ;;  %p3330_p0 = scmp.lt.s32.totalorder %s310_s30, %s310_s30 }
  0x4f   : > { %p3323_p11 = scmp.ne.s32.totalorder %s310_s30, %s3322_s24  ;;  %p3331_p2 = scmp.lt.s32.totalorder %s3322_s24, %s3322_s24 }
  0x51   : > { %p3325_p12 = pnand %p3323_p11, %p3630_p10  ;;  %p3332_p3 = por %p3331_p2, %p3330_p0 }
  0x53   : > { %p3326_p13 = pneg %p3325_p12 }
  0x55   : > { %p3333_p7 = pnand %p3332_p3, %p3326_p13 }
  0x57   : > { %3336 = shalt.err (!%p3333_p7)
}
  0x58   : > { %s4363_s1 = smov 4   ;;  %s4364_s21 = smov 64  }
  0x59   : > { %3072 = dma.hbm_to_vmem [thread:$0]  (!%p3616_p8), %s4341_s2, 1024, %s310_s30, [#allocation8], %s4364_s21, %s4364_s21, %s4363_s1  }
  0x5a   : > { %s3337_s12 = scalar_lea.hbm %s4342_s3, 1024 }
  0x5b   : > { %p3338_p1 = scmp.ne.s32.totalorder %s4342_s3, %s3337_s12  ;;  %p3344_p6 = scmp.lt.u32.totalorder %s3337_s12, %s4342_s3 }
  0x5d   : > { %p3340_p4 = pnand %p3338_p1, %p3630_p10 }
  0x5f   : > { %p3341_p5 = pneg %p3340_p4 }
  0x61   : > { %p3346_p9 = pnand %p3344_p6, %p3341_p5 }
  0x63   : > { %3349 = shalt.err (!%p3346_p9)
}
  0x64   : > { %s3350_s30 = scalar_lea.vmem %s3672_s13, 1024  ;;  %p3358_p0 = scmp.lt.s32.totalorder %s3672_s13, %s3672_s13 }
  0x65   : > { %p3351_p11 = scmp.ne.s32.totalorder %s3672_s13, %s3350_s30  ;;  %p3359_p2 = scmp.lt.s32.totalorder %s3350_s30, %s3350_s30 }
  0x67   : > { %p3353_p12 = pnand %p3351_p11, %p3630_p10  ;;  %p3360_p3 = por %p3359_p2, %p3358_p0 }
  0x69   : > { %p3354_p13 = pneg %p3353_p12 }
  0x6b   : > { %p3361_p7 = pnand %p3360_p3, %p3354_p13 }
  0x6d   : > { %3364 = shalt.err (!%p3361_p7)
}
  0x6e   : > { %3075 = dma.hbm_to_vmem [thread:$0]  (!%p3616_p8), %s4342_s3, 1024, %s3672_s13, [#allocation11], %s4364_s21, %s4364_s21, %s4363_s1  }
  0x6f   : > { %s3513_s15 = smov [#allocation13]   ;;  %s3722_s29 = sadd.s32 1, %s3503_s18  }
  0x70   : > { %s335_s28 = sshll.u32 %s3513_s15, 4  ;;  %s3365_s22 = scalar_lea.hbm %s4345_s6, 1024  ;;  %s336_s28 = int_to_ptr.vmem [resolvable:$true] %s335_s28 }
  0x71   : > { %p3366_p1 = scmp.ne.s32.totalorder %s4345_s6, %s3365_s22  ;;  %p3372_p6 = scmp.lt.u32.totalorder %s3365_s22, %s4345_s6 }
  0x73   : > { %p3368_p4 = pnand %p3366_p1, %p3630_p10 }
  0x75   : > { %p3369_p5 = pneg %p3368_p4 }
  0x77   : > { %p3374_p9 = pnand %p3372_p6, %p3369_p5 }
  0x79   : > { %3377 = shalt.err (!%p3374_p9)
}
  0x7a   : > { %s3378_s13 = scalar_lea.vmem %s336_s28, 1024  ;;  %p3386_p0 = scmp.lt.s32.totalorder %s336_s28, %s336_s28 }
  0x7b   : > { %p3379_p11 = scmp.ne.s32.totalorder %s336_s28, %s3378_s13  ;;  %p3387_p2 = scmp.lt.s32.totalorder %s3378_s13, %s3378_s13 }
  0x7d   : > { %p3381_p12 = pnand %p3379_p11, %p3630_p10  ;;  %p3388_p3 = por %p3387_p2, %p3386_p0 }
  0x7f   : > { %p3382_p13 = pneg %p3381_p12 }
  0x81   : > { %p3389_p7 = pnand %p3388_p3, %p3382_p13 }
  0x83   : > { %3392 = shalt.err (!%p3389_p7)
}
  0x84   : > { %3078 = dma.hbm_to_vmem [thread:$0]  (!%p3616_p8), %s4345_s6, 1024, %s336_s28, [#allocation8], %s4364_s21, %s4364_s21, %s4363_s1  }
  0x85   : > { %s139_s11 = ssub.s32 %s3503_s18, %s3722_s29  ;;  %s142_s23 = sadd.s32 1, %s3499_s17 }
  0x86   : > { %p140_p10 = scmp.eq.s32.totalorder %s139_s11, 0  ;;  %p149_p1 = scmp.ne.s32.totalorder %s3499_s17, %s3495_s16 }
  0x87   : > { %p150_p4 = scmp.eq.s32.totalorder %s3503_s18, 0  ;;  %p3088_p5 = scmp.lt.s32.totalorder %s3503_s18, 2 }
  0x88   : > { %s3753_s12 = scalar_select %p140_p10, %s3499_s17, %s142_s23  }
  0x89   : > { %p151_p6 = por %p150_p4, %p149_p1  ;;  %s365_s14 = sand.u32 1, %s3503_s18  }
  0x8a   : > { %s367_s22 = sand.u32 1, %s3499_s17   ;;  %s2543_s25 = sshll.u32 %s3503_s18, 12 }
  0x8b   : > { %s2429_s27 = sshll.u32 %s367_s22, 8  ;;  %s3761_s13 = scalar_lea.hbm %s4344_s5, %s2543_s25 }
  0x8c   : > { %s369_s28 = scalar_lea.vmem [#allocation12], %s2429_s27  ;;  %p3763_p8 = pnand %p3088_p5, %p151_p6 }
  0x8d   : > { %s376_s26 = sshll.u32 %s369_s28, 4  ;;  %s3769_s18 = scalar_lea.sflag [#allocation5], %s365_s14  ;;  %s3767_s26 = int_to_ptr.vmem [resolvable:$true] %s376_s26 }
  0x8e   : > { %s3393_s11 = scalar_lea.hbm %s3761_s13, 4096  ;;  %p3395_p11 = pneg %p3763_p8 }
  0x8f   : > { %p3394_p9 = scmp.ne.s32.totalorder %s3761_s13, %s3393_s11  ;;  %s3398_s27 = scalar_lea.hbm %s4344_s5, 8192 }
  0x90   : > { %p3399_p0 = scmp.lt.u32.totalorder %s3761_s13, %s4344_s5  ;;  %p3400_p2 = scmp.lt.u32.totalorder %s3398_s27, %s3393_s11 }
  0x91   : > { %p3396_p12 = pnand %p3395_p11, %p3394_p9  ;;  %p3402_p7 = scmp.lt.u32.totalorder %s3393_s11, %s3761_s13 }
  0x92   : > { %p3401_p3 = por %p3400_p2, %p3399_p0 }
  0x93   : > { %p3397_p13 = pneg %p3396_p12 }
  0x94   : > { %p3403_p10 = por %p3402_p7, %p3401_p3 }
  0x96   : > { %p3404_p1 = pnand %p3403_p10, %p3397_p13 }
  0x98   : > { %3407 = shalt.err (!%p3404_p1)
}
  0x99   : > { %s3408_s14 = scalar_lea.vmem %s3767_s26, 4096  ;;  %s3514_s24 = smov [#allocation12]  }
  0x9a   : > { %p3409_p4 = scmp.ne.s32.totalorder %s3767_s26, %s3408_s14  ;;  %s3413_s28 = sshll.u32 %s3514_s24, 4  ;;  %s3414_s28 = int_to_ptr.vmem [resolvable:$false] %s3413_s28 }
  0x9b   : > { %s3415_s23 = scalar_lea.vmem %s3414_s28, 8192  ;;  %p3416_p9 = scmp.lt.s32.totalorder %s3767_s26, %s3414_s28 }
  0x9c   : > { %p3411_p5 = pnand %p3409_p4, %p3395_p11  ;;  %p3417_p12 = scmp.lt.s32.totalorder %s3415_s23, %s3408_s14 }
  0x9e   : > { %p3412_p6 = pneg %p3411_p5  ;;  %p3418_p0 = por %p3417_p12, %p3416_p9 }
  0xa0   : > { %p3419_p2 = pnand %p3418_p0, %p3412_p6 }
  0xa2   : > { %3422 = shalt.err (!%p3419_p2)
}
  0xa3   : > { %3082 = dma.hbm_to_vmem [thread:$0]  (!%p3763_p8), %s3761_s13, 4096, %s3767_s26, %s3769_s18, %s4364_s21, %s4364_s21, %s4363_s1  }
  0xa4   : > { %p4366_p11 = scmp.ne.s32.totalorder %s4359_s20, 0 }
  0xa5   : > { %p4367_p13 = scmp.eq.s32.totalorder (!%p4366_p11), %s3595_s9, 0 }
  0xa6   : > { %388 = sbr.rel (%p4366_p11) target bundleno = 2787 (0xae3), region = 60 }
  0xad   : > { %3466 = dma.done.wait (%p4367_p13), [#allocation5], 2048   ;;  %p4368_p3 = pmov %p4367_p13 }
  0xaf   : > { %3468 = vsyncadd (%p4368_p3), [#allocation5], 4294965248  ;;  %p4369_p7 = pmov %p4368_p3 }
  0xb0   : > { %p4370_p10 = pmov %p4368_p3 }
  0xb1   : > { %3470 = dma.done.wait (%p4369_p7), [#allocation8], 2048  }
  0xb2   : > { %3472 = vsyncadd (%p4370_p10), [#allocation8], 4294965248  ;;  %p4371_p1 = pmov %p4368_p3 }
  0xb4   : > { %3474 = dma.done.wait (%p4371_p1), [#allocation11], 1024   ;;  %p4372_p8 = pmov %p4371_p1 }
  0xb5   : > { %s406_s20 = sand.u32 1, %s3595_s9   ;;  %s408_s1 = sand.u32 1, %s3495_s16  }
  0xb6   : > { %3476 = vsyncadd (%p4372_p8), [#allocation11], 4294966272  ;;  %s2437_s21 = sshll.u32 %s408_s1, 8  ;;  %s407_s13 = scalar_lea.sflag [#allocation5], %s406_s20 }
  0xb7   : > { %s3816_s26 = scalar_lea.vmem [#allocation12], %s2437_s21  ;;  %p4373_p4 = scmp.ne.s32.totalorder %s4358_s19, 0 }
  0xb9   : > { %3478 = dma.done.wait (%p4373_p4), %s407_s13, 4096  }
  0xba   : > { %3480 = vsyncadd (%p4373_p4), %s407_s13, 4294963200  ;;  %p4374_p5 = pmov %p4371_p1 }
  0xbb   : > { %p4375_p6 = pmov %p4371_p1 }
  0xbc   : > { %3482 = dma.done.wait (%p4374_p5), [#allocation8], 1024  }
  0xbd   : > { %3484 = vsyncadd (%p4375_p6), [#allocation8], 4294966272  ;;  %p450_p9 = scmp.lt.s32.totalorder %s3595_s9, 1  ;;  %p4376_p12 = scmp.ne.s32.totalorder %s3595_s9, 0 }
  0xbe   : > { %v459_v0 = vld [vmem:[#allocation4] sm:$0xff] (!%p4376_p12)  ;;  %v460_v1 = vld [vmem:[#allocation4 + $0x8] sm:$0xff] (!%p4376_p12)  ;;  %v461_v2 = vld [vmem:[#allocation4 + $0x10] sm:$0xff] (!%p4376_p12) }
  0xbf   : > { %s451_s15 = scalar_select %p450_p9, %s3595_s9, 1 }
  0xc0   : > { %458 = sbr.rel (%p4376_p12) target bundleno = 200 (0xc8), region = 88  ;;  %475 = vst [vmem:[#allocation2] sm:$0xff] (!%p4376_p12), %v459_v0  ;;  %476 = vst [vmem:[#allocation2 + $0x8] sm:$0xff] (!%p4376_p12), %v460_v1  ;;  %v462_v3 = vld [vmem:[#allocation4 + $0x18] sm:$0xff] (!%p4376_p12)  ;;  %v463_v4 = vld [vmem:[#allocation4 + $0x20] sm:$0xff] (!%p4376_p12) }
  0xc1   : > { %s2439_s18 = sshll.u32 %s451_s15, 3  ;;  %477 = vst [vmem:[#allocation2 + $0x10] sm:$0xff] (!%p4376_p12), %v461_v2  ;;  %v464_v5 = vld [vmem:[#allocation4 + $0x28] sm:$0xff] (!%p4376_p12)  ;;  %478 = vst [vmem:[#allocation2 + $0x18] sm:$0xff] (!%p4376_p12), %v462_v3  ;;  %v465_v6 = vld [vmem:[#allocation4 + $0x30] sm:$0xff] (!%p4376_p12) }
  0xc2   : > { %s3831_s27 = scalar_lea.vmem %s4343_s4, %s2439_s18  ;;  %479 = vst [vmem:[#allocation2 + $0x20] sm:$0xff] (!%p4376_p12), %v463_v4  ;;  %480 = vst [vmem:[#allocation2 + $0x28] sm:$0xff] (!%p4376_p12), %v464_v5  ;;  %v466_v7 = vld [vmem:[#allocation4 + $0x38] sm:$0xff] (!%p4376_p12)  ;;  %v467_v8 = vld [vmem:[#allocation4 + $0x40] sm:$0xff] (!%p4376_p12) }
  0xc3   : > { %481 = vst [vmem:[#allocation2 + $0x30] sm:$0xff] (!%p4376_p12), %v465_v6  ;;  %482 = vst [vmem:[#allocation2 + $0x38] sm:$0xff] (!%p4376_p12), %v466_v7  ;;  %v468_v9 = vld [vmem:[#allocation4 + $0x48] sm:$0xff] (!%p4376_p12)  ;;  %v469_v10 = vld [vmem:[#allocation4 + $0x50] sm:$0xff] (!%p4376_p12) }
  0xc4   : > { %483 = vst [vmem:[#allocation2 + $0x40] sm:$0xff] (!%p4376_p12), %v467_v8  ;;  %v470_v11 = vld [vmem:[#allocation4 + $0x58] sm:$0xff] (!%p4376_p12)  ;;  %484 = vst [vmem:[#allocation2 + $0x48] sm:$0xff] (!%p4376_p12), %v468_v9  ;;  %v471_v12 = vld [vmem:[#allocation4 + $0x60] sm:$0xff] (!%p4376_p12) }
  0xc5   : > { %485 = vst [vmem:[#allocation2 + $0x50] sm:$0xff] (!%p4376_p12), %v469_v10  ;;  %486 = vst [vmem:[#allocation2 + $0x58] sm:$0xff] (!%p4376_p12), %v470_v11  ;;  %v472_v13 = vld [vmem:[#allocation4 + $0x68] sm:$0xff] (!%p4376_p12)  ;;  %v473_v14 = vld [vmem:[#allocation4 + $0x70] sm:$0xff] (!%p4376_p12) }
  0xc6   : > { %487 = vst [vmem:[#allocation2 + $0x60] sm:$0xff] (!%p4376_p12), %v471_v12  ;;  %488 = vst [vmem:[#allocation2 + $0x68] sm:$0xff] (!%p4376_p12), %v472_v13  ;;  %v474_v15 = vld [vmem:[#allocation4 + $0x78] sm:$0xff] (!%p4376_p12) }
  0xc7   : > { %489 = vst [vmem:[#allocation2 + $0x70] sm:$0xff] %v473_v14  ;;  %490 = vst [vmem:[#allocation2 + $0x78] sm:$0xff] %v474_v15 }
  0xc8 PF: > { %v3835_v16 = vld [vmem:[#allocation2] sm:$0xff]  ;;  %v3837_v17 = vld [vmem:[#allocation2 + $0x8] sm:$0xff]  ;;  %v3885_v42 = vld [vmem:[#allocation10 + $0x10] sm:$0xff]   ;;  %p2529_p0 = scmp.ne.s32.totalorder %s3595_s9, 1 }
  0xc9   : > { %v3839_v18 = vld [vmem:[#allocation2 + $0x10] sm:$0xff]  ;;  %v556_v19 = vpack.c.bf16 %v3837_v17, %v3835_v16  ;;  %v3843_v20 = vld [vmem:[#allocation2 + $0x18] sm:$0xff]  ;;  %v3140_v27 = vld [vmem:[#allocation10] sm:$0xff]   ;;  %s2262_s24 = sld [smem:[#allocation3]] (!%p2529_p0) }
  0xca   : > { %v557_v21 = vpack.c.bf16 %v3843_v20, %v3839_v18  ;;  %v3847_v22 = vld [vmem:[#allocation2 + $0x20] sm:$0xff]  ;;  %v3849_v23 = vld [vmem:[#allocation2 + $0x28] sm:$0xff]  ;;  %2809 = vmatprep.mubr.bf16.mxu1 %v3140_v27  ;;  %2873 = vmatprep.mubr.bf16.mxu0 %v3140_v27  ;;  %v3889_v43 = vld [vmem:[#allocation10 + $0x18] sm:$0xff]  }
  0xcb   : > { %2793 = vmatprep.subr.bf16.mxu1 %v556_v19  ;;  %v3851_v24 = vld [vmem:[#allocation2 + $0x30] sm:$0xff]  ;;  %v558_v25 = vpack.c.bf16 %v3849_v23, %v3847_v22  ;;  %v3855_v26 = vld [vmem:[#allocation2 + $0x38] sm:$0xff]  ;;  %v3883_v41 = vld [vmem:[#allocation10 + $0x8] sm:$0xff]  }
  0xcc   : > { %2794 = vmatpush3.bf16.msra.mxu1 %v556_v19  ;;  %v559_v28 = vpack.c.bf16 %v3855_v26, %v3851_v24  ;;  %v3859_v29 = vld [vmem:[#allocation2 + $0x40] sm:$0xff]  ;;  %v3861_v30 = vld [vmem:[#allocation2 + $0x48] sm:$0xff]  ;;  %v3897_v46 = vld [vmem:[#allocation10 + $0x30] sm:$0xff]   ;;  %v862_v19 = vlaneseq }
  0xcd   : > { %2795 = vmatprep.subr.bf16.mxu1 %v557_v21  ;;  %v3863_v31 = vld [vmem:[#allocation2 + $0x50] sm:$0xff]  ;;  %v560_v32 = vpack.c.bf16 %v3861_v30, %v3859_v29  ;;  %v3867_v33 = vld [vmem:[#allocation2 + $0x58] sm:$0xff]  ;;  %v3891_v44 = vld [vmem:[#allocation10 + $0x20] sm:$0xff]  }
  0xce   : > { %v3869_v34 = vld [vmem:[#allocation2 + $0x60] sm:$0xff]  ;;  %v3871_v35 = vld [vmem:[#allocation2 + $0x68] sm:$0xff]  ;;  %v561_v36 = vpack.c.bf16 %v3867_v33, %v3863_v31  ;;  %v3875_v37 = vld [vmem:[#allocation2 + $0x70] sm:$0xff] }
  0xcf   : > { %v3877_v38 = vld [vmem:[#allocation2 + $0x78] sm:$0xff]  ;;  %v562_v39 = vpack.c.bf16 %v3871_v35, %v3869_v34  ;;  %v3895_v45 = vld [vmem:[#allocation10 + $0x28] sm:$0xff]   ;;  %v3148_v48 = vld [vmem:[#allocation9] sm:$0xff]  }
  0xd0   : > { %2796 = vmatpush3.bf16.msra.mxu1 %v557_v21  ;;  %v563_v40 = vpack.c.bf16 %v3877_v38, %v3875_v37  ;;  %v3901_v47 = vld [vmem:[#allocation10 + $0x38] sm:$0xff]   ;;  %v3904_v9 = vld [vmem:[#allocation9 + $0x8] sm:$0xff]   ;;  %v3906_v10 = vld [vmem:[#allocation9 + $0x10] sm:$0xff]   ;;  %v3925_v21 = vshrl.u32 %v862_v19, 7 }
  0xd1   : > { %2797 = vmatprep.subr.bf16.mxu1 %v558_v25  ;;  %v3910_v11 = vld [vmem:[#allocation9 + $0x18] sm:$0xff]   ;;  %v3912_v12 = vld [vmem:[#allocation9 + $0x20] sm:$0xff]   ;;  %v3916_v13 = vld [vmem:[#allocation9 + $0x28] sm:$0xff]  }
  0xd2   : > { %v3918_v14 = vld [vmem:[#allocation9 + $0x30] sm:$0xff]   ;;  %v3922_v15 = vld [vmem:[#allocation9 + $0x38] sm:$0xff]   ;;  %v3929_v27 = vld [vmem:[%s3831_s27] sm:$0xff] }
  0xd4   : > { %2798 = vmatpush3.bf16.msra.mxu1 %v558_v25  ;;  %v864_v25 = vsub.s32 2, %v3925_v21 }
  0xd5   : > { %2799 = vmatprep.subr.bf16.mxu1 %v559_v28 }
  0xd8   : > { %2800 = vmatpush3.bf16.msra.mxu1 %v559_v28  ;;  %v3932_v28 = vrot.slane %v3929_v27, %v864_v25 }
  0xd9   : > { %2801 = vmatprep.subr.bf16.mxu1 %v560_v32 }
  0xdc   : > { %2802 = vmatpush3.bf16.msra.mxu1 %v560_v32 }
  0xdd   : > { %2803 = vmatprep.subr.bf16.mxu1 %v561_v36 }
  0xe0   : > { %2804 = vmatpush3.bf16.msra.mxu1 %v561_v36 }
  0xe1   : > { %2805 = vmatprep.subr.bf16.mxu1 %v562_v39 }
  0xe4   : > { %2806 = vmatpush3.bf16.msra.mxu1 %v562_v39 }
  0xe5   : > { %2807 = vmatprep.subr.bf16.mxu1 %v563_v40 }
  0xe8   : > { %2808 = vmatpush3.bf16.msra.mxu1 %v563_v40 }
  0xeb   : > { %2810 = vmatmul.mubr.bf16.vlgmr.msra.gmra.mrb[0].mxu1 %v3883_v41 }
  0xec   : > { %2813 = vmatprep.mubr.bf16.mxu1 %v3885_v42 }
  0xf3   : > { %2814 = vmatmul.mubr.bf16.gmra.mrb[4].mxu1 %v3889_v43 }
  0xf4   : > { %2817 = vmatprep.mubr.bf16.mxu1 %v3891_v44 }
  0xfb   : > { %2818 = vmatmul.mubr.bf16.gmra.mrb[8].mxu1 %v3895_v45 }
  0xfc   : > { %2821 = vmatprep.mubr.bf16.mxu1 %v3897_v46 }
 0x103   : > { %2822 = vmatmul.mubr.bf16.gmra.mrb[12].mxu1 %v3901_v47 }
 0x104   : > { %2841 = vmatprep.mubr.bf16.mxu1 %v3148_v48 }
 0x1be   : > { %v2811_v49 = vpop.f32.mrb[0].mxu1 }
 0x1bf   : > { %v646_v50 = vpop.f32.mrb[1].mxu1 }
 0x1c0   : > { %v2812_v51 = vpop.f32.mrb[2].mxu1 }
 0x1c1   : > { %v710_v52 = vpack.c.bf16 %v2812_v51, %v2811_v49  ;;  %v649_v53 = vpop.f32.mrb[3].mxu1 }
 0x1c2   : > { %v709_v54 = vpack.c.bf16 %v649_v53, %v646_v50 }
 0x1c4   : > { %2825 = vmatprep.subr.bf16.mxu1 %v709_v54 }
 0x1c5   : > { %2826 = vmatpush3.bf16.msra.mxu1 %v709_v54 }
 0x1c6   : > { %v2815_v55 = vpop.f32.mrb[4].mxu1  ;;  %2827 = vmatprep.subr.bf16.mxu1 %v710_v52 }
 0x1c7   : > { %v662_v56 = vpop.f32.mrb[5].mxu1 }
 0x1c8   : > { %v2816_v57 = vpop.f32.mrb[6].mxu1 }
 0x1c9   : > { %v712_v58 = vpack.c.bf16 %v2816_v57, %v2815_v55  ;;  %v665_v59 = vpop.f32.mrb[7].mxu1  ;;  %2828 = vmatpush3.bf16.msra.mxu1 %v710_v52 }
 0x1ca   : > { %v711_v60 = vpack.c.bf16 %v665_v59, %v662_v56 }
 0x1cc   : > { %2829 = vmatprep.subr.bf16.mxu1 %v711_v60 }
 0x1cd   : > { %2830 = vmatpush3.bf16.msra.mxu1 %v711_v60 }
 0x1ce   : > { %v2819_v61 = vpop.f32.mrb[8].mxu1  ;;  %2831 = vmatprep.subr.bf16.mxu1 %v712_v58 }
 0x1cf   : > { %v678_v62 = vpop.f32.mrb[9].mxu1 }
 0x1d0   : > { %v2820_v63 = vpop.f32.mrb[10].mxu1 }
 0x1d1   : > { %v714_v0 = vpack.c.bf16 %v2820_v63, %v2819_v61  ;;  %v681_v1 = vpop.f32.mrb[11].mxu1  ;;  %2832 = vmatpush3.bf16.msra.mxu1 %v712_v58 }
 0x1d2   : > { %v713_v2 = vpack.c.bf16 %v681_v1, %v678_v62 }
 0x1d4   : > { %2833 = vmatprep.subr.bf16.mxu1 %v713_v2 }
 0x1d5   : > { %2834 = vmatpush3.bf16.msra.mxu1 %v713_v2 }
 0x1d6   : > { %v2823_v3 = vpop.f32.mrb[12].mxu1  ;;  %2835 = vmatprep.subr.bf16.mxu1 %v714_v0 }
 0x1d7   : > { %v694_v4 = vpop.f32.mrb[13].mxu1 }
 0x1d8   : > { %v2824_v5 = vpop.f32.mrb[14].mxu1 }
 0x1d9   : > { %v716_v6 = vpack.c.bf16 %v2824_v5, %v2823_v3  ;;  %v697_v7 = vpop.f32.mrb[15].mxu1  ;;  %2836 = vmatpush3.bf16.msra.mxu1 %v714_v0 }
 0x1da   : > { %v715_v8 = vpack.c.bf16 %v697_v7, %v694_v4 }
 0x1dc   : > { %2837 = vmatprep.subr.bf16.mxu1 %v715_v8 }
 0x1dd   : > { %2838 = vmatpush3.bf16.msra.mxu1 %v715_v8 }
 0x1de   : > { %2839 = vmatprep.subr.bf16.mxu1 %v716_v6 }
 0x1e1   : > { %2840 = vmatpush3.bf16.msra.mxu1 %v716_v6 }
 0x1e4   : > { %2842 = vmatmul.mubr.bf16.vlgmr.msra.gmra.mrb[16].mxu1 %v3904_v9 }
 0x1e5   : > { %2845 = vmatprep.mubr.bf16.mxu1 %v3906_v10 }
 0x1ec   : > { %2846 = vmatmul.mubr.bf16.gmra.mrb[20].mxu1 %v3910_v11 }
 0x1ed   : > { %2849 = vmatprep.mubr.bf16.mxu1 %v3912_v12 }
 0x1f4   : > { %2850 = vmatmul.mubr.bf16.gmra.mrb[24].mxu1 %v3916_v13 }
 0x1f5   : > { %2853 = vmatprep.mubr.bf16.mxu1 %v3918_v14 }
 0x1fc   : > { %2854 = vmatmul.mubr.bf16.gmra.mrb[28].mxu1 %v3922_v15 }
 0x1fd   : > { %2905 = vmatprep.mubr.bf16.mxu1 %v3148_v48 }
 0x2b7   : > { %v2843_v32 = vpop.f32.mrb[16].mxu1 }
 0x2b8   : > { %v868_v36 = vmul.f32 %v2843_v32, %v3932_v28  ;;  %v799_v39 = vpop.f32.mrb[17].mxu1 }
 0x2b9   : > { %v866_v40 = vmul.f32 %v3932_v28, %v799_v39  ;;  %v2844_v49 = vpop.f32.mrb[18].mxu1 }
 0x2ba   : > { %v3937_v50 = vsub.f32 %v3839_v18, %v868_v36  ;;  %v869_v48 = vmul.f32 %v2844_v49, %v3932_v28  ;;  %v802_v51 = vpop.f32.mrb[19].mxu1 }
 0x2bb   : > { %v3941_v52 = vsub.f32 %v3835_v16, %v866_v40  ;;  %v867_v53 = vmul.f32 %v3932_v28, %v802_v51 }
 0x2bc   : > { %v3945_v54 = vsub.f32 %v3843_v20, %v869_v48  ;;  %v900_v56 = vmul.f32 %v3937_v50, %v3937_v50 }
 0x2bd   : > { %v3948_v55 = vsub.f32 %v3837_v17, %v867_v53  ;;  %v898_v58 = vmul.f32 %v3941_v52, %v3941_v52 }
 0x2be   : > { %v901_v18 = vmul.f32 %v3945_v54, %v3945_v54 }
 0x2bf   : > { %v2847_v57 = vpop.f32.mrb[20].mxu1  ;;  %v899_v16 = vmul.f32 %v3948_v55, %v3948_v55 }
 0x2c0   : > { %v872_v59 = vmul.f32 %v2847_v57, %v3932_v28  ;;  %v815_v20 = vpop.f32.mrb[21].mxu1  ;;  %v915_v60 = vpack.c.bf16 %v901_v18, %v900_v56 }
 0x2c1   : > { %v870_v17 = vmul.f32 %v3932_v28, %v815_v20  ;;  %v2848_v61 = vpop.f32.mrb[22].mxu1  ;;  %v914_v62 = vpack.c.bf16 %v899_v16, %v898_v58 }
 0x2c2   : > { %v3961_v63 = vsub.f32 %v3851_v24, %v872_v59  ;;  %v873_v0 = vmul.f32 %v2848_v61, %v3932_v28  ;;  %v818_v1 = vpop.f32.mrb[23].mxu1 }
 0x2c3   : > { %v3965_v2 = vsub.f32 %v3847_v22, %v870_v17  ;;  %v871_v3 = vmul.f32 %v3932_v28, %v818_v1  ;;  %2857 = vmatprep.subr.bf16.mxu0 %v914_v62 }
 0x2c4   : > { %v3969_v4 = vsub.f32 %v3855_v26, %v873_v0  ;;  %2858 = vmatpush3.bf16.msra.mxu0 %v914_v62  ;;  %v904_v24 = vmul.f32 %v3961_v63, %v3961_v63 }
 0x2c5   : > { %v3972_v5 = vsub.f32 %v3849_v23, %v871_v3  ;;  %2859 = vmatprep.subr.bf16.mxu0 %v915_v60  ;;  %v902_v22 = vmul.f32 %v3965_v2, %v3965_v2 }
 0x2c6   : > { %v905_v6 = vmul.f32 %v3969_v4, %v3969_v4 }
 0x2c7   : > { %v903_v7 = vmul.f32 %v3972_v5, %v3972_v5  ;;  %v2851_v8 = vpop.f32.mrb[24].mxu1 }
 0x2c8   : > { %v876_v26 = vmul.f32 %v2851_v8, %v3932_v28  ;;  %v831_v19 = vpop.f32.mrb[25].mxu1  ;;  %2860 = vmatpush3.bf16.msra.mxu0 %v915_v60  ;;  %v917_v23 = vpack.c.bf16 %v905_v6, %v904_v24 }
 0x2c9   : > { %v874_v25 = vmul.f32 %v3932_v28, %v831_v19  ;;  %v2852_v32 = vpop.f32.mrb[26].mxu1  ;;  %v916_v36 = vpack.c.bf16 %v903_v7, %v902_v22 }
 0x2ca   : > { %v3985_v39 = vsub.f32 %v3863_v31, %v876_v26  ;;  %v877_v40 = vmul.f32 %v2852_v32, %v3932_v28  ;;  %v834_v49 = vpop.f32.mrb[27].mxu1 }
 0x2cb   : > { %v3989_v48 = vsub.f32 %v3859_v29, %v874_v25  ;;  %v875_v51 = vmul.f32 %v3932_v28, %v834_v49  ;;  %2861 = vmatprep.subr.bf16.mxu0 %v916_v36 }
 0x2cc   : > { %v3993_v53 = vsub.f32 %v3867_v33, %v877_v40  ;;  %2862 = vmatpush3.bf16.msra.mxu0 %v916_v36  ;;  %v908_v31 = vmul.f32 %v3985_v39, %v3985_v39 }
 0x2cd   : > { %v3996_v56 = vsub.f32 %v3861_v30, %v875_v51  ;;  %2863 = vmatprep.subr.bf16.mxu0 %v917_v23  ;;  %v906_v29 = vmul.f32 %v3989_v48, %v3989_v48 }
 0x2ce   : > { %v909_v18 = vmul.f32 %v3993_v53, %v3993_v53 }
 0x2cf   : > { %v907_v57 = vmul.f32 %v3996_v56, %v3996_v56  ;;  %v2855_v58 = vpop.f32.mrb[28].mxu1 }
 0x2d0   : > { %v880_v33 = vmul.f32 %v2855_v58, %v3932_v28  ;;  %v847_v16 = vpop.f32.mrb[29].mxu1  ;;  %2864 = vmatpush3.bf16.msra.mxu0 %v917_v23  ;;  %v919_v30 = vpack.c.bf16 %v909_v18, %v908_v31 }
 0x2d1   : > { %v878_v59 = vmul.f32 %v3932_v28, %v847_v16  ;;  %v2856_v20 = vpop.f32.mrb[30].mxu1  ;;  %v918_v60 = vpack.c.bf16 %v907_v57, %v906_v29  ;;  %v3171_v16 = vld [vmem:[%s3816_s26 + $0x18] sm:$0xff]  }
 0x2d2   : > { %v4009_v17 = vsub.f32 %v3875_v37, %v880_v33  ;;  %v881_v61 = vmul.f32 %v2856_v20, %v3932_v28  ;;  %v850_v62 = vpop.f32.mrb[31].mxu1  ;;  %v4044_v33 = vld [vmem:[#allocation7] sm:$0xff]   ;;  %v3174_v20 = vld [vmem:[%s3816_s26 + $0x68] sm:$0xff]  }
 0x2d3   : > { %v4013_v0 = vsub.f32 %v3869_v34, %v878_v59  ;;  %v879_v1 = vmul.f32 %v3932_v28, %v850_v62  ;;  %2865 = vmatprep.subr.bf16.mxu0 %v918_v60  ;;  %v3173_v59 = vld [vmem:[%s3816_s26 + $0x20] sm:$0xff]   ;;  %v3177_v62 = vld [vmem:[%s3816_s26 + $0x30] sm:$0xff]  }
 0x2d4   : > { %v4017_v3 = vsub.f32 %v3877_v38, %v881_v61  ;;  %2866 = vmatpush3.bf16.msra.mxu0 %v918_v60  ;;  %v912_v37 = vmul.f32 %v4009_v17, %v4009_v17  ;;  %v3175_v60 = vld [vmem:[%s3816_s26 + $0x28] sm:$0xff]   ;;  %v3176_v61 = vld [vmem:[%s3816_s26 + $0x70] sm:$0xff]  }
 0x2d5   : > { %v4020_v24 = vsub.f32 %v3871_v35, %v879_v1  ;;  %2867 = vmatprep.subr.bf16.mxu0 %v919_v30  ;;  %v910_v34 = vmul.f32 %v4013_v0, %v4013_v0 }
 0x2d6   : > { %v913_v6 = vmul.f32 %v4017_v3, %v4017_v3 }
 0x2d7   : > { %v911_v28 = vmul.f32 %v4020_v24, %v4020_v24 }
 0x2d8   : > { %2868 = vmatpush3.bf16.msra.mxu0 %v919_v30  ;;  %v921_v38 = vpack.c.bf16 %v913_v6, %v912_v37  ;;  %v3172_v30 = vld [vmem:[%s3816_s26 + $0x60] sm:$0xff]  }
 0x2d9   : > { %v920_v22 = vpack.c.bf16 %v911_v28, %v910_v34 }
 0x2db   : > { %2869 = vmatprep.subr.bf16.mxu0 %v920_v22 }
 0x2dc   : > { %2870 = vmatpush3.bf16.msra.mxu0 %v920_v22 }
 0x2dd   : > { %2871 = vmatprep.subr.bf16.mxu0 %v921_v38 }
 0x2e0   : > { %2872 = vmatpush3.bf16.msra.mxu0 %v921_v38 }
 0x2e3   : > { %2874 = vmatmul.mubr.bf16.vlgmr.msra.gmra.mrb[0].mxu0 %v3883_v41 }
 0x2e4   : > { %2877 = vmatprep.mubr.bf16.mxu0 %v3885_v42 }
 0x2eb   : > { %2878 = vmatmul.mubr.bf16.gmra.mrb[4].mxu0 %v3889_v43 }
 0x2ec   : > { %2881 = vmatprep.mubr.bf16.mxu0 %v3891_v44 }
 0x2f3   : > { %2882 = vmatmul.mubr.bf16.gmra.mrb[8].mxu0 %v3895_v45 }
 0x2f4   : > { %2885 = vmatprep.mubr.bf16.mxu0 %v3897_v46 }
 0x2fb   : > { %2886 = vmatmul.mubr.bf16.gmra.mrb[12].mxu0 %v3901_v47 }
 0x2fc   : > { %2937 = vmatprep.mubr.bf16.mxu0 %v4044_v33 }
 0x3b6   : > { %v2875_v35 = vpop.f32.mrb[0].mxu0 }
 0x3b7   : > { %v956_v7 = vpop.f32.mrb[1].mxu0 }
 0x3b8   : > { %v2876_v8 = vpop.f32.mrb[2].mxu0 }
 0x3b9   : > { %v1020_v26 = vpack.c.bf16 %v2876_v8, %v2875_v35  ;;  %v959_v19 = vpop.f32.mrb[3].mxu0  ;;  %v1029_v35 = vsub.s32 0, %v3925_v21 }
 0x3ba   : > { %v1019_v23 = vpack.c.bf16 %v959_v19, %v956_v7 }
 0x3bb   : > { %v4063_v8 = vrot.slane %v3929_v27, %v1029_v35 }
 0x3bc   : > { %2889 = vmatprep.subr.bf16.mxu1 %v1019_v23 }
 0x3bd   : > { %2890 = vmatpush3.bf16.msra.mxu1 %v1019_v23 }
 0x3be   : > { %v2879_v41 = vpop.f32.mrb[4].mxu0  ;;  %2891 = vmatprep.subr.bf16.mxu1 %v1020_v26 }
 0x3bf   : > { %v972_v42 = vpop.f32.mrb[5].mxu0 }
 0x3c0   : > { %v2880_v43 = vpop.f32.mrb[6].mxu0 }
 0x3c1   : > { %v1022_v25 = vpack.c.bf16 %v2880_v43, %v2879_v41  ;;  %v975_v44 = vpop.f32.mrb[7].mxu0  ;;  %2892 = vmatpush3.bf16.msra.mxu1 %v1020_v26  ;;  %v1178_v43 = vsub.s32 1, %v3925_v21 }
 0x3c2   : > { %v1021_v45 = vpack.c.bf16 %v975_v44, %v972_v42 }
 0x3c4   : > { %2893 = vmatprep.subr.bf16.mxu1 %v1021_v45 }
 0x3c5   : > { %2894 = vmatpush3.bf16.msra.mxu1 %v1021_v45  ;;  %v1033_v45 = vmul.f32 %v4063_v8, %v3937_v50  ;;  %v1032_v50 = vmul.f32 %v4063_v8, %v3948_v55 }
 0x3c6   : > { %v2883_v46 = vpop.f32.mrb[8].mxu0  ;;  %2895 = vmatprep.subr.bf16.mxu1 %v1022_v25 }
 0x3c7   : > { %v988_v47 = vpop.f32.mrb[9].mxu0 }
 0x3c8   : > { %v2884_v32 = vpop.f32.mrb[10].mxu0 }
 0x3c9   : > { %v1024_v36 = vpack.c.bf16 %v2884_v32, %v2883_v46  ;;  %v991_v40 = vpop.f32.mrb[11].mxu0  ;;  %2896 = vmatpush3.bf16.msra.mxu1 %v1022_v25  ;;  %v1031_v32 = vmul.f32 %v4063_v8, %v3941_v52 }
 0x3ca   : > { %v1023_v49 = vpack.c.bf16 %v991_v40, %v988_v47  ;;  %v1034_v40 = vmul.f32 %v4063_v8, %v3945_v54 }
 0x3cc   : > { %2897 = vmatprep.subr.bf16.mxu1 %v1023_v49 }
 0x3cd   : > { %2898 = vmatpush3.bf16.msra.mxu1 %v1023_v49  ;;  %v4073_v49 = vrot.slane %v3929_v27, %v1178_v43 }
 0x3ce   : > { %v2887_v51 = vpop.f32.mrb[12].mxu0  ;;  %2899 = vmatprep.subr.bf16.mxu1 %v1024_v36 }
 0x3cf   : > { %v1004_v31 = vpop.f32.mrb[13].mxu0 }
 0x3d0   : > { %v2888_v18 = vpop.f32.mrb[14].mxu0 }
 0x3d1   : > { %v1026_v29 = vpack.c.bf16 %v2888_v18, %v2887_v51  ;;  %v1007_v57 = vpop.f32.mrb[15].mxu0  ;;  %2900 = vmatpush3.bf16.msra.mxu1 %v1024_v36 }
 0x3d2   : > { %v1025_v58 = vpack.c.bf16 %v1007_v57, %v1004_v31 }
 0x3d4   : > { %2901 = vmatprep.subr.bf16.mxu1 %v1025_v58 }
 0x3d5   : > { %2902 = vmatpush3.bf16.msra.mxu1 %v1025_v58 }
 0x3d6   : > { %2903 = vmatprep.subr.bf16.mxu1 %v1026_v29 }
 0x3d9   : > { %2904 = vmatpush3.bf16.msra.mxu1 %v1026_v29 }
 0x3dc   : > { %2906 = vmatmul.mubr.bf16.vlgmr.msra.gmra.mrb[32].mxu1 %v3904_v9  ;;  %v3164_v9 = vld [vmem:[%s3816_s26 + $0x40] sm:$0xff]  }
 0x3dd   : > { %2909 = vmatprep.mubr.bf16.mxu1 %v3906_v10  ;;  %v3165_v10 = vld [vmem:[%s3816_s26] sm:$0xff]   ;;  %2624 = vmatprep.subr.bf16.mxu1 %v3164_v9 }
 0x3de   : > { %2625 = vmatpush3.bf16.msra.mxu1 %v3165_v10 }
 0x3e4   : > { %2910 = vmatmul.mubr.bf16.gmra.mrb[36].mxu1 %v3910_v11  ;;  %v3166_v11 = vld [vmem:[%s3816_s26 + $0x48] sm:$0xff]  }
 0x3e5   : > { %2913 = vmatprep.mubr.bf16.mxu1 %v3912_v12  ;;  %v3167_v12 = vld [vmem:[%s3816_s26 + $0x8] sm:$0xff]   ;;  %2626 = vmatprep.subr.bf16.mxu1 %v3166_v11 }
 0x3e6   : > { %2627 = vmatpush3.bf16.msra.mxu1 %v3167_v12 }
 0x3ec   : > { %2914 = vmatmul.mubr.bf16.gmra.mrb[40].mxu1 %v3916_v13  ;;  %v3168_v13 = vld [vmem:[%s3816_s26 + $0x50] sm:$0xff]  }
 0x3ed   : > { %2917 = vmatprep.mubr.bf16.mxu1 %v3918_v14  ;;  %v3169_v14 = vld [vmem:[%s3816_s26 + $0x10] sm:$0xff]   ;;  %2628 = vmatprep.subr.bf16.mxu1 %v3168_v13 }
 0x3ee   : > { %2629 = vmatpush3.bf16.msra.mxu1 %v3169_v14 }
 0x3f4   : > { %2918 = vmatmul.mubr.bf16.gmra.mrb[44].mxu1 %v3922_v15  ;;  %v3170_v15 = vld [vmem:[%s3816_s26 + $0x58] sm:$0xff]  }
 0x3f5   : > { %2630 = vmatprep.subr.bf16.mxu1 %v3170_v15 }
 0x3f6   : > { %2631 = vmatpush3.bf16.msra.mxu1 %v3171_v16 }
 0x3f7   : > { %2632 = vmatprep.subr.bf16.mxu1 %v3172_v30  ;;  %v1037_v30 = vmul.f32 %v4063_v8, %v3961_v63  ;;  %v1036_v63 = vmul.f32 %v4063_v8, %v3972_v5 }
 0x3fa   : > { %2633 = vmatpush3.bf16.msra.mxu1 %v3173_v59 }
 0x3fb   : > { %2634 = vmatprep.subr.bf16.mxu1 %v3174_v20 }
 0x3fe   : > { %2635 = vmatpush3.bf16.msra.mxu1 %v3175_v60 }
 0x3ff   : > { %2636 = vmatprep.subr.bf16.mxu1 %v3176_v61  ;;  %v1035_v61 = vmul.f32 %v4063_v8, %v3965_v2 }
 0x402   : > { %2637 = vmatpush3.bf16.msra.mxu1 %v3177_v62 }
 0x4af   : > { %v2907_v1 = vpop.f32.mrb[32].mxu1 }
 0x4b0   : > { %v1090_v37 = vadd.f32 1e-05, %v2907_v1  ;;  %v1081_v6 = vpop.f32.mrb[33].mxu1 }
 0x4b1   : > { %v1082_v34 = vadd.f32 1e-05, %v1081_v6  ;;  %v2908_v28 = vpop.f32.mrb[34].mxu1 }
 0x4b2   : > { %3196 = vrsqrt.f32 %v1090_v37  ;;  %v1093_v38 = vadd.f32 1e-05, %v2908_v28  ;;  %v1084_v22 = vpop.f32.mrb[35].mxu1  ;;  %v1038_v37 = vmul.f32 %v4063_v8, %v3969_v4 }
 0x4b3   : > { %3198 = vrsqrt.f32 %v1082_v34  ;;  %v1085_v7 = vadd.f32 1e-05, %v1084_v22 }
 0x4b4   : > { %3200 = vrsqrt.f32 %v1093_v38 }
 0x4b5   : > { %3202 = vrsqrt.f32 %v1085_v7 }
 0x4b7   : > { %v2911_v26 = vpop.f32.mrb[36].mxu1 }
 0x4b8   : > { %v1106_v19 = vadd.f32 1e-05, %v2911_v26  ;;  %v1097_v23 = vpop.f32.mrb[37].mxu1 }
 0x4b9   : > { %v1098_v41 = vadd.f32 1e-05, %v1097_v23  ;;  %v2912_v42 = vpop.f32.mrb[38].mxu1 }
 0x4ba   : > { %3204 = vrsqrt.f32 %v1106_v19  ;;  %v1109_v25 = vadd.f32 1e-05, %v2912_v42  ;;  %v1100_v44 = vpop.f32.mrb[39].mxu1 }
 0x4bb   : > { %3206 = vrsqrt.f32 %v1098_v41  ;;  %v1101_v46 = vadd.f32 1e-05, %v1100_v44  ;;  %v1041_v44 = vmul.f32 %v4063_v8, %v3985_v39 }
 0x4bc   : > { %v3197_v47 = vpop.eup %3196  ;;  %3208 = vrsqrt.f32 %v1109_v25 }
 0x4bd   : > { %v3199_v36 = vpop.eup %3198  ;;  %3210 = vrsqrt.f32 %v1101_v46  ;;  %v1162_v51 = vmul.f32 %v3197_v47, %v1033_v45 }
 0x4be   : > { %v3201_v31 = vpop.eup %3200  ;;  %v1160_v18 = vmul.f32 %v3199_v36, %v1031_v32  ;;  %v1039_v32 = vmul.f32 %v4063_v8, %v3989_v48 }
 0x4bf   : > { %v3203_v29 = vpop.eup %3202  ;;  %v2915_v57 = vpop.f32.mrb[40].mxu1  ;;  %v1163_v58 = vmul.f32 %v3201_v31, %v1034_v40  ;;  %v1182_v54 = vadd.f32 %v4073_v49, %v1162_v51  ;;  %v1042_v51 = vmul.f32 %v4063_v8, %v3993_v53 }
 0x4c0   : > { %v1122_v9 = vadd.f32 1e-05, %v2915_v57  ;;  %v1113_v52 = vpop.f32.mrb[41].mxu1  ;;  %v1161_v10 = vmul.f32 %v3203_v29, %v1032_v50  ;;  %v1180_v16 = vadd.f32 %v4073_v49, %v1160_v18  ;;  %v1040_v50 = vmul.f32 %v4063_v8, %v3996_v56 }
 0x4c1   : > { %v1114_v11 = vadd.f32 1e-05, %v1113_v52  ;;  %v2916_v12 = vpop.f32.mrb[42].mxu1  ;;  %v1183_v13 = vadd.f32 %v4073_v49, %v1163_v58  ;;  %v1045_v56 = vmul.f32 %v4063_v8, %v4009_v17 }
 0x4c2   : > { %3212 = vrsqrt.f32 %v1122_v9  ;;  %v1125_v14 = vadd.f32 1e-05, %v2916_v12  ;;  %v1116_v15 = vpop.f32.mrb[43].mxu1  ;;  %v1181_v55 = vadd.f32 %v4073_v49, %v1161_v10  ;;  %v1043_v12 = vmul.f32 %v4063_v8, %v4013_v0 }
 0x4c3   : > { %3214 = vrsqrt.f32 %v1114_v11  ;;  %v1117_v59 = vadd.f32 1e-05, %v1116_v15  ;;  %v4083_v20 = vpack.c.bf16 %v1183_v13, %v1182_v54 }
 0x4c4   : > { %v3205_v60 = vpop.eup %3204  ;;  %3216 = vrsqrt.f32 %v1125_v14  ;;  %v1196_v62 = vpack.c.bf16 %v1181_v55, %v1180_v16  ;;  %v1046_v14 = vmul.f32 %v4063_v8, %v4017_v3  ;;  %v1044_v55 = vmul.f32 %v4063_v8, %v4020_v24 }
 0x4c5   : > { %v3207_v1 = vpop.eup %3206  ;;  %3218 = vrsqrt.f32 %v1117_v59  ;;  %v1166_v6 = vmul.f32 %v3205_v60, %v1037_v30 }
 0x4c6   : > { %v3209_v34 = vpop.eup %3208  ;;  %2921 = vmatprep.subr.bf16.mxu0 %v1196_v62  ;;  %1521 = vmatprep.mubr.bf16.mxu1 %v1196_v62  ;;  %v1164_v28 = vmul.f32 %v3207_v1, %v1035_v61  ;;  %v4137_v1 = vld [vmem:[#allocation7 + $0x8] sm:$0xff]  }
 0x4c7   : > { %v3211_v38 = vpop.eup %3210  ;;  %v2919_v22 = vpop.f32.mrb[44].mxu1  ;;  %2922 = vmatpush3.bf16.msra.mxu0 %v1196_v62  ;;  %v1167_v35 = vmul.f32 %v3209_v34, %v1038_v37  ;;  %v1186_v23 = vadd.f32 %v4073_v49, %v1166_v6  ;;  %v4139_v37 = vld [vmem:[#allocation7 + $0x10] sm:$0xff]   ;;  %v4143_v6 = vld [vmem:[#allocation7 + $0x18] sm:$0xff]   ;;  %v4149_v34 = vld [vmem:[#allocation7 + $0x28] sm:$0xff]  }
 0x4c8   : > { %v1138_v2 = vadd.f32 1e-05, %v2919_v22  ;;  %v1129_v7 = vpop.f32.mrb[45].mxu1  ;;  %2923 = vmatprep.subr.bf16.mxu0 %v4083_v20  ;;  %v1165_v26 = vmul.f32 %v3211_v38, %v1036_v63  ;;  %v1184_v43 = vadd.f32 %v4073_v49, %v1164_v28  ;;  %v4151_v63 = vld [vmem:[#allocation7 + $0x30] sm:$0xff]   ;;  %v4155_v28 = vld [vmem:[#allocation7 + $0x38] sm:$0xff]  }
 0x4c9   : > { %v1130_v19 = vadd.f32 1e-05, %v1129_v7  ;;  %v2920_v4 = vpop.f32.mrb[46].mxu1  ;;  %v1187_v41 = vadd.f32 %v4073_v49, %v1167_v35  ;;  %v3178_v38 = vld [vmem:[%s3816_s26 + $0x78] sm:$0xff]  }
 0x4ca   : > { %3220 = vrsqrt.f32 %v1138_v2  ;;  %v1141_v5 = vadd.f32 1e-05, %v2920_v4  ;;  %v1132_v42 = vpop.f32.mrb[47].mxu1  ;;  %v1185_v25 = vadd.f32 %v4073_v49, %v1165_v26  ;;  %v3179_v22 = vld [vmem:[%s3816_s26 + $0x38] sm:$0xff]   ;;  %2638 = vmatprep.subr.bf16.mxu1 %v3178_v38 }
 0x4cb   : > { %3222 = vrsqrt.f32 %v1130_v19  ;;  %v1133_v45 = vadd.f32 1e-05, %v1132_v42  ;;  %2924 = vmatpush3.bf16.msra.mxu0 %v4083_v20  ;;  %v4099_v46 = vpack.c.bf16 %v1187_v41, %v1186_v23  ;;  %2639 = vmatpush3.bf16.msra.mxu1 %v3179_v22 }
 0x4cc   : > { %v3213_v47 = vpop.eup %3212  ;;  %3224 = vrsqrt.f32 %v1141_v5  ;;  %v4103_v36 = vpack.c.bf16 %v1185_v25, %v1184_v43 }
 0x4cd   : > { %v3215_v40 = vpop.eup %3214  ;;  %3226 = vrsqrt.f32 %v1133_v45  ;;  %v1170_v31 = vmul.f32 %v3213_v47, %v1041_v44 }
 0x4ce   : > { %v3217_v39 = vpop.eup %3216  ;;  %2925 = vmatprep.subr.bf16.mxu0 %v4103_v36  ;;  %v1168_v18 = vmul.f32 %v3215_v40, %v1039_v32 }
 0x4cf   : > { %v3219_v29 = vpop.eup %3218  ;;  %2926 = vmatpush3.bf16.msra.mxu0 %v4103_v36  ;;  %v1171_v48 = vmul.f32 %v3217_v39, %v1042_v51  ;;  %v1190_v58 = vadd.f32 %v4073_v49, %v1170_v31 }
 0x4d0   : > { %2927 = vmatprep.subr.bf16.mxu0 %v4099_v46  ;;  %v1169_v57 = vmul.f32 %v3219_v29, %v1040_v50  ;;  %v1188_v9 = vadd.f32 %v4073_v49, %v1168_v18 }
 0x4d1   : > { %v1191_v53 = vadd.f32 %v4073_v49, %v1171_v48 }
 0x4d2   : > { %v1189_v52 = vadd.f32 %v4073_v49, %v1169_v57 }
 0x4d3   : > { %2928 = vmatpush3.bf16.msra.mxu0 %v4099_v46  ;;  %v4119_v10 = vpack.c.bf16 %v1191_v53, %v1190_v58 }
 0x4d4   : > { %v3221_v11 = vpop.eup %3220  ;;  %v4123_v54 = vpack.c.bf16 %v1189_v52, %v1188_v9 }
 0x4d5   : > { %v3223_v13 = vpop.eup %3222  ;;  %v1174_v15 = vmul.f32 %v3221_v11, %v1045_v56 }
 0x4d6   : > { %v3225_v16 = vpop.eup %3224  ;;  %2929 = vmatprep.subr.bf16.mxu0 %v4123_v54  ;;  %v1172_v17 = vmul.f32 %v3223_v13, %v1043_v12 }
 0x4d7   : > { %v3227_v30 = vpop.eup %3226  ;;  %2930 = vmatpush3.bf16.msra.mxu0 %v4123_v54  ;;  %v1175_v59 = vmul.f32 %v3225_v16, %v1046_v14  ;;  %v1194_v60 = vadd.f32 %v4073_v49, %v1174_v15 }
 0x4d8   : > { %2931 = vmatprep.subr.bf16.mxu0 %v4119_v10  ;;  %v1173_v0 = vmul.f32 %v3227_v30, %v1044_v55  ;;  %v1192_v3 = vadd.f32 %v4073_v49, %v1172_v17 }
 0x4d9   : > { %v1195_v61 = vadd.f32 %v4073_v49, %v1175_v59 }
 0x4da   : > { %v1193_v62 = vadd.f32 %v4073_v49, %v1173_v0  ;;  %v4145_v49 = vld [vmem:[#allocation7 + $0x20] sm:$0xff]  }
 0x4db   : > { %2932 = vmatpush3.bf16.msra.mxu0 %v4119_v10  ;;  %v1203_v24 = vpack.c.bf16 %v1195_v61, %v1194_v60 }
 0x4dc   : > { %v1202_v8 = vpack.c.bf16 %v1193_v62, %v1192_v3 }
 0x4de   : > { %2933 = vmatprep.subr.bf16.mxu0 %v1202_v8 }
 0x4df   : > { %2934 = vmatpush3.bf16.msra.mxu0 %v1202_v8 }
 0x4e0   : > { %2935 = vmatprep.subr.bf16.mxu0 %v1203_v24 }
 0x4e3   : > { %2936 = vmatpush3.bf16.msra.mxu0 %v1203_v24 }
 0x4e6   : > { %2938 = vmatmul.mubr.bf16.vlgmr.msra.gmra.mrb[16].mxu0 %v4137_v1 }
 0x4e7   : > { %2941 = vmatprep.mubr.bf16.mxu0 %v4139_v37 }
 0x4ee   : > { %2942 = vmatmul.mubr.bf16.gmra.mrb[20].mxu0 %v4143_v6 }
 0x4ef   : > { %2945 = vmatprep.mubr.bf16.mxu0 %v4145_v49 }
 0x4f6   : > { %2946 = vmatmul.mubr.bf16.gmra.mrb[24].mxu0 %v4149_v34 }
 0x4f7   : > { %2949 = vmatprep.mubr.bf16.mxu0 %v4151_v63 }
 0x4fe   : > { %2950 = vmatmul.mubr.bf16.gmra.mrb[28].mxu0 %v4155_v28 }
 0x4ff   : > { %2969 = vmatprep.mubr.bf16.mxu0 %v4044_v33 }
 0x5b9   : > { %v2939_v35 = vpop.f32.mrb[16].mxu0 }
 0x5ba   : > { %v1286_v2 = vpop.f32.mrb[17].mxu0 }
 0x5bb   : > { %v2940_v7 = vpop.f32.mrb[18].mxu0 }
 0x5bc   : > { %v1350_v26 = vpack.c.bf16 %v2940_v7, %v2939_v35  ;;  %v1289_v19 = vpop.f32.mrb[19].mxu0 }
 0x5bd   : > { %v1349_v4 = vpack.c.bf16 %v1289_v19, %v1286_v2 }
 0x5bf   : > { %1522 = vmatmul.mubr.bf16.vlgmr.msra.gmra.mrb[48].mxu1 %v1349_v4 }
 0x5c0   : > { %1529 = vmatprep.mubr.bf16.mxu1 %v4083_v20 }
 0x5c1   : > { %v2943_v23 = vpop.f32.mrb[20].mxu0 }
 0x5c2   : > { %v1302_v41 = vpop.f32.mrb[21].mxu0 }
 0x5c3   : > { %v2944_v5 = vpop.f32.mrb[22].mxu0 }
 0x5c4   : > { %v1352_v42 = vpack.c.bf16 %v2944_v5, %v2943_v23  ;;  %v1305_v43 = vpop.f32.mrb[23].mxu0 }
 0x5c5   : > { %v1351_v25 = vpack.c.bf16 %v1305_v43, %v1302_v41 }
 0x5c7   : > { %1530 = vmatmul.mubr.bf16.gmra.mrb[52].mxu1 %v1350_v26 }
 0x5c8   : > { %1537 = vmatprep.mubr.bf16.mxu1 %v4103_v36  ;;  %v1391_v36 = vsub.s32 3, %v3925_v21 }
 0x5c9   : > { %v2947_v33 = vpop.f32.mrb[24].mxu0 }
 0x5ca   : > { %v1318_v44 = vpop.f32.mrb[25].mxu0  ;;  %v4168_v29 = vrot.slane %v3929_v27, %v1391_v36 }
 0x5cb   : > { %v2948_v45 = vpop.f32.mrb[26].mxu0 }
 0x5cc   : > { %v1354_v47 = vpack.c.bf16 %v2948_v45, %v2947_v33  ;;  %v1321_v32 = vpop.f32.mrb[27].mxu0 }
 0x5cd   : > { %v1353_v40 = vpack.c.bf16 %v1321_v32, %v1318_v44 }
 0x5cf   : > { %1538 = vmatmul.mubr.bf16.gmra.mrb[56].mxu1 %v1351_v25 }
 0x5d0   : > { %1545 = vmatprep.mubr.bf16.mxu1 %v4099_v46 }
 0x5d1   : > { %v2951_v51 = vpop.f32.mrb[28].mxu0 }
 0x5d2   : > { %v1334_v20 = vpop.f32.mrb[29].mxu0 }
 0x5d3   : > { %v2952_v31 = vpop.f32.mrb[30].mxu0 }
 0x5d4   : > { %v1356_v39 = vpack.c.bf16 %v2952_v31, %v2951_v51  ;;  %v1337_v50 = vpop.f32.mrb[31].mxu0 }
 0x5d5   : > { %v1355_v18 = vpack.c.bf16 %v1337_v50, %v1334_v20 }
 0x5d7   : > { %1546 = vmatmul.mubr.bf16.gmra.mrb[60].mxu1 %v1352_v42 }
 0x5d8   : > { %1553 = vmatprep.mubr.bf16.mxu1 %v4123_v54 }
 0x5df   : > { %1554 = vmatmul.mubr.bf16.gmra.mrb[64].mxu1 %v1353_v40 }
 0x5e0   : > { %1561 = vmatprep.mubr.bf16.mxu1 %v4119_v10 }
 0x5e7   : > { %1562 = vmatmul.mubr.bf16.gmra.mrb[68].mxu1 %v1354_v47 }
 0x5e8   : > { %1569 = vmatprep.mubr.bf16.mxu1 %v1202_v8 }
 0x5ef   : > { %1570 = vmatmul.mubr.bf16.gmra.mrb[72].mxu1 %v1355_v18 }
 0x5f0   : > { %1577 = vmatprep.mubr.bf16.mxu1 %v1203_v24 }
 0x5f7   : > { %1578 = vmatmul.mubr.bf16.gmra.mrb[76].mxu1 %v1356_v39 }
 0x692   : > { %v2640_v46 = vpop.f32.mrb[48].mxu1 }
 0x693   : > { %v2641_v48 = vpop.f32.mrb[49].mxu1 }
 0x694   : > { %v2642_v57 = vadd.f32 %v2641_v48, %v2640_v46  ;;  %v2643_v58 = vpop.f32.mrb[50].mxu1 }
 0x695   : > { %v2644_v53 = vpop.f32.mrb[51].mxu1 }
 0x696   : > { %v1524_v9 = vadd.f32 %v2642_v57, %v4168_v29  ;;  %v2645_v52 = vadd.f32 %v2644_v53, %v2643_v58 }
 0x698   : > { %v1602_v56 = vmul.f32 0.1, %v1524_v9  ;;  %v1527_v10 = vadd.f32 %v2645_v52, %v4168_v29  ;;  %vm1586_vm0 = vcmp.gt.f32.partialorder %v1524_v9, 0.0 }
 0x69a   : > { %vm1587_vm1 = vcmp.gt.f32.partialorder %v1527_v10, 0.0  ;;  %v1603_v11 = vmul.f32 0.1, %v1527_v10  ;;  %v2646_v12 = vpop.f32.mrb[52].mxu1  ;;  %v1618_v15 = vsel %vm1586_vm0, %v1524_v9, %v1602_v56  ;;  %vm3516_vm0 = vmmov (!%p2529_p0), 0  }
 0x69b   : > { %v2647_v54 = vpop.f32.mrb[53].mxu1 }
 0x69c   : > { %v2648_v13 = vadd.f32 %v2647_v54, %v2646_v12  ;;  %v2649_v14 = vpop.f32.mrb[54].mxu1  ;;  %v1619_v27 = vsel %vm1587_vm1, %v1527_v10, %v1603_v11 }
 0x69d   : > { %v2650_v16 = vpop.f32.mrb[55].mxu1  ;;  %v4172_v55 = vpack.c.bf16 %v1619_v27, %v1618_v15 }
 0x69e   : > { %v1532_v17 = vadd.f32 %v2648_v13, %v4168_v29  ;;  %v2651_v30 = vadd.f32 %v2650_v16, %v2649_v14 }
 0x69f   : > { %2953 = vmatprep.subr.bf16.mxu0 %v4172_v55 }
 0x6a0   : > { %v1604_v59 = vmul.f32 0.1, %v1532_v17  ;;  %v1535_v0 = vadd.f32 %v2651_v30, %v4168_v29  ;;  %2954 = vmatpush3.bf16.msra.mxu0 %v4172_v55  ;;  %vm1588_vm2 = vcmp.gt.f32.partialorder %v1532_v17, 0.0 }
 0x6a2   : > { %vm1589_vm3 = vcmp.gt.f32.partialorder %v1535_v0, 0.0  ;;  %v1605_v60 = vmul.f32 0.1, %v1535_v0  ;;  %v2652_v61 = vpop.f32.mrb[56].mxu1  ;;  %v1620_v8 = vsel %vm1588_vm2, %v1532_v17, %v1604_v59 }
 0x6a3   : > { %v2653_v3 = vpop.f32.mrb[57].mxu1 }
 0x6a4   : > { %v2654_v62 = vadd.f32 %v2653_v3, %v2652_v61  ;;  %v2655_v24 = vpop.f32.mrb[58].mxu1  ;;  %v1621_v38 = vsel %vm1589_vm3, %v1535_v0, %v1605_v60 }
 0x6a5   : > { %v2656_v22 = vpop.f32.mrb[59].mxu1  ;;  %v4178_v35 = vpack.c.bf16 %v1621_v38, %v1620_v8 }
 0x6a6   : > { %v1540_v2 = vadd.f32 %v2654_v62, %v4168_v29  ;;  %v2657_v7 = vadd.f32 %v2656_v22, %v2655_v24 }
 0x6a7   : > { %2955 = vmatprep.subr.bf16.mxu0 %v4178_v35 }
 0x6a8   : > { %v1606_v26 = vmul.f32 0.1, %v1540_v2  ;;  %v1543_v19 = vadd.f32 %v2657_v7, %v4168_v29  ;;  %2956 = vmatpush3.bf16.msra.mxu0 %v4178_v35  ;;  %vm1590_vm4 = vcmp.gt.f32.partialorder %v1540_v2, 0.0 }
 0x6aa   : > { %vm1591_vm5 = vcmp.gt.f32.partialorder %v1543_v19, 0.0  ;;  %v1607_v4 = vmul.f32 0.1, %v1543_v19  ;;  %v2658_v23 = vpop.f32.mrb[60].mxu1  ;;  %v1622_v43 = vsel %vm1590_vm4, %v1540_v2, %v1606_v26 }
 0x6ab   : > { %v2659_v41 = vpop.f32.mrb[61].mxu1 }
 0x6ac   : > { %v2660_v5 = vadd.f32 %v2659_v41, %v2658_v23  ;;  %v2661_v42 = vpop.f32.mrb[62].mxu1  ;;  %v1623_v25 = vsel %vm1591_vm5, %v1543_v19, %v1607_v4 }
 0x6ad   : > { %v2662_v33 = vpop.f32.mrb[63].mxu1  ;;  %v4184_v44 = vpack.c.bf16 %v1623_v25, %v1622_v43 }
 0x6ae   : > { %v1548_v45 = vadd.f32 %v2660_v5, %v4168_v29  ;;  %v2663_v47 = vadd.f32 %v2662_v33, %v2661_v42 }
 0x6af   : > { %2957 = vmatprep.subr.bf16.mxu0 %v4184_v44 }
 0x6b0   : > { %v1608_v32 = vmul.f32 0.1, %v1548_v45  ;;  %v1551_v40 = vadd.f32 %v2663_v47, %v4168_v29  ;;  %2958 = vmatpush3.bf16.msra.mxu0 %v4184_v44  ;;  %vm1592_vm6 = vcmp.gt.f32.partialorder %v1548_v45, 0.0 }
 0x6b2   : > { %vm1593_vm7 = vcmp.gt.f32.partialorder %v1551_v40, 0.0  ;;  %v1609_v51 = vmul.f32 0.1, %v1551_v40  ;;  %v2664_v20 = vpop.f32.mrb[64].mxu1  ;;  %v1624_v18 = vsel %vm1592_vm6, %v1548_v45, %v1608_v32 }
 0x6b3   : > { %v2665_v31 = vpop.f32.mrb[65].mxu1 }
 0x6b4   : > { %v2666_v39 = vadd.f32 %v2665_v31, %v2664_v20  ;;  %v2667_v50 = vpop.f32.mrb[66].mxu1  ;;  %v1625_v36 = vsel %vm1593_vm7, %v1551_v40, %v1609_v51 }
 0x6b5   : > { %v2668_v46 = vpop.f32.mrb[67].mxu1  ;;  %v4190_v48 = vpack.c.bf16 %v1625_v36, %v1624_v18  ;;  %v3181_v18 = vld [vmem:[%s3816_s26 + $0x80] sm:$0xff]   ;;  %v3183_v36 = vld [vmem:[%s3816_s26 + $0x88] sm:$0xff]  }
 0x6b6   : > { %v1556_v57 = vadd.f32 %v2666_v39, %v4168_v29  ;;  %v2669_v58 = vadd.f32 %v2668_v46, %v2667_v50  ;;  %v3180_v50 = vld [vmem:[%s3816_s26 + $0xc0] sm:$0xff]   ;;  %v3184_v46 = vld [vmem:[%s3816_s26 + $0xd0] sm:$0xff]  }
 0x6b7   : > { %2959 = vmatprep.subr.bf16.mxu0 %v4190_v48 }
 0x6b8   : > { %v1610_v53 = vmul.f32 0.1, %v1556_v57  ;;  %v1559_v9 = vadd.f32 %v2669_v58, %v4168_v29  ;;  %2960 = vmatpush3.bf16.msra.mxu0 %v4190_v48  ;;  %vm1594_vm8 = vcmp.gt.f32.partialorder %v1556_v57, 0.0  ;;  %v3186_v58 = vld [vmem:[%s3816_s26 + $0xd8] sm:$0xff]  }
 0x6ba   : > { %vm1595_vm9 = vcmp.gt.f32.partialorder %v1559_v9, 0.0  ;;  %v1611_v52 = vmul.f32 0.1, %v1559_v9  ;;  %v2670_v56 = vpop.f32.mrb[68].mxu1  ;;  %v1626_v54 = vsel %vm1594_vm8, %v1556_v57, %v1610_v53  ;;  %v3185_v57 = vld [vmem:[%s3816_s26 + $0x90] sm:$0xff]   ;;  %v3189_v53 = vld [vmem:[%s3816_s26 + $0xa0] sm:$0xff]  }
 0x6bb   : > { %v2671_v10 = vpop.f32.mrb[69].mxu1 }
 0x6bc   : > { %v2672_v11 = vadd.f32 %v2671_v10, %v2670_v56  ;;  %v2673_v12 = vpop.f32.mrb[70].mxu1  ;;  %v1627_v13 = vsel %vm1595_vm9, %v1559_v9, %v1611_v52  ;;  %v3190_v9 = vld [vmem:[%s3816_s26 + $0xe8] sm:$0xff]   ;;  %v3194_v56 = vld [vmem:[%s3816_s26 + $0xf8] sm:$0xff]  }
 0x6bd   : > { %v2674_v14 = vpop.f32.mrb[71].mxu1  ;;  %v4196_v15 = vpack.c.bf16 %v1627_v13, %v1626_v54  ;;  %v3191_v52 = vld [vmem:[%s3816_s26 + $0xa8] sm:$0xff]   ;;  %v3195_v10 = vld [vmem:[%s3816_s26 + $0xb8] sm:$0xff]  }
 0x6be   : > { %v1564_v27 = vadd.f32 %v2672_v11, %v4168_v29  ;;  %v2675_v16 = vadd.f32 %v2674_v14, %v2673_v12 }
 0x6bf   : > { %2961 = vmatprep.subr.bf16.mxu0 %v4196_v15 }
 0x6c0   : > { %v1612_v17 = vmul.f32 0.1, %v1564_v27  ;;  %v1567_v30 = vadd.f32 %v2675_v16, %v4168_v29  ;;  %2962 = vmatpush3.bf16.msra.mxu0 %v4196_v15  ;;  %vm1596_vm10 = vcmp.gt.f32.partialorder %v1564_v27, 0.0 }
 0x6c2   : > { %vm1597_vm11 = vcmp.gt.f32.partialorder %v1567_v30, 0.0  ;;  %v1613_v59 = vmul.f32 0.1, %v1567_v30  ;;  %v2676_v0 = vpop.f32.mrb[72].mxu1  ;;  %v1628_v62 = vsel %vm1596_vm10, %v1564_v27, %v1612_v17 }
 0x6c3   : > { %v2677_v60 = vpop.f32.mrb[73].mxu1 }
 0x6c4   : > { %v2678_v61 = vadd.f32 %v2677_v60, %v2676_v0  ;;  %v2679_v3 = vpop.f32.mrb[74].mxu1  ;;  %v1629_v24 = vsel %vm1597_vm11, %v1567_v30, %v1613_v59 }
 0x6c5   : > { %v2680_v8 = vpop.f32.mrb[75].mxu1  ;;  %v4202_v38 = vpack.c.bf16 %v1629_v24, %v1628_v62 }
 0x6c6   : > { %v1572_v22 = vadd.f32 %v2678_v61, %v4168_v29  ;;  %v2681_v2 = vadd.f32 %v2680_v8, %v2679_v3 }
 0x6c7   : > { %2963 = vmatprep.subr.bf16.mxu0 %v4202_v38 }
 0x6c8   : > { %v1614_v7 = vmul.f32 0.1, %v1572_v22  ;;  %v1575_v26 = vadd.f32 %v2681_v2, %v4168_v29  ;;  %2964 = vmatpush3.bf16.msra.mxu0 %v4202_v38  ;;  %vm1598_vm12 = vcmp.gt.f32.partialorder %v1572_v22, 0.0 }
 0x6ca   : > { %vm1599_vm13 = vcmp.gt.f32.partialorder %v1575_v26, 0.0  ;;  %v1615_v19 = vmul.f32 0.1, %v1575_v26  ;;  %v2682_v4 = vpop.f32.mrb[76].mxu1  ;;  %v1630_v42 = vsel %vm1598_vm12, %v1572_v22, %v1614_v7  ;;  %v3228_v7 = vld [vmem:[%s3831_s27] sm:$0xff] }
 0x6cb   : > { %v2683_v23 = vpop.f32.mrb[77].mxu1 }
 0x6cc   : > { %v2684_v41 = vadd.f32 %v2683_v23, %v2682_v4  ;;  %v2685_v5 = vpop.f32.mrb[78].mxu1  ;;  %v1631_v43 = vsel %vm1599_vm13, %v1575_v26, %v1615_v19 }
 0x6cd   : > { %v2686_v25 = vpop.f32.mrb[79].mxu1  ;;  %v4208_v33 = vpack.c.bf16 %v1631_v43, %v1630_v42 }
 0x6ce   : > { %v1580_v45 = vadd.f32 %v2684_v41, %v4168_v29  ;;  %v2687_v47 = vadd.f32 %v2686_v25, %v2685_v5  ;;  %v3229_v5 = vld [vmem:[#allocation2] sm:$0xff]  ;;  %v3230_v25 = vld [vmem:[#allocation2 + $0x8] sm:$0xff] }
 0x6cf   : > { %2965 = vmatprep.subr.bf16.mxu0 %v4208_v33 }
 0x6d0   : > { %v1616_v32 = vmul.f32 0.1, %v1580_v45  ;;  %v1583_v40 = vadd.f32 %v2687_v47, %v4168_v29  ;;  %2966 = vmatpush3.bf16.msra.mxu0 %v4208_v33  ;;  %vm1600_vm14 = vcmp.gt.f32.partialorder %v1580_v45, 0.0  ;;  %v3182_v29 = vld [vmem:[%s3816_s26 + $0xc8] sm:$0xff]  }
 0x6d2   : > { %vm1601_vm15 = vcmp.gt.f32.partialorder %v1583_v40, 0.0  ;;  %v1617_v51 = vmul.f32 0.1, %v1583_v40  ;;  %v1632_v20 = vsel %vm1600_vm14, %v1580_v45, %v1616_v32 }
 0x6d4   : > { %v1633_v31 = vsel %vm1601_vm15, %v1583_v40, %v1617_v51 }
 0x6d5   : > { %v4214_v39 = vpack.c.bf16 %v1633_v31, %v1632_v20  ;;  %v3231_v31 = vld [vmem:[#allocation2 + $0x10] sm:$0xff] }
 0x6d7   : > { %2967 = vmatprep.subr.bf16.mxu0 %v4214_v39 }
 0x6d8   : > { %2968 = vmatpush3.bf16.msra.mxu0 %v4214_v39 }
 0x6d9   : > { %2704 = vmatprep.subr.bf16.mxu0 %v3180_v50 }
 0x6db   : > { %2970 = vmatmul.mubr.bf16.vlgmr.msra.gmra.mrb[32].mxu0 %v4137_v1  ;;  %v3187_v1 = vld [vmem:[%s3816_s26 + $0x98] sm:$0xff]  }
 0x6dc   : > { %2973 = vmatprep.mubr.bf16.mxu0 %v4139_v37  ;;  %2705 = vmatpush3.bf16.msra.mxu0 %v3181_v18  ;;  %v3188_v37 = vld [vmem:[%s3816_s26 + $0xe0] sm:$0xff]   ;;  %v3232_v18 = vld [vmem:[#allocation2 + $0x18] sm:$0xff] }
 0x6dd   : > { %2706 = vmatprep.subr.bf16.mxu0 %v3182_v29 }
 0x6e0   : > { %2707 = vmatpush3.bf16.msra.mxu0 %v3183_v36 }
 0x6e1   : > { %2708 = vmatprep.subr.bf16.mxu0 %v3184_v46 }
 0x6e3   : > { %2974 = vmatmul.mubr.bf16.gmra.mrb[36].mxu0 %v4143_v6  ;;  %v3192_v6 = vld [vmem:[%s3816_s26 + $0xf0] sm:$0xff]  }
 0x6e4   : > { %2977 = vmatprep.mubr.bf16.mxu0 %v4145_v49  ;;  %2709 = vmatpush3.bf16.msra.mxu0 %v3185_v57  ;;  %v3193_v49 = vld [vmem:[%s3816_s26 + $0xb0] sm:$0xff]  }
 0x6e5   : > { %2710 = vmatprep.subr.bf16.mxu0 %v3186_v58 }
 0x6e8   : > { %2711 = vmatpush3.bf16.msra.mxu0 %v3187_v1 }
 0x6e9   : > { %2712 = vmatprep.subr.bf16.mxu0 %v3188_v37 }
 0x6eb   : > { %2978 = vmatmul.mubr.bf16.gmra.mrb[40].mxu0 %v4149_v34 }
 0x6ec   : > { %2981 = vmatprep.mubr.bf16.mxu0 %v4151_v63  ;;  %2713 = vmatpush3.bf16.msra.mxu0 %v3189_v53 }
 0x6ed   : > { %2714 = vmatprep.subr.bf16.mxu0 %v3190_v9  ;;  %v3233_v9 = vld [vmem:[#allocation2 + $0x20] sm:$0xff] }
 0x6f0   : > { %2715 = vmatpush3.bf16.msra.mxu0 %v3191_v52 }
 0x6f1   : > { %2716 = vmatprep.subr.bf16.mxu0 %v3192_v6 }
 0x6f3   : > { %2982 = vmatmul.mubr.bf16.gmra.mrb[44].mxu0 %v4155_v28 }
 0x6f4   : > { %1912 = vmatprep.mubr.bf16.mxu0 %v4172_v55  ;;  %2717 = vmatpush3.bf16.msra.mxu0 %v3193_v49  ;;  %v3234_v49 = vld [vmem:[#allocation2 + $0x28] sm:$0xff] }
 0x6f5   : > { %2718 = vmatprep.subr.bf16.mxu0 %v3194_v56 }
 0x6f8   : > { %2719 = vmatpush3.bf16.msra.mxu0 %v3195_v10 }
 0x7ae   : > { %v2971_v11 = vpop.f32.mrb[32].mxu0 }
 0x7af   : > { %v1676_v34 = vpop.f32.mrb[33].mxu0 }
 0x7b0   : > { %v2972_v12 = vpop.f32.mrb[34].mxu0 }
 0x7b1   : > { %v1740_v63 = vpack.c.bf16 %v2972_v12, %v2971_v11  ;;  %v1679_v54 = vpop.f32.mrb[35].mxu0 }
 0x7b2   : > { %v1739_v13 = vpack.c.bf16 %v1679_v54, %v1676_v34 }
 0x7b4   : > { %1913 = vmatmul.mubr.bf16.vlgmr.msra.gmra.mrb[48].mxu0 %v1739_v13 }
 0x7b5   : > { %1920 = vmatprep.mubr.bf16.mxu0 %v4178_v35 }
 0x7b6   : > { %v2975_v14 = vpop.f32.mrb[36].mxu0 }
 0x7b7   : > { %v1692_v27 = vpop.f32.mrb[37].mxu0 }
 0x7b8   : > { %v2976_v16 = vpop.f32.mrb[38].mxu0 }
 0x7b9   : > { %v1742_v28 = vpack.c.bf16 %v2976_v16, %v2975_v14  ;;  %v1695_v17 = vpop.f32.mrb[39].mxu0  ;;  %v3235_v14 = vld [vmem:[#allocation2 + $0x30] sm:$0xff] }
 0x7ba   : > { %v1741_v55 = vpack.c.bf16 %v1695_v17, %v1692_v27 }
 0x7bc   : > { %1921 = vmatmul.mubr.bf16.gmra.mrb[52].mxu0 %v1740_v63 }
 0x7bd   : > { %1928 = vmatprep.mubr.bf16.mxu0 %v4184_v44  ;;  %v1782_v44 = vsub.s32 4, %v3925_v21 }
 0x7be   : > { %v2979_v30 = vpop.f32.mrb[40].mxu0 }
 0x7bf   : > { %v1708_v59 = vpop.f32.mrb[41].mxu0  ;;  %v4251_v26 = vrot.slane %v3228_v7, %v1782_v44 }
 0x7c0   : > { %v2980_v0 = vpop.f32.mrb[42].mxu0 }
 0x7c1   : > { %v1744_v60 = vpack.c.bf16 %v2980_v0, %v2979_v30  ;;  %v1711_v61 = vpop.f32.mrb[43].mxu0 }
 0x7c2   : > { %v1743_v3 = vpack.c.bf16 %v1711_v61, %v1708_v59 }
 0x7c4   : > { %1929 = vmatmul.mubr.bf16.gmra.mrb[56].mxu0 %v1741_v55 }
 0x7c5   : > { %1936 = vmatprep.mubr.bf16.mxu0 %v4190_v48 }
 0x7c6   : > { %v2983_v62 = vpop.f32.mrb[44].mxu0 }
 0x7c7   : > { %v1724_v35 = vpop.f32.mrb[45].mxu0 }
 0x7c8   : > { %v2984_v24 = vpop.f32.mrb[46].mxu0 }
 0x7c9   : > { %v1746_v8 = vpack.c.bf16 %v2984_v24, %v2983_v62  ;;  %v1727_v22 = vpop.f32.mrb[47].mxu0  ;;  %v3237_v62 = vld [vmem:[#allocation2 + $0x40] sm:$0xff] }
 0x7ca   : > { %v1745_v2 = vpack.c.bf16 %v1727_v22, %v1724_v35 }
 0x7cc   : > { %1937 = vmatmul.mubr.bf16.gmra.mrb[60].mxu0 %v1742_v28  ;;  %v3236_v28 = vld [vmem:[#allocation2 + $0x38] sm:$0xff] }
 0x7cd   : > { %1944 = vmatprep.mubr.bf16.mxu0 %v4196_v15 }
 0x7d4   : > { %1945 = vmatmul.mubr.bf16.gmra.mrb[64].mxu0 %v1743_v3 }
 0x7d5   : > { %1952 = vmatprep.mubr.bf16.mxu0 %v4202_v38 }
 0x7dc   : > { %1953 = vmatmul.mubr.bf16.gmra.mrb[68].mxu0 %v1744_v60 }
 0x7dd   : > { %1960 = vmatprep.mubr.bf16.mxu0 %v4208_v33 }
 0x7e4   : > { %1961 = vmatmul.mubr.bf16.gmra.mrb[72].mxu0 %v1745_v2 }
 0x7e5   : > { %1968 = vmatprep.mubr.bf16.mxu0 %v4214_v39 }
 0x7ec   : > { %1969 = vmatmul.mubr.bf16.gmra.mrb[76].mxu0 %v1746_v8  ;;  %v3238_v8 = vld [vmem:[#allocation2 + $0x48] sm:$0xff] }
 0x887   : > { %v2720_v48 = vpop.f32.mrb[48].mxu0 }
 0x888   : > { %v2721_v19 = vpop.f32.mrb[49].mxu0 }
 0x889   : > { %v2722_v4 = vadd.f32 %v2721_v19, %v2720_v48  ;;  %v2723_v23 = vpop.f32.mrb[50].mxu0 }
 0x88a   : > { %v2724_v15 = vpop.f32.mrb[51].mxu0 }
 0x88b   : > { %v1915_v41 = vadd.f32 %v2722_v4, %v4251_v26  ;;  %v2725_v38 = vadd.f32 %v2724_v15, %v2723_v23  ;;  %v3239_v15 = vld [vmem:[#allocation2 + $0x50] sm:$0xff] }
 0x88d   : > { %v1977_v42 = vadd.f32 %v3229_v5, %v1915_v41  ;;  %v1918_v43 = vadd.f32 %v2725_v38, %v4251_v26  ;;  %v3240_v5 = vld [vmem:[#allocation2 + $0x58] sm:$0xff] }
 0x88f   : > { %1993 = vst [vmem:[#allocation2] sm:$0xff] %v1977_v42  ;;  %v1978_v33 = vadd.f32 %v3230_v25, %v1918_v43  ;;  %v2726_v45 = vpop.f32.mrb[52].mxu0 }
 0x890   : > { %v2727_v21 = vpop.f32.mrb[53].mxu0 }
 0x891   : > { %1994 = vst [vmem:[#allocation2 + $0x8] sm:$0xff] %v1978_v33  ;;  %v2728_v47 = vadd.f32 %v2727_v21, %v2726_v45  ;;  %v2729_v32 = vpop.f32.mrb[54].mxu0 }
 0x892   : > { %v2730_v40 = vpop.f32.mrb[55].mxu0 }
 0x893   : > { %v1923_v51 = vadd.f32 %v2728_v47, %v4251_v26  ;;  %v2731_v20 = vadd.f32 %v2730_v40, %v2729_v32  ;;  %v3241_v40 = vld [vmem:[#allocation2 + $0x60] sm:$0xff] }
 0x895   : > { %v1979_v39 = vadd.f32 %v3231_v31, %v1923_v51  ;;  %v1926_v50 = vadd.f32 %v2731_v20, %v4251_v26  ;;  %v3242_v31 = vld [vmem:[#allocation2 + $0x68] sm:$0xff] }
 0x897   : > { %1995 = vst [vmem:[#allocation2 + $0x10] sm:$0xff] %v1979_v39  ;;  %v1980_v29 = vadd.f32 %v3232_v18, %v1926_v50  ;;  %v2732_v36 = vpop.f32.mrb[56].mxu0 }
 0x898   : > { %v2733_v46 = vpop.f32.mrb[57].mxu0 }
 0x899   : > { %1996 = vst [vmem:[#allocation2 + $0x18] sm:$0xff] %v1980_v29  ;;  %v2734_v57 = vadd.f32 %v2733_v46, %v2732_v36  ;;  %v2735_v58 = vpop.f32.mrb[58].mxu0 }
 0x89a   : > { %v2736_v1 = vpop.f32.mrb[59].mxu0 }
 0x89b   : > { %v1931_v37 = vadd.f32 %v2734_v57, %v4251_v26  ;;  %v2737_v53 = vadd.f32 %v2736_v1, %v2735_v58  ;;  %v3243_v1 = vld [vmem:[#allocation2 + $0x70] sm:$0xff] }
 0x89d   : > { %v1981_v52 = vadd.f32 %v3233_v9, %v1931_v37  ;;  %v1934_v6 = vadd.f32 %v2737_v53, %v4251_v26  ;;  %v3244_v9 = vld [vmem:[#allocation2 + $0x78] sm:$0xff] }
 0x89f   : > { %1997 = vst [vmem:[#allocation2 + $0x20] sm:$0xff] %v1981_v52  ;;  %v1982_v56 = vadd.f32 %v3234_v49, %v1934_v6  ;;  %v2738_v10 = vpop.f32.mrb[60].mxu0  ;;  %v3245_v6 = vld [vmem:[#allocation13] sm:$0xff] (!%p2529_p0)   ;;  %v3246_v49 = vld [vmem:[#allocation13 + $0x8] sm:$0xff] (!%p2529_p0)  }
 0x8a0   : > { %v2739_v11 = vpop.f32.mrb[61].mxu0  ;;  %2985 = vmatprep.subr.bf16.mxu0 (!%p2529_p0), %v3245_v6 }
 0x8a1   : > { %1998 = vst [vmem:[#allocation2 + $0x28] sm:$0xff] %v1982_v56  ;;  %v2740_v34 = vadd.f32 %v2739_v11, %v2738_v10  ;;  %v2741_v12 = vpop.f32.mrb[62].mxu0  ;;  %2986 = vmatpush3.bf16.msra.mxu0 (!%p2529_p0), %v3245_v6  ;;  %v3247_v56 = vld [vmem:[#allocation13 + $0x10] sm:$0xff] (!%p2529_p0)   ;;  %v3248_v10 = vld [vmem:[#allocation13 + $0x18] sm:$0xff] (!%p2529_p0)   ;;  %v2013_v11 = vld [vmem:[#allocation2] sm:$0xff] (!%p2529_p0) }
 0x8a2   : > { %v2742_v63 = vpop.f32.mrb[63].mxu0  ;;  %2987 = vmatprep.subr.bf16.mxu0 (!%p2529_p0), %v3246_v49 }
 0x8a3   : > { %v1939_v54 = vadd.f32 %v2740_v34, %v4251_v26  ;;  %v2743_v13 = vadd.f32 %v2742_v63, %v2741_v12  ;;  %v2014_v34 = vld [vmem:[#allocation2 + $0x8] sm:$0xff] (!%p2529_p0) }
 0x8a4   : > { %v2029_v12 = vpack.c.bf16 (!%p2529_p0), %v2014_v34, %v2013_v11  ;;  %v3250_v63 = vld [vmem:[#allocation13 + $0x28] sm:$0xff] (!%p2529_p0)  }
 0x8a5   : > { %v1983_v27 = vadd.f32 %v3235_v14, %v1939_v54  ;;  %v1942_v16 = vadd.f32 %v2743_v13, %v4251_v26  ;;  %2988 = vmatpush3.bf16.msra.mxu0 (!%p2529_p0), %v3246_v49  ;;  %v3251_v54 = vld [vmem:[#allocation13 + $0x30] sm:$0xff] (!%p2529_p0)   ;;  %v3252_v13 = vld [vmem:[#allocation13 + $0x38] sm:$0xff] (!%p2529_p0)  }
 0x8a6   : > { %2989 = vmatprep.subr.bf16.mxu0 (!%p2529_p0), %v3247_v56  ;;  %3001 = vmatprep.mubr.bf16.mxu0 (!%p2529_p0), %v2029_v12  ;;  %v2015_v14 = vld [vmem:[#allocation2 + $0x10] sm:$0xff] (!%p2529_p0) }
 0x8a7   : > { %1999 = vst [vmem:[#allocation2 + $0x30] sm:$0xff] %v1983_v27  ;;  %v1984_v17 = vadd.f32 %v3236_v28, %v1942_v16  ;;  %v2744_v55 = vpop.f32.mrb[64].mxu0  ;;  %v2016_v27 = vld [vmem:[#allocation2 + $0x18] sm:$0xff] (!%p2529_p0)  ;;  %v2017_v16 = vld [vmem:[#allocation2 + $0x20] sm:$0xff] (!%p2529_p0) }
 0x8a8   : > { %v2745_v30 = vpop.f32.mrb[65].mxu0  ;;  %v2018_v28 = vld [vmem:[#allocation2 + $0x28] sm:$0xff] (!%p2529_p0) }
 0x8a9   : > { %2000 = vst [vmem:[#allocation2 + $0x38] sm:$0xff] %v1984_v17  ;;  %v2746_v59 = vadd.f32 %v2745_v30, %v2744_v55  ;;  %v2747_v0 = vpop.f32.mrb[66].mxu0  ;;  %2990 = vmatpush3.bf16.msra.mxu0 (!%p2529_p0), %v3247_v56  ;;  %v2030_v17 = vpack.c.bf16 (!%p2529_p0), %v2016_v27, %v2015_v14  ;;  %v2031_v55 = vpack.c.bf16 (!%p2529_p0), %v2018_v28, %v2017_v16 }
 0x8aa   : > { %v2748_v60 = vpop.f32.mrb[67].mxu0  ;;  %2991 = vmatprep.subr.bf16.mxu0 (!%p2529_p0), %v3248_v10 }
 0x8ab   : > { %v1947_v61 = vadd.f32 %v2746_v59, %v4251_v26  ;;  %v2749_v3 = vadd.f32 %v2748_v60, %v2747_v0 }
 0x8ad   : > { %v1985_v35 = vadd.f32 %v3237_v62, %v1947_v61  ;;  %v1950_v24 = vadd.f32 %v2749_v3, %v4251_v26  ;;  %2992 = vmatpush3.bf16.msra.mxu0 (!%p2529_p0), %v3248_v10 }
 0x8ae   : > { %v2019_v30 = vld [vmem:[#allocation2 + $0x30] sm:$0xff] (!%p2529_p0) }
 0x8af   : > { %2001 = vst [vmem:[#allocation2 + $0x40] sm:$0xff] %v1985_v35  ;;  %v1986_v22 = vadd.f32 %v3238_v8, %v1950_v24  ;;  %v2750_v2 = vpop.f32.mrb[68].mxu0 }
 0x8b0   : > { %v2751_v44 = vpop.f32.mrb[69].mxu0  ;;  %v2020_v59 = vld [vmem:[#allocation2 + $0x38] sm:$0xff] (!%p2529_p0) }
 0x8b1   : > { %2002 = vst [vmem:[#allocation2 + $0x48] sm:$0xff] %v1986_v22  ;;  %v2752_v48 = vadd.f32 %v2751_v44, %v2750_v2  ;;  %v2753_v7 = vpop.f32.mrb[70].mxu0  ;;  %v2032_v61 = vpack.c.bf16 (!%p2529_p0), %v2020_v59, %v2019_v30 }
 0x8b2   : > { %v2754_v19 = vpop.f32.mrb[71].mxu0 }
 0x8b3   : > { %v1955_v4 = vadd.f32 %v2752_v48, %v4251_v26  ;;  %v2755_v23 = vadd.f32 %v2754_v19, %v2753_v7  ;;  %v3515_v19 = vmov (!%p2529_p0), 0.0  }
 0x8b4   : > { %3017 = vmatprep.subr.bf16.mxu1 (!%p2529_p0), %v3515_v19  ;;  %3033 = vmatprep.mubr.msk.bf16.mxu1 (!%p2529_p0), %vm3516_vm0, %v3515_v19 }
 0x8b5   : > { %v1987_v41 = vadd.f32 %v3239_v15, %v1955_v4  ;;  %v1958_v38 = vadd.f32 %v2755_v23, %v4251_v26  ;;  %v4275_v4 = vld [vmem:[%s4346_s7] ss:$0 sm:$0xff] (!%p2529_p0) }
 0x8b6   : > { %v2021_v0 = vld [vmem:[#allocation2 + $0x40] sm:$0xff] (!%p2529_p0) }
 0x8b7   : > { %2003 = vst [vmem:[#allocation2 + $0x50] sm:$0xff] %v1987_v41  ;;  %v1988_v42 = vadd.f32 %v3240_v5, %v1958_v38  ;;  %v2756_v43 = vpop.f32.mrb[72].mxu0 }
 0x8b8   : > { %v2757_v25 = vpop.f32.mrb[73].mxu0  ;;  %v2022_v60 = vld [vmem:[#allocation2 + $0x48] sm:$0xff] (!%p2529_p0) }
 0x8b9   : > { %2004 = vst [vmem:[#allocation2 + $0x58] sm:$0xff] %v1988_v42  ;;  %v2758_v33 = vadd.f32 %v2757_v25, %v2756_v43  ;;  %v2759_v45 = vpop.f32.mrb[74].mxu0  ;;  %v2033_v3 = vpack.c.bf16 (!%p2529_p0), %v2022_v60, %v2021_v0 }
 0x8ba   : > { %v2760_v21 = vpop.f32.mrb[75].mxu0 }
 0x8bb   : > { %v1963_v47 = vadd.f32 %v2758_v33, %v4251_v26  ;;  %v2761_v32 = vadd.f32 %v2760_v21, %v2759_v45 }
 0x8bd   : > { %v1989_v51 = vadd.f32 %v3241_v40, %v1963_v47  ;;  %v1966_v20 = vadd.f32 %v2761_v32, %v4251_v26 }
 0x8be   : > { %v2023_v62 = vld [vmem:[#allocation2 + $0x50] sm:$0xff] (!%p2529_p0) }
 0x8bf   : > { %2005 = vst [vmem:[#allocation2 + $0x60] sm:$0xff] %v1989_v51  ;;  %v1990_v39 = vadd.f32 %v3242_v31, %v1966_v20  ;;  %v2762_v50 = vpop.f32.mrb[76].mxu0 }
 0x8c0   : > { %v2763_v18 = vpop.f32.mrb[77].mxu0  ;;  %v2024_v35 = vld [vmem:[#allocation2 + $0x58] sm:$0xff] (!%p2529_p0) }
 0x8c1   : > { %2006 = vst [vmem:[#allocation2 + $0x68] sm:$0xff] %v1990_v39  ;;  %v2764_v29 = vadd.f32 %v2763_v18, %v2762_v50  ;;  %v2765_v36 = vpop.f32.mrb[78].mxu0  ;;  %v2034_v22 = vpack.c.bf16 (!%p2529_p0), %v2024_v35, %v2023_v62 }
 0x8c2   : > { %v2766_v46 = vpop.f32.mrb[79].mxu0 }
 0x8c3   : > { %v1971_v57 = vadd.f32 %v2764_v29, %v4251_v26  ;;  %v2767_v58 = vadd.f32 %v2766_v46, %v2765_v36  ;;  %2012 = sbr.rel (%p2529_p0) target bundleno = 2762 (0xaca), region = 92 }
 0x8c5   : > { %v1991_v37 = vadd.f32 %v3243_v1, %v1971_v57  ;;  %v1974_v53 = vadd.f32 %v2767_v58, %v4251_v26  ;;  %v3249_v26 = vld [vmem:[#allocation13 + $0x20] sm:$0xff] (!%p2529_p0)  }
 0x8c6   : > { %2993 = vmatprep.subr.bf16.mxu0 (!%p2529_p0), %v3249_v26  ;;  %v2025_v24 = vld [vmem:[#allocation2 + $0x60] sm:$0xff] (!%p2529_p0) }
 0x8c7   : > { %2007 = vst [vmem:[#allocation2 + $0x70] sm:$0xff] %v1991_v37  ;;  %v1992_v52 = vadd.f32 %v3244_v9, %v1974_v53  ;;  %2994 = vmatpush3.bf16.msra.mxu0 (!%p2529_p0), %v3249_v26 }
 0x8c8   : > { %2995 = vmatprep.subr.bf16.mxu0 (!%p2529_p0), %v3250_v63  ;;  %v2026_v8 = vld [vmem:[#allocation2 + $0x68] sm:$0xff] (!%p2529_p0) }
 0x8c9   : > { %2008 = vst [vmem:[#allocation2 + $0x78] sm:$0xff] %v1992_v52  ;;  %v2035_v2 = vpack.c.bf16 (!%p2529_p0), %v2026_v8, %v2025_v24 }
 0x8cb   : > { %2996 = vmatpush3.bf16.msra.mxu0 %v3250_v63 }
 0x8cc   : > { %2997 = vmatprep.subr.bf16.mxu0 %v3251_v54 }
 0x8ce   : > { %v2027_v44 = vld [vmem:[#allocation2 + $0x70] sm:$0xff] }
 0x8cf   : > { %2998 = vmatpush3.bf16.msra.mxu0 %v3251_v54 }
 0x8d0   : > { %2999 = vmatprep.subr.bf16.mxu0 %v3252_v13  ;;  %v2028_v48 = vld [vmem:[#allocation2 + $0x78] sm:$0xff] }
 0x8d1   : > { %v2036_v7 = vpack.c.bf16 %v2028_v48, %v2027_v44 }
 0x8d3   : > { %3000 = vmatpush3.bf16.msra.mxu0 %v3252_v13 }
 0x8d6   : > { %3002 = vmatmul.mubr.bf16.vlgmr.msra.gmra.mrb[0].mxu0 %v2030_v17 }
 0x8d7   : > { %3005 = vmatprep.mubr.bf16.mxu0 %v2031_v55 }
 0x8de   : > { %3006 = vmatmul.mubr.bf16.gmra.mrb[4].mxu0 %v2032_v61 }
 0x8df   : > { %3009 = vmatprep.mubr.bf16.mxu0 %v2033_v3 }
 0x8e6   : > { %3010 = vmatmul.mubr.bf16.gmra.mrb[8].mxu0 %v2034_v22 }
 0x8e7   : > { %3013 = vmatprep.mubr.bf16.mxu0 %v2035_v2 }
 0x8ee   : > { %3014 = vmatmul.mubr.bf16.gmra.mrb[12].mxu0 %v2036_v7 }
 0x9a9   : > { %v3003_v23 = vpop.f32.mrb[0].mxu0 }
 0x9aa   : > { %v2151_v15 = vadd.f32 %v3003_v23, %v4275_v4  ;;  %v2142_v41 = vpop.f32.mrb[1].mxu0 }
 0x9ab   : > { %v2143_v38 = vadd.f32 %v4275_v4, %v2142_v41  ;;  %v3004_v5 = vpop.f32.mrb[2].mxu0 }
 0x9ac   : > { %v2223_v42 = vmul.f32 0.1, %v2151_v15  ;;  %v2154_v43 = vadd.f32 %v3004_v5, %v4275_v4  ;;  %v2145_v25 = vpop.f32.mrb[3].mxu0  ;;  %vm2207_vm1 = vcmp.gt.f32.partialorder %v2151_v15, 0.0 }
 0x9ad   : > { %v2221_v33 = vmul.f32 0.1, %v2143_v38  ;;  %v2146_v45 = vadd.f32 %v4275_v4, %v2145_v25  ;;  %vm2205_vm3 = vcmp.gt.f32.partialorder %v2143_v38, 0.0 }
 0x9ae   : > { %vm2208_vm2 = vcmp.gt.f32.partialorder %v2154_v43, 0.0  ;;  %v2224_v21 = vmul.f32 0.1, %v2154_v43  ;;  %v2239_v32 = vsel %vm2207_vm1, %v2151_v15, %v2223_v42 }
 0x9af   : > { %v2222_v47 = vmul.f32 0.1, %v2146_v45  ;;  %vm2206_vm4 = vcmp.gt.f32.partialorder %v2146_v45, 0.0  ;;  %v2237_v20 = vsel %vm2205_vm3, %v2143_v38, %v2221_v33 }
 0x9b0   : > { %v2240_v40 = vsel %vm2208_vm2, %v2154_v43, %v2224_v21  ;;  %v2263_v21 = vstv %s2262_s24 }
 0x9b1   : > { %v3007_v51 = vpop.f32.mrb[4].mxu0  ;;  %v2238_v31 = vsel %vm2206_vm4, %v2146_v45, %v2222_v47  ;;  %v2255_v39 = vpack.c.bf16 %v2240_v40, %v2239_v32 }
 0x9b2   : > { %v2167_v50 = vadd.f32 %v3007_v51, %v4275_v4  ;;  %v2254_v18 = vpack.c.bf16 %v2238_v31, %v2237_v20  ;;  %v2158_v29 = vpop.f32.mrb[5].mxu0 }
 0x9b3   : > { %v2159_v36 = vadd.f32 %v4275_v4, %v2158_v29  ;;  %v3008_v46 = vpop.f32.mrb[6].mxu0 }
 0x9b4   : > { %vm2211_vm5 = vcmp.gt.f32.partialorder %v2167_v50, 0.0  ;;  %v2227_v57 = vmul.f32 0.1, %v2167_v50  ;;  %3018 = vmatpush3.bf16.xpose.msra.mxu1 %v2254_v18  ;;  %v2170_v58 = vadd.f32 %v3008_v46, %v4275_v4  ;;  %v2161_v1 = vpop.f32.mrb[7].mxu0 }
 0x9b5   : > { %vm2209_vm6 = vcmp.gt.f32.partialorder %v2159_v36, 0.0  ;;  %v2225_v37 = vmul.f32 0.1, %v2159_v36  ;;  %v2162_v53 = vadd.f32 %v4275_v4, %v2161_v1  ;;  %3019 = vmatprep.subr.bf16.mxu1 %v3515_v19 }
 0x9b6   : > { %vm2212_vm7 = vcmp.gt.f32.partialorder %v2170_v58, 0.0  ;;  %v2228_v9 = vmul.f32 0.1, %v2170_v58  ;;  %v2243_v52 = vsel %vm2211_vm5, %v2167_v50, %v2227_v57 }
 0x9b7   : > { %vm2210_vm8 = vcmp.gt.f32.partialorder %v2162_v53, 0.0  ;;  %v2226_v6 = vmul.f32 0.1, %v2162_v53  ;;  %v2241_v49 = vsel %vm2209_vm6, %v2159_v36, %v2225_v37 }
 0x9b8   : > { %v2244_v56 = vsel %vm2212_vm7, %v2170_v58, %v2228_v9 }
 0x9b9   : > { %v3011_v10 = vpop.f32.mrb[8].mxu0  ;;  %v2242_v11 = vsel %vm2210_vm8, %v2162_v53, %v2226_v6  ;;  %v2257_v34 = vpack.c.bf16 %v2244_v56, %v2243_v52 }
 0x9ba   : > { %v2183_v12 = vadd.f32 %v3011_v10, %v4275_v4  ;;  %v2256_v26 = vpack.c.bf16 %v2242_v11, %v2241_v49  ;;  %v2174_v63 = vpop.f32.mrb[9].mxu0 }
 0x9bb   : > { %v2175_v54 = vadd.f32 %v4275_v4, %v2174_v63  ;;  %v3012_v13 = vpop.f32.mrb[10].mxu0 }
 0x9bc   : > { %3020 = vmatpush3.bf16.xpose.msra.mxu1 %v2255_v39  ;;  %vm2215_vm9 = vcmp.gt.f32.partialorder %v2183_v12, 0.0  ;;  %v2231_v14 = vmul.f32 0.1, %v2183_v12  ;;  %v2186_v27 = vadd.f32 %v3012_v13, %v4275_v4  ;;  %v2177_v16 = vpop.f32.mrb[11].mxu0 }
 0x9bd   : > { %3021 = vmatprep.subr.bf16.mxu1 %v3515_v19  ;;  %vm2213_vm10 = vcmp.gt.f32.partialorder %v2175_v54, 0.0  ;;  %v2229_v28 = vmul.f32 0.1, %v2175_v54  ;;  %v2178_v17 = vadd.f32 %v4275_v4, %v2177_v16 }
 0x9be   : > { %vm2216_vm11 = vcmp.gt.f32.partialorder %v2186_v27, 0.0  ;;  %v2232_v55 = vmul.f32 0.1, %v2186_v27  ;;  %v2247_v30 = vsel %vm2215_vm9, %v2183_v12, %v2231_v14 }
 0x9bf   : > { %vm2214_vm12 = vcmp.gt.f32.partialorder %v2178_v17, 0.0  ;;  %v2230_v59 = vmul.f32 0.1, %v2178_v17  ;;  %v2245_v0 = vsel %vm2213_vm10, %v2175_v54, %v2229_v28 }
 0x9c0   : > { %v2248_v60 = vsel %vm2216_vm11, %v2186_v27, %v2232_v55 }
 0x9c1   : > { %v3015_v61 = vpop.f32.mrb[12].mxu0  ;;  %v2246_v3 = vsel %vm2214_vm12, %v2178_v17, %v2230_v59  ;;  %v2259_v62 = vpack.c.bf16 %v2248_v60, %v2247_v30 }
 0x9c2   : > { %v2199_v35 = vadd.f32 %v3015_v61, %v4275_v4  ;;  %v2258_v24 = vpack.c.bf16 %v2246_v3, %v2245_v0  ;;  %v2190_v8 = vpop.f32.mrb[13].mxu0 }
 0x9c3   : > { %v2191_v22 = vadd.f32 %v4275_v4, %v2190_v8  ;;  %v3016_v2 = vpop.f32.mrb[14].mxu0 }
 0x9c4   : > { %3022 = vmatpush3.bf16.xpose.msra.mxu1 %v2256_v26  ;;  %vm2219_vm13 = vcmp.gt.f32.partialorder %v2199_v35, 0.0  ;;  %v2235_v44 = vmul.f32 0.1, %v2199_v35  ;;  %v2202_v48 = vadd.f32 %v3016_v2, %v4275_v4  ;;  %v2193_v7 = vpop.f32.mrb[15].mxu0 }
 0x9c5   : > { %3023 = vmatprep.subr.bf16.mxu1 %v3515_v19  ;;  %vm2217_vm14 = vcmp.gt.f32.partialorder %v2191_v22, 0.0  ;;  %v2233_v23 = vmul.f32 0.1, %v2191_v22  ;;  %v2194_v15 = vadd.f32 %v4275_v4, %v2193_v7  ;;  %v2253_v4 = vld [vmem:[%s4347_s8] sm:$0x1] }
 0x9c6   : > { %vm2220_vm15 = vcmp.gt.f32.partialorder %v2202_v48, 0.0  ;;  %v2236_v41 = vmul.f32 0.1, %v2202_v48  ;;  %v2251_v38 = vsel %vm2219_vm13, %v2199_v35, %v2235_v44 }
 0x9c7   : > { %vm2218_vm0 = vcmp.gt.f32.partialorder %v2194_v15, 0.0  ;;  %v2234_v5 = vmul.f32 0.1, %v2194_v15  ;;  %v2249_v42 = vsel %vm2217_vm14, %v2191_v22, %v2233_v23 }
 0x9c8   : > { %v2252_v43 = vsel %vm2220_vm15, %v2202_v48, %v2236_v41 }
 0x9c9   : > { %v2250_v25 = vsel %vm2218_vm0, %v2194_v15, %v2234_v5  ;;  %v2261_v33 = vpack.c.bf16 %v2252_v43, %v2251_v38 }
 0x9ca   : > { %v2260_v45 = vpack.c.bf16 %v2250_v25, %v2249_v42 }
 0x9cc   : > { %3024 = vmatpush3.bf16.xpose.msra.mxu1 %v2257_v34 }
 0x9cd   : > { %3025 = vmatprep.subr.bf16.mxu1 %v3515_v19 }
 0x9d4   : > { %3026 = vmatpush3.bf16.xpose.msra.mxu1 %v2258_v24 }
 0x9d5   : > { %3027 = vmatprep.subr.bf16.mxu1 %v3515_v19 }
 0x9dc   : > { %3028 = vmatpush3.bf16.xpose.msra.mxu1 %v2259_v62 }
 0x9dd   : > { %3029 = vmatprep.subr.bf16.mxu1 %v3515_v19 }
 0x9e4   : > { %3030 = vmatpush3.bf16.xpose.msra.mxu1 %v2260_v45 }
 0x9e5   : > { %3031 = vmatprep.subr.bf16.mxu1 %v3515_v19 }
 0x9ec   : > { %3032 = vmatpush3.bf16.xpose.msra.mxu1 %v2261_v33 }
 0x9f3   : > { %3034 = vmatmul.mubr.bf16.vlgmr.msra.gmra.mrb[0].mxu1 %v2253_v4 }
 0xac6   : > { %v2298_v47 = vpop.f32.mrb[0].mxu1 }
 0xac7   : > { %v2299_v32 = vadd.f32 %v2298_v47, %v2263_v21  ;;  %v3035_v40 = vpop.f32.mrb[1].mxu1 }
 0xac8   : > { %v2301_v51 = vpop.f32.mrb[2].mxu1 }
 0xac9   : > { %2304 = vst [vmem:[#allocation14] sm:$0x1] %v2299_v32  ;;  %v3036_v20 = vpop.f32.mrb[3].mxu1 }
 0xaca PF: > { %p3094_p2 = scmp.eq.s32.totalorder %s3595_s9, 1  ;;  %s3517_s28 = smov [#allocation14]  }
 0xacb   : > { %s2312_s23 = sshll.u32 %s3517_s28, 4  ;;  %s2313_s23 = int_to_ptr.vmem [resolvable:$true] %s2312_s23 }
 0xacc   : > { %s3423_s20 = scalar_lea.vmem %s2313_s23, 16  ;;  %s3429_s1 = scalar_lea.vmem %s2313_s23, 32 }
 0xacd   : > { %p3424_p11 = scmp.ne.s32.totalorder %s2313_s23, %s3423_s20  ;;  %p3430_p7 = scmp.lt.s32.totalorder %s2313_s23, %s2313_s23 }
 0xace   : > { %p3431_p10 = scmp.lt.s32.totalorder %s3429_s1, %s3423_s20 }
 0xacf   : > { %p3425_p13 = pnand %p3424_p11, %p3094_p2 }
 0xad0   : > { %p3432_p1 = por %p3431_p10, %p3430_p7 }
 0xad1   : > { %p3426_p3 = pneg %p3425_p13 }
 0xad3   : > { %p3433_p8 = pnand %p3432_p1, %p3426_p3 }
 0xad5   : > { %3436 = shalt.err (!%p3433_p8)
}
 0xad6   : > { %s3437_s26 = scalar_lea.hbm %s4349_s10, 16 }
 0xad7   : > { %p3438_p4 = scmp.ne.s32.totalorder %s4349_s10, %s3437_s26  ;;  %p3443_p9 = scmp.lt.u32.totalorder %s3437_s26, %s4349_s10 }
 0xad9   : > { %p3439_p5 = pnand %p3438_p4, %p3094_p2 }
 0xadb   : > { %p3440_p6 = pneg %p3439_p5 }
 0xadd   : > { %p3445_p12 = pnand %p3443_p9, %p3440_p6 }
 0xadf   : > { %3448 = shalt.err (!%p3445_p12)
}
 0xae0   : > { %3060 = dma.vmem_to_hbm [thread:$0]  (%p3094_p2), %s2313_s23, 16, %s4349_s10, [#allocation6]  }
 0xae1   : > { %3486 = dma.done.wait (%p3094_p2), [#allocation6], 16  }
 0xae2   : > { %3488 = vsyncadd (%p3094_p2), [#allocation6], 4294967280 }
 0xae3 PF: > { %p22_p0 = scmp.ge.s32.totalorder %s3722_s29, 4   ;;  %s4377_s15 = smov %s3495_s16 }
 0xae4   : > { %s4378_s16 = smov %s3499_s17  ;;  %s4379_s17 = smov %s3753_s12 }
 0xae5   : > { %s4380_s18 = smov %s3722_s29  ;;  %24 = sbr.rel (!%p22_p0) target bundleno = 8 (0x8), region = 128 }
 0xaec   :  { %2325 = vsyncpa [#allocation5], 1 }
 0xaed   :  { %2327 = vsyncpa [#allocation5 + $0x1], 1 }
 0xaee   :  { %2328 = vsyncpa [#allocation8], 1 }
 0xaef   :  { %2329 = vsyncpa [#allocation11], 1 }
 0xaf0   :  { %2330 = vsyncpa [#allocation6], 1 }
 0xaf1   :  { %2332 = vsyncpa [#allocation6 + $0x1], 1 }

// kernel: tpu_custom_call.1
= control target key start
LH: loop header
LB: loop body
LE: loop exit
PB: predicated region body
PF: predicated region fallthrough
CT: control target
= control target key end

     0   :  { %s4339_s0 = inlined_call_operand.hbm [shape: f32[128,128], index: 0, kind: input, shape index: {}]   ;;  %s4340_s1 = inlined_call_operand.hbm [shape: bf16[128,128], index: 1, kind: input, shape index: {}]   ;;  %s4341_s2 = inlined_call_operand.hbm [shape: bf16[128,128], index: 2, kind: input, shape index: {}]   ;;  %s4342_s3 = inlined_call_operand.hbm [shape: bf16[128,128], index: 3, kind: input, shape index: {}]   ;;  %s4343_s4 = inlined_call_operand.vmem [shape: f32[2,8,128], index: 4, kind: input, shape index: {}]   ;;  %s4344_s5 = inlined_call_operand.hbm [shape: bf16[2,2,256,128], index: 5, kind: input, shape index: {}]   ;;  %s4345_s6 = inlined_call_operand.hbm [shape: bf16[128,128], index: 6, kind: input, shape index: {}]   ;;  %s4346_s7 = inlined_call_operand.vmem [shape: f32[1,128], index: 7, kind: input, shape index: {}]   ;;  %s4347_s8 = inlined_call_operand.vmem [shape: bf16[1,128], index: 8, kind: input, shape index: {}]   ;;  %s4348_s9 = inlined_call_operand.<no memory space> [shape: f32[1,1], index: 9, kind: input, shape index: {}]   ;;  %s4349_s10 = inlined_call_operand.hbm [shape: f32[1,128], index: 10, kind: output, shape index: {}]  }
   0x1   :  { %4357 = sst [smem:[#allocation21_spill]] %s4340_s1 }
   0x2   :  { %15 = sst [smem:[#allocation3]] %s4348_s9 }
   0x3   :  { %16 = vsyncpa [#allocation5], 0 }
   0x4   :  { %17 = vsyncpa [#allocation8], 0 }
   0x5   :  { %18 = vsyncpa [#allocation11], 0 }
   0x6   :  { %19 = vsyncpa [#allocation6], 0  ;;  %s3576_s15 = smov 0   ;;  %s3578_s16 = smov 0  }
   0x7   :  { %s3580_s17 = smov 0   ;;  %s3582_s18 = smov 0  }
   0x8 LB: > { %s3595_s9 = sadd.s32 4294967295, %s3503_s18   ;;  %p155_p0 = scmp.ne.s32.totalorder %s3495_s16, %s3491_s15  ;;  %s3503_s18 = sphi %s3582_s18, %s4380_s18   ;;  %s3499_s17 = sphi %s3580_s17, %s4379_s17   ;;  %s3495_s16 = sphi %s3578_s16, %s4378_s16   ;;  %s3491_s15 = sphi %s3576_s15, %s4377_s15  }
   0x9   : > { %p4350_p1 = scmp.eq.s32.totalorder %s3595_s9, 0  ;;  %p2422_p2 = scmp.ge.s32.totalorder %s3503_s18, 1 }
   0xa   : > { %p271_p3 = scmp.lt.s32.totalorder %s3503_s18, 3  ;;  %s3505_s21 = smov [#allocation7]  }
   0xb   : > { %p3604_p5 = por %p4350_p1, %p155_p0  ;;  %s296_s22 = sshll.u32 %s3505_s21, 4  ;;  %s297_s22 = int_to_ptr.vmem [resolvable:$true] %s296_s22 }
   0xc   : > { %p3608_p6 = pnand %p2422_p2, %p271_p3  ;;  %s3506_s24 = smov [#allocation4]  }
   0xd   : > { %s4358_s19 = scalar_select %p3604_p5, 1, 0 }
   0xe   : > { %s4359_s20 = scalar_select %p3608_p6, 1, 0 }
   0xf   : > { %p3063_p7 = pneg %p3608_p6  ;;  %s283_s25 = sshll.u32 %s3506_s24, 4  ;;  %s3620_s25 = int_to_ptr.vmem [resolvable:$true] %s283_s25 }
  0x10   : > { %s4361_s1 = sld [smem:[#allocation21_spill]] }
  0x11   : > { %p3616_p8 = pnand %p3063_p7, %p4350_p1 }
  0x13   : > { %p3630_p10 = pneg %p3616_p8 }
  0x16   : > { %s3253_s28 = scalar_lea.hbm %s4361_s1, 1024 }
  0x17   : > { %p3254_p9 = scmp.ne.s32.totalorder %s4361_s1, %s3253_s28  ;;  %p3260_p13 = scmp.lt.u32.totalorder %s3253_s28, %s4361_s1 }
  0x19   : > { %p3256_p11 = pnand %p3630_p10, %p3254_p9 }
  0x1b   : > { %p3257_p12 = pneg %p3256_p11 }
  0x1d   : > { %p3262_p0 = pnand %p3260_p13, %p3257_p12 }
  0x1f   : > { %3265 = shalt.err (!%p3262_p0)
}
  0x20   : > { %s3266_s14 = scalar_lea.vmem %s297_s22, 1024  ;;  %p3274_p4 = scmp.lt.s32.totalorder %s297_s22, %s297_s22 }
  0x21   : > { %p3267_p2 = scmp.ne.s32.totalorder %s297_s22, %s3266_s14  ;;  %p3275_p1 = scmp.lt.s32.totalorder %s3266_s14, %s3266_s14 }
  0x23   : > { %p3269_p3 = pnand %p3267_p2, %p3630_p10  ;;  %p3276_p5 = por %p3275_p1, %p3274_p4 }
  0x25   : > { %p3270_p7 = pneg %p3269_p3 }
  0x27   : > { %p3277_p6 = pnand %p3276_p5, %p3270_p7 }
  0x29   : > { %3280 = shalt.err (!%p3277_p6)
}
  0x2a   : > { %s4353_s15 = smov 64   ;;  %s4355_s21 = smov 4  }
  0x2b   : > { %3069 = dma.hbm_to_vmem [thread:$0]  (!%p3616_p8), %s4361_s1, 1024, %s297_s22, [#allocation8], %s4353_s15, %s4353_s15, %s4355_s21  }
  0x2c   : > { %s3281_s29 = scalar_lea.hbm %s4339_s0, 2048 }
  0x2d   : > { %p3282_p1 = scmp.ne.s32.totalorder %s4339_s0, %s3281_s29  ;;  %p3288_p6 = scmp.lt.u32.totalorder %s3281_s29, %s4339_s0 }
  0x2f   : > { %p3284_p4 = pnand %p3282_p1, %p3630_p10 }
  0x31   : > { %p3285_p5 = pneg %p3284_p4 }
  0x33   : > { %p3290_p9 = pnand %p3288_p6, %p3285_p5 }
  0x35   : > { %3293 = shalt.err (!%p3290_p9)
}
  0x36   : > { %s3294_s22 = scalar_lea.vmem %s3620_s25, 2048  ;;  %p3302_p0 = scmp.lt.s32.totalorder %s3620_s25, %s3620_s25 }
  0x37   : > { %p3295_p11 = scmp.ne.s32.totalorder %s3620_s25, %s3294_s22  ;;  %p3303_p2 = scmp.lt.s32.totalorder %s3294_s22, %s3294_s22 }
  0x39   : > { %p3297_p12 = pnand %p3295_p11, %p3630_p10  ;;  %p3304_p3 = por %p3303_p2, %p3302_p0 }
  0x3b   : > { %p3298_p13 = pneg %p3297_p12 }
  0x3d   : > { %p3305_p7 = pnand %p3304_p3, %p3298_p13 }
  0x3f   : > { %3308 = shalt.err (!%p3305_p7)
}
  0x40   : > { %s3509_s24 = smov 128   ;;  %s3510_s26 = smov 8  }
  0x41   : > { %3066 = dma.hbm_to_vmem [thread:$0]  (!%p3616_p8), %s4339_s0, 2048, %s3620_s25, [#allocation5], %s3509_s24, %s3509_s24, %s3510_s26  }
  0x42   : > { %s3511_s29 = smov [#allocation9]   ;;  %s3512_s12 = smov [#allocation10]  }
  0x43   : > { %s309_s30 = sshll.u32 %s3511_s29, 4  ;;  %s322_s13 = sshll.u32 %s3512_s12, 4  ;;  %s310_s30 = int_to_ptr.vmem [resolvable:$true] %s309_s30  ;;  %s3672_s13 = int_to_ptr.vmem [resolvable:$true] %s322_s13 }
  0x44   : > { %s3309_s15 = scalar_lea.hbm %s4341_s2, 1024 }
  0x45   : > { %p3310_p1 = scmp.ne.s32.totalorder %s4341_s2, %s3309_s15  ;;  %p3316_p6 = scmp.lt.u32.totalorder %s3309_s15, %s4341_s2 }
  0x47   : > { %p3312_p4 = pnand %p3310_p1, %p3630_p10 }
  0x49   : > { %p3313_p5 = pneg %p3312_p4 }
  0x4b   : > { %p3318_p9 = pnand %p3316_p6, %p3313_p5 }
  0x4d   : > { %3321 = shalt.err (!%p3318_p9)
}
  0x4e   : > { %s3322_s24 = scalar_lea.vmem %s310_s30, 1024  ;;  %p3330_p0 = scmp.lt.s32.totalorder %s310_s30, %s310_s30 }
  0x4f   : > { %p3323_p11 = scmp.ne.s32.totalorder %s310_s30, %s3322_s24  ;;  %p3331_p2 = scmp.lt.s32.totalorder %s3322_s24, %s3322_s24 }
  0x51   : > { %p3325_p12 = pnand %p3323_p11, %p3630_p10  ;;  %p3332_p3 = por %p3331_p2, %p3330_p0 }
  0x53   : > { %p3326_p13 = pneg %p3325_p12 }
  0x55   : > { %p3333_p7 = pnand %p3332_p3, %p3326_p13 }
  0x57   : > { %3336 = shalt.err (!%p3333_p7)
}
  0x58   : > { %s4363_s1 = smov 4   ;;  %s4364_s21 = smov 64  }
  0x59   : > { %3072 = dma.hbm_to_vmem [thread:$0]  (!%p3616_p8), %s4341_s2, 1024, %s310_s30, [#allocation8], %s4364_s21, %s4364_s21, %s4363_s1  }
  0x5a   : > { %s3337_s12 = scalar_lea.hbm %s4342_s3, 1024 }
  0x5b   : > { %p3338_p1 = scmp.ne.s32.totalorder %s4342_s3, %s3337_s12  ;;  %p3344_p6 = scmp.lt.u32.totalorder %s3337_s12, %s4342_s3 }
  0x5d   : > { %p3340_p4 = pnand %p3338_p1, %p3630_p10 }
  0x5f   : > { %p3341_p5 = pneg %p3340_p4 }
  0x61   : > { %p3346_p9 = pnand %p3344_p6, %p3341_p5 }
  0x63   : > { %3349 = shalt.err (!%p3346_p9)
}
  0x64   : > { %s3350_s30 = scalar_lea.vmem %s3672_s13, 1024  ;;  %p3358_p0 = scmp.lt.s32.totalorder %s3672_s13, %s3672_s13 }
  0x65   : > { %p3351_p11 = scmp.ne.s32.totalorder %s3672_s13, %s3350_s30  ;;  %p3359_p2 = scmp.lt.s32.totalorder %s3350_s30, %s3350_s30 }
  0x67   : > { %p3353_p12 = pnand %p3351_p11, %p3630_p10  ;;  %p3360_p3 = por %p3359_p2, %p3358_p0 }
  0x69   : > { %p3354_p13 = pneg %p3353_p12 }
  0x6b   : > { %p3361_p7 = pnand %p3360_p3, %p3354_p13 }
  0x6d   : > { %3364 = shalt.err (!%p3361_p7)
}
  0x6e   : > { %3075 = dma.hbm_to_vmem [thread:$0]  (!%p3616_p8), %s4342_s3, 1024, %s3672_s13, [#allocation11], %s4364_s21, %s4364_s21, %s4363_s1  }
  0x6f   : > { %s3513_s15 = smov [#allocation13]   ;;  %s3722_s29 = sadd.s32 1, %s3503_s18  }
  0x70   : > { %s335_s28 = sshll.u32 %s3513_s15, 4  ;;  %s3365_s22 = scalar_lea.hbm %s4345_s6, 1024  ;;  %s336_s28 = int_to_ptr.vmem [resolvable:$true] %s335_s28 }
  0x71   : > { %p3366_p1 = scmp.ne.s32.totalorder %s4345_s6, %s3365_s22  ;;  %p3372_p6 = scmp.lt.u32.totalorder %s3365_s22, %s4345_s6 }
  0x73   : > { %p3368_p4 = pnand %p3366_p1, %p3630_p10 }
  0x75   : > { %p3369_p5 = pneg %p3368_p4 }
  0x77   : > { %p3374_p9 = pnand %p3372_p6, %p3369_p5 }
  0x79   : > { %3377 = shalt.err (!%p3374_p9)
}
  0x7a   : > { %s3378_s13 = scalar_lea.vmem %s336_s28, 1024  ;;  %p3386_p0 = scmp.lt.s32.totalorder %s336_s28, %s336_s28 }
  0x7b   : > { %p3379_p11 = scmp.ne.s32.totalorder %s336_s28, %s3378_s13  ;;  %p3387_p2 = scmp.lt.s32.totalorder %s3378_s13, %s3378_s13 }
  0x7d   : > { %p3381_p12 = pnand %p3379_p11, %p3630_p10  ;;  %p3388_p3 = por %p3387_p2, %p3386_p0 }
  0x7f   : > { %p3382_p13 = pneg %p3381_p12 }
  0x81   : > { %p3389_p7 = pnand %p3388_p3, %p3382_p13 }
  0x83   : > { %3392 = shalt.err (!%p3389_p7)
}
  0x84   : > { %3078 = dma.hbm_to_vmem [thread:$0]  (!%p3616_p8), %s4345_s6, 1024, %s336_s28, [#allocation8], %s4364_s21, %s4364_s21, %s4363_s1  }
  0x85   : > { %s139_s11 = ssub.s32 %s3503_s18, %s3722_s29  ;;  %s142_s23 = sadd.s32 1, %s3499_s17 }
  0x86   : > { %p140_p10 = scmp.eq.s32.totalorder %s139_s11, 0  ;;  %p149_p1 = scmp.ne.s32.totalorder %s3499_s17, %s3495_s16 }
  0x87   : > { %p150_p4 = scmp.eq.s32.totalorder %s3503_s18, 0  ;;  %p3088_p5 = scmp.lt.s32.totalorder %s3503_s18, 2 }
  0x88   : > { %s3753_s12 = scalar_select %p140_p10, %s3499_s17, %s142_s23  }
  0x89   : > { %p151_p6 = por %p150_p4, %p149_p1  ;;  %s365_s14 = sand.u32 1, %s3503_s18  }
  0x8a   : > { %s367_s22 = sand.u32 1, %s3499_s17   ;;  %s2543_s25 = sshll.u32 %s3503_s18, 12 }
  0x8b   : > { %s2429_s27 = sshll.u32 %s367_s22, 8  ;;  %s3761_s13 = scalar_lea.hbm %s4344_s5, %s2543_s25 }
  0x8c   : > { %s369_s28 = scalar_lea.vmem [#allocation12], %s2429_s27  ;;  %p3763_p8 = pnand %p3088_p5, %p151_p6 }
  0x8d   : > { %s376_s26 = sshll.u32 %s369_s28, 4  ;;  %s3769_s18 = scalar_lea.sflag [#allocation5], %s365_s14  ;;  %s3767_s26 = int_to_ptr.vmem [resolvable:$true] %s376_s26 }
  0x8e   : > { %s3393_s11 = scalar_lea.hbm %s3761_s13, 4096  ;;  %p3395_p11 = pneg %p3763_p8 }
  0x8f   : > { %p3394_p9 = scmp.ne.s32.totalorder %s3761_s13, %s3393_s11  ;;  %s3398_s27 = scalar_lea.hbm %s4344_s5, 8192 }
  0x90   : > { %p3399_p0 = scmp.lt.u32.totalorder %s3761_s13, %s4344_s5  ;;  %p3400_p2 = scmp.lt.u32.totalorder %s3398_s27, %s3393_s11 }
  0x91   : > { %p3396_p12 = pnand %p3395_p11, %p3394_p9  ;;  %p3402_p7 = scmp.lt.u32.totalorder %s3393_s11, %s3761_s13 }
  0x92   : > { %p3401_p3 = por %p3400_p2, %p3399_p0 }
  0x93   : > { %p3397_p13 = pneg %p3396_p12 }
  0x94   : > { %p3403_p10 = por %p3402_p7, %p3401_p3 }
  0x96   : > { %p3404_p1 = pnand %p3403_p10, %p3397_p13 }
  0x98   : > { %3407 = shalt.err (!%p3404_p1)
}
  0x99   : > { %s3408_s14 = scalar_lea.vmem %s3767_s26, 4096  ;;  %s3514_s24 = smov [#allocation12]  }
  0x9a   : > { %p3409_p4 = scmp.ne.s32.totalorder %s3767_s26, %s3408_s14  ;;  %s3413_s28 = sshll.u32 %s3514_s24, 4  ;;  %s3414_s28 = int_to_ptr.vmem [resolvable:$false] %s3413_s28 }
  0x9b   : > { %s3415_s23 = scalar_lea.vmem %s3414_s28, 8192  ;;  %p3416_p9 = scmp.lt.s32.totalorder %s3767_s26, %s3414_s28 }
  0x9c   : > { %p3411_p5 = pnand %p3409_p4, %p3395_p11  ;;  %p3417_p12 = scmp.lt.s32.totalorder %s3415_s23, %s3408_s14 }
  0x9e   : > { %p3412_p6 = pneg %p3411_p5  ;;  %p3418_p0 = por %p3417_p12, %p3416_p9 }
  0xa0   : > { %p3419_p2 = pnand %p3418_p0, %p3412_p6 }
  0xa2   : > { %3422 = shalt.err (!%p3419_p2)
}
  0xa3   : > { %3082 = dma.hbm_to_vmem [thread:$0]  (!%p3763_p8), %s3761_s13, 4096, %s3767_s26, %s3769_s18, %s4364_s21, %s4364_s21, %s4363_s1  }
  0xa4   : > { %p4366_p11 = scmp.ne.s32.totalorder %s4359_s20, 0 }
  0xa5   : > { %p4367_p13 = scmp.eq.s32.totalorder (!%p4366_p11), %s3595_s9, 0 }
  0xa6   : > { %388 = sbr.rel (%p4366_p11) target bundleno = 2787 (0xae3), region = 60 }
  0xad   : > { %3466 = dma.done.wait (%p4367_p13), [#allocation5], 2048   ;;  %p4368_p3 = pmov %p4367_p13 }
  0xaf   : > { %3468 = vsyncadd (%p4368_p3), [#allocation5], 4294965248  ;;  %p4369_p7 = pmov %p4368_p3 }
  0xb0   : > { %p4370_p10 = pmov %p4368_p3 }
  0xb1   : > { %3470 = dma.done.wait (%p4369_p7), [#allocation8], 2048  }
  0xb2   : > { %3472 = vsyncadd (%p4370_p10), [#allocation8], 4294965248  ;;  %p4371_p1 = pmov %p4368_p3 }
  0xb4   : > { %3474 = dma.done.wait (%p4371_p1), [#allocation11], 1024   ;;  %p4372_p8 = pmov %p4371_p1 }
  0xb5   : > { %s406_s20 = sand.u32 1, %s3595_s9   ;;  %s408_s1 = sand.u32 1, %s3495_s16  }
  0xb6   : > { %3476 = vsyncadd (%p4372_p8), [#allocation11], 4294966272  ;;  %s2437_s21 = sshll.u32 %s408_s1, 8  ;;  %s407_s13 = scalar_lea.sflag [#allocation5], %s406_s20 }
  0xb7   : > { %s3816_s26 = scalar_lea.vmem [#allocation12], %s2437_s21  ;;  %p4373_p4 = scmp.ne.s32.totalorder %s4358_s19, 0 }
  0xb9   : > { %3478 = dma.done.wait (%p4373_p4), %s407_s13, 4096  }
  0xba   : > { %3480 = vsyncadd (%p4373_p4), %s407_s13, 4294963200  ;;  %p4374_p5 = pmov %p4371_p1 }
  0xbb   : > { %p4375_p6 = pmov %p4371_p1 }
  0xbc   : > { %3482 = dma.done.wait (%p4374_p5), [#allocation8], 1024  }
  0xbd   : > { %3484 = vsyncadd (%p4375_p6), [#allocation8], 4294966272  ;;  %p450_p9 = scmp.lt.s32.totalorder %s3595_s9, 1  ;;  %p4376_p12 = scmp.ne.s32.totalorder %s3595_s9, 0 }
  0xbe   : > { %v459_v0 = vld [vmem:[#allocation4] sm:$0xff] (!%p4376_p12)  ;;  %v460_v1 = vld [vmem:[#allocation4 + $0x8] sm:$0xff] (!%p4376_p12)  ;;  %v461_v2 = vld [vmem:[#allocation4 + $0x10] sm:$0xff] (!%p4376_p12) }
  0xbf   : > { %s451_s15 = scalar_select %p450_p9, %s3595_s9, 1 }
  0xc0   : > { %458 = sbr.rel (%p4376_p12) target bundleno = 200 (0xc8), region = 88  ;;  %475 = vst [vmem:[#allocation2] sm:$0xff] (!%p4376_p12), %v459_v0  ;;  %476 = vst [vmem:[#allocation2 + $0x8] sm:$0xff] (!%p4376_p12), %v460_v1  ;;  %v462_v3 = vld [vmem:[#allocation4 + $0x18] sm:$0xff] (!%p4376_p12)  ;;  %v463_v4 = vld [vmem:[#allocation4 + $0x20] sm:$0xff] (!%p4376_p12) }
  0xc1   : > { %s2439_s18 = sshll.u32 %s451_s15, 3  ;;  %477 = vst [vmem:[#allocation2 + $0x10] sm:$0xff] (!%p4376_p12), %v461_v2  ;;  %v464_v5 = vld [vmem:[#allocation4 + $0x28] sm:$0xff] (!%p4376_p12)  ;;  %478 = vst [vmem:[#allocation2 + $0x18] sm:$0xff] (!%p4376_p12), %v462_v3  ;;  %v465_v6 = vld [vmem:[#allocation4 + $0x30] sm:$0xff] (!%p4376_p12) }
  0xc2   : > { %s3831_s27 = scalar_lea.vmem %s4343_s4, %s2439_s18  ;;  %479 = vst [vmem:[#allocation2 + $0x20] sm:$0xff] (!%p4376_p12), %v463_v4  ;;  %480 = vst [vmem:[#allocation2 + $0x28] sm:$0xff] (!%p4376_p12), %v464_v5  ;;  %v466_v7 = vld [vmem:[#allocation4 + $0x38] sm:$0xff] (!%p4376_p12)  ;;  %v467_v8 = vld [vmem:[#allocation4 + $0x40] sm:$0xff] (!%p4376_p12) }
  0xc3   : > { %481 = vst [vmem:[#allocation2 + $0x30] sm:$0xff] (!%p4376_p12), %v465_v6  ;;  %482 = vst [vmem:[#allocation2 + $0x38] sm:$0xff] (!%p4376_p12), %v466_v7  ;;  %v468_v9 = vld [vmem:[#allocation4 + $0x48] sm:$0xff] (!%p4376_p12)  ;;  %v469_v10 = vld [vmem:[#allocation4 + $0x50] sm:$0xff] (!%p4376_p12) }
  0xc4   : > { %483 = vst [vmem:[#allocation2 + $0x40] sm:$0xff] (!%p4376_p12), %v467_v8  ;;  %v470_v11 = vld [vmem:[#allocation4 + $0x58] sm:$0xff] (!%p4376_p12)  ;;  %484 = vst [vmem:[#allocation2 + $0x48] sm:$0xff] (!%p4376_p12), %v468_v9  ;;  %v471_v12 = vld [vmem:[#allocation4 + $0x60] sm:$0xff] (!%p4376_p12) }
  0xc5   : > { %485 = vst [vmem:[#allocation2 + $0x50] sm:$0xff] (!%p4376_p12), %v469_v10  ;;  %486 = vst [vmem:[#allocation2 + $0x58] sm:$0xff] (!%p4376_p12), %v470_v11  ;;  %v472_v13 = vld [vmem:[#allocation4 + $0x68] sm:$0xff] (!%p4376_p12)  ;;  %v473_v14 = vld [vmem:[#allocation4 + $0x70] sm:$0xff] (!%p4376_p12) }
  0xc6   : > { %487 = vst [vmem:[#allocation2 + $0x60] sm:$0xff] (!%p4376_p12), %v471_v12  ;;  %488 = vst [vmem:[#allocation2 + $0x68] sm:$0xff] (!%p4376_p12), %v472_v13  ;;  %v474_v15 = vld [vmem:[#allocation4 + $0x78] sm:$0xff] (!%p4376_p12) }
  0xc7   : > { %489 = vst [vmem:[#allocation2 + $0x70] sm:$0xff] %v473_v14  ;;  %490 = vst [vmem:[#allocation2 + $0x78] sm:$0xff] %v474_v15 }
  0xc8 PF: > { %v3835_v16 = vld [vmem:[#allocation2] sm:$0xff]  ;;  %v3837_v17 = vld [vmem:[#allocation2 + $0x8] sm:$0xff]  ;;  %v3885_v42 = vld [vmem:[#allocation10 + $0x10] sm:$0xff]   ;;  %p2529_p0 = scmp.ne.s32.totalorder %s3595_s9, 1 }
  0xc9   : > { %v3839_v18 = vld [vmem:[#allocation2 + $0x10] sm:$0xff]  ;;  %v556_v19 = vpack.c.bf16 %v3837_v17, %v3835_v16  ;;  %v3843_v20 = vld [vmem:[#allocation2 + $0x18] sm:$0xff]  ;;  %v3140_v27 = vld [vmem:[#allocation10] sm:$0xff]   ;;  %s2262_s24 = sld [smem:[#allocation3]] (!%p2529_p0) }
  0xca   : > { %v557_v21 = vpack.c.bf16 %v3843_v20, %v3839_v18  ;;  %v3847_v22 = vld [vmem:[#allocation2 + $0x20] sm:$0xff]  ;;  %v3849_v23 = vld [vmem:[#allocation2 + $0x28] sm:$0xff]  ;;  %2809 = vmatprep.mubr.bf16.mxu1 %v3140_v27  ;;  %2873 = vmatprep.mubr.bf16.mxu0 %v3140_v27  ;;  %v3889_v43 = vld [vmem:[#allocation10 + $0x18] sm:$0xff]  }
  0xcb   : > { %2793 = vmatprep.subr.bf16.mxu1 %v556_v19  ;;  %v3851_v24 = vld [vmem:[#allocation2 + $0x30] sm:$0xff]  ;;  %v558_v25 = vpack.c.bf16 %v3849_v23, %v3847_v22  ;;  %v3855_v26 = vld [vmem:[#allocation2 + $0x38] sm:$0xff]  ;;  %v3883_v41 = vld [vmem:[#allocation10 + $0x8] sm:$0xff]  }
  0xcc   : > { %2794 = vmatpush3.bf16.msra.mxu1 %v556_v19  ;;  %v559_v28 = vpack.c.bf16 %v3855_v26, %v3851_v24  ;;  %v3859_v29 = vld [vmem:[#allocation2 + $0x40] sm:$0xff]  ;;  %v3861_v30 = vld [vmem:[#allocation2 + $0x48] sm:$0xff]  ;;  %v3897_v46 = vld [vmem:[#allocation10 + $0x30] sm:$0xff]   ;;  %v862_v19 = vlaneseq }
  0xcd   : > { %2795 = vmatprep.subr.bf16.mxu1 %v557_v21  ;;  %v3863_v31 = vld [vmem:[#allocation2 + $0x50] sm:$0xff]  ;;  %v560_v32 = vpack.c.bf16 %v3861_v30, %v3859_v29  ;;  %v3867_v33 = vld [vmem:[#allocation2 + $0x58] sm:$0xff]  ;;  %v3891_v44 = vld [vmem:[#allocation10 + $0x20] sm:$0xff]  }
  0xce   : > { %v3869_v34 = vld [vmem:[#allocation2 + $0x60] sm:$0xff]  ;;  %v3871_v35 = vld [vmem:[#allocation2 + $0x68] sm:$0xff]  ;;  %v561_v36 = vpack.c.bf16 %v3867_v33, %v3863_v31  ;;  %v3875_v37 = vld [vmem:[#allocation2 + $0x70] sm:$0xff] }
  0xcf   : > { %v3877_v38 = vld [vmem:[#allocation2 + $0x78] sm:$0xff]  ;;  %v562_v39 = vpack.c.bf16 %v3871_v35, %v3869_v34  ;;  %v3895_v45 = vld [vmem:[#allocation10 + $0x28] sm:$0xff]   ;;  %v3148_v48 = vld [vmem:[#allocation9] sm:$0xff]  }
  0xd0   : > { %2796 = vmatpush3.bf16.msra.mxu1 %v557_v21  ;;  %v563_v40 = vpack.c.bf16 %v3877_v38, %v3875_v37  ;;  %v3901_v47 = vld [vmem:[#allocation10 + $0x38] sm:$0xff]   ;;  %v3904_v9 = vld [vmem:[#allocation9 + $0x8] sm:$0xff]   ;;  %v3906_v10 = vld [vmem:[#allocation9 + $0x10] sm:$0xff]   ;;  %v3925_v21 = vshrl.u32 %v862_v19, 7 }
  0xd1   : > { %2797 = vmatprep.subr.bf16.mxu1 %v558_v25  ;;  %v3910_v11 = vld [vmem:[#allocation9 + $0x18] sm:$0xff]   ;;  %v3912_v12 = vld [vmem:[#allocation9 + $0x20] sm:$0xff]   ;;  %v3916_v13 = vld [vmem:[#allocation9 + $0x28] sm:$0xff]  }
  0xd2   : > { %v3918_v14 = vld [vmem:[#allocation9 + $0x30] sm:$0xff]   ;;  %v3922_v15 = vld [vmem:[#allocation9 + $0x38] sm:$0xff]   ;;  %v3929_v27 = vld [vmem:[%s3831_s27] sm:$0xff] }
  0xd4   : > { %2798 = vmatpush3.bf16.msra.mxu1 %v558_v25  ;;  %v864_v25 = vsub.s32 2, %v3925_v21 }
  0xd5   : > { %2799 = vmatprep.subr.bf16.mxu1 %v559_v28 }
  0xd8   : > { %2800 = vmatpush3.bf16.msra.mxu1 %v559_v28  ;;  %v3932_v28 = vrot.slane %v3929_v27, %v864_v25 }
  0xd9   : > { %2801 = vmatprep.subr.bf16.mxu1 %v560_v32 }
  0xdc   : > { %2802 = vmatpush3.bf16.msra.mxu1 %v560_v32 }
  0xdd   : > { %2803 = vmatprep.subr.bf16.mxu1 %v561_v36 }
  0xe0   : > { %2804 = vmatpush3.bf16.msra.mxu1 %v561_v36 }
  0xe1   : > { %2805 = vmatprep.subr.bf16.mxu1 %v562_v39 }
  0xe4   : > { %2806 = vmatpush3.bf16.msra.mxu1 %v562_v39 }
  0xe5   : > { %2807 = vmatprep.subr.bf16.mxu1 %v563_v40 }
  0xe8   : > { %2808 = vmatpush3.bf16.msra.mxu1 %v563_v40 }
  0xeb   : > { %2810 = vmatmul.mubr.bf16.vlgmr.msra.gmra.mrb[0].mxu1 %v3883_v41 }
  0xec   : > { %2813 = vmatprep.mubr.bf16.mxu1 %v3885_v42 }
  0xf3   : > { %2814 = vmatmul.mubr.bf16.gmra.mrb[4].mxu1 %v3889_v43 }
  0xf4   : > { %2817 = vmatprep.mubr.bf16.mxu1 %v3891_v44 }
  0xfb   : > { %2818 = vmatmul.mubr.bf16.gmra.mrb[8].mxu1 %v3895_v45 }
  0xfc   : > { %2821 = vmatprep.mubr.bf16.mxu1 %v3897_v46 }
 0x103   : > { %2822 = vmatmul.mubr.bf16.gmra.mrb[12].mxu1 %v3901_v47 }
 0x104   : > { %2841 = vmatprep.mubr.bf16.mxu1 %v3148_v48 }
 0x1be   : > { %v2811_v49 = vpop.f32.mrb[0].mxu1 }
 0x1bf   : > { %v646_v50 = vpop.f32.mrb[1].mxu1 }
 0x1c0   : > { %v2812_v51 = vpop.f32.mrb[2].mxu1 }
 0x1c1   : > { %v710_v52 = vpack.c.bf16 %v2812_v51, %v2811_v49  ;;  %v649_v53 = vpop.f32.mrb[3].mxu1 }
 0x1c2   : > { %v709_v54 = vpack.c.bf16 %v649_v53, %v646_v50 }
 0x1c4   : > { %2825 = vmatprep.subr.bf16.mxu1 %v709_v54 }
 0x1c5   : > { %2826 = vmatpush3.bf16.msra.mxu1 %v709_v54 }
 0x1c6   : > { %v2815_v55 = vpop.f32.mrb[4].mxu1  ;;  %2827 = vmatprep.subr.bf16.mxu1 %v710_v52 }
 0x1c7   : > { %v662_v56 = vpop.f32.mrb[5].mxu1 }
 0x1c8   : > { %v2816_v57 = vpop.f32.mrb[6].mxu1 }
 0x1c9   : > { %v712_v58 = vpack.c.bf16 %v2816_v57, %v2815_v55  ;;  %v665_v59 = vpop.f32.mrb[7].mxu1  ;;  %2828 = vmatpush3.bf16.msra.mxu1 %v710_v52 }
 0x1ca   : > { %v711_v60 = vpack.c.bf16 %v665_v59, %v662_v56 }
 0x1cc   : > { %2829 = vmatprep.subr.bf16.mxu1 %v711_v60 }
 0x1cd   : > { %2830 = vmatpush3.bf16.msra.mxu1 %v711_v60 }
 0x1ce   : > { %v2819_v61 = vpop.f32.mrb[8].mxu1  ;;  %2831 = vmatprep.subr.bf16.mxu1 %v712_v58 }
 0x1cf   : > { %v678_v62 = vpop.f32.mrb[9].mxu1 }
 0x1d0   : > { %v2820_v63 = vpop.f32.mrb[10].mxu1 }
 0x1d1   : > { %v714_v0 = vpack.c.bf16 %v2820_v63, %v2819_v61  ;;  %v681_v1 = vpop.f32.mrb[11].mxu1  ;;  %2832 = vmatpush3.bf16.msra.mxu1 %v712_v58 }
 0x1d2   : > { %v713_v2 = vpack.c.bf16 %v681_v1, %v678_v62 }
 0x1d4   : > { %2833 = vmatprep.subr.bf16.mxu1 %v713_v2 }
 0x1d5   : > { %2834 = vmatpush3.bf16.msra.mxu1 %v713_v2 }
 0x1d6   : > { %v2823_v3 = vpop.f32.mrb[12].mxu1  ;;  %2835 = vmatprep.subr.bf16.mxu1 %v714_v0 }
 0x1d7   : > { %v694_v4 = vpop.f32.mrb[13].mxu1 }
 0x1d8   : > { %v2824_v5 = vpop.f32.mrb[14].mxu1 }
 0x1d9   : > { %v716_v6 = vpack.c.bf16 %v2824_v5, %v2823_v3  ;;  %v697_v7 = vpop.f32.mrb[15].mxu1  ;;  %2836 = vmatpush3.bf16.msra.mxu1 %v714_v0 }
 0x1da   : > { %v715_v8 = vpack.c.bf16 %v697_v7, %v694_v4 }
 0x1dc   : > { %2837 = vmatprep.subr.bf16.mxu1 %v715_v8 }
 0x1dd   : > { %2838 = vmatpush3.bf16.msra.mxu1 %v715_v8 }
 0x1de   : > { %2839 = vmatprep.subr.bf16.mxu1 %v716_v6 }
 0x1e1   : > { %2840 = vmatpush3.bf16.msra.mxu1 %v716_v6 }
 0x1e4   : > { %2842 = vmatmul.mubr.bf16.vlgmr.msra.gmra.mrb[16].mxu1 %v3904_v9 }
 0x1e5   : > { %2845 = vmatprep.mubr.bf16.mxu1 %v3906_v10 }
 0x1ec   : > { %2846 = vmatmul.mubr.bf16.gmra.mrb[20].mxu1 %v3910_v11 }
 0x1ed   : > { %2849 = vmatprep.mubr.bf16.mxu1 %v3912_v12 }
 0x1f4   : > { %2850 = vmatmul.mubr.bf16.gmra.mrb[24].mxu1 %v3916_v13 }
 0x1f5   : > { %2853 = vmatprep.mubr.bf16.mxu1 %v3918_v14 }
 0x1fc   : > { %2854 = vmatmul.mubr.bf16.gmra.mrb[28].mxu1 %v3922_v15 }
 0x1fd   : > { %2905 = vmatprep.mubr.bf16.mxu1 %v3148_v48 }
 0x2b7   : > { %v2843_v32 = vpop.f32.mrb[16].mxu1 }
 0x2b8   : > { %v868_v36 = vmul.f32 %v2843_v32, %v3932_v28  ;;  %v799_v39 = vpop.f32.mrb[17].mxu1 }
 0x2b9   : > { %v866_v40 = vmul.f32 %v3932_v28, %v799_v39  ;;  %v2844_v49 = vpop.f32.mrb[18].mxu1 }
 0x2ba   : > { %v3937_v50 = vsub.f32 %v3839_v18, %v868_v36  ;;  %v869_v48 = vmul.f32 %v2844_v49, %v3932_v28  ;;  %v802_v51 = vpop.f32.mrb[19].mxu1 }
 0x2bb   : > { %v3941_v52 = vsub.f32 %v3835_v16, %v866_v40  ;;  %v867_v53 = vmul.f32 %v3932_v28, %v802_v51 }
 0x2bc   : > { %v3945_v54 = vsub.f32 %v3843_v20, %v869_v48  ;;  %v900_v56 = vmul.f32 %v3937_v50, %v3937_v50 }
 0x2bd   : > { %v3948_v55 = vsub.f32 %v3837_v17, %v867_v53  ;;  %v898_v58 = vmul.f32 %v3941_v52, %v3941_v52 }
 0x2be   : > { %v901_v18 = vmul.f32 %v3945_v54, %v3945_v54 }
 0x2bf   : > { %v2847_v57 = vpop.f32.mrb[20].mxu1  ;;  %v899_v16 = vmul.f32 %v3948_v55, %v3948_v55 }
 0x2c0   : > { %v872_v59 = vmul.f32 %v2847_v57, %v3932_v28  ;;  %v815_v20 = vpop.f32.mrb[21].mxu1  ;;  %v915_v60 = vpack.c.bf16 %v901_v18, %v900_v56 }
 0x2c1   : > { %v870_v17 = vmul.f32 %v3932_v28, %v815_v20  ;;  %v2848_v61 = vpop.f32.mrb[22].mxu1  ;;  %v914_v62 = vpack.c.bf16 %v899_v16, %v898_v58 }
 0x2c2   : > { %v3961_v63 = vsub.f32 %v3851_v24, %v872_v59  ;;  %v873_v0 = vmul.f32 %v2848_v61, %v3932_v28  ;;  %v818_v1 = vpop.f32.mrb[23].mxu1 }
 0x2c3   : > { %v3965_v2 = vsub.f32 %v3847_v22, %v870_v17  ;;  %v871_v3 = vmul.f32 %v3932_v28, %v818_v1  ;;  %2857 = vmatprep.subr.bf16.mxu0 %v914_v62 }
 0x2c4   : > { %v3969_v4 = vsub.f32 %v3855_v26, %v873_v0  ;;  %2858 = vmatpush3.bf16.msra.mxu0 %v914_v62  ;;  %v904_v24 = vmul.f32 %v3961_v63, %v3961_v63 }
 0x2c5   : > { %v3972_v5 = vsub.f32 %v3849_v23, %v871_v3  ;;  %2859 = vmatprep.subr.bf16.mxu0 %v915_v60  ;;  %v902_v22 = vmul.f32 %v3965_v2, %v3965_v2 }
 0x2c6   : > { %v905_v6 = vmul.f32 %v3969_v4, %v3969_v4 }
 0x2c7   : > { %v903_v7 = vmul.f32 %v3972_v5, %v3972_v5  ;;  %v2851_v8 = vpop.f32.mrb[24].mxu1 }
 0x2c8   : > { %v876_v26 = vmul.f32 %v2851_v8, %v3932_v28  ;;  %v831_v19 = vpop.f32.mrb[25].mxu1  ;;  %2860 = vmatpush3.bf16.msra.mxu0 %v915_v60  ;;  %v917_v23 = vpack.c.bf16 %v905_v6, %v904_v24 }
 0x2c9   : > { %v874_v25 = vmul.f32 %v3932_v28, %v831_v19  ;;  %v2852_v32 = vpop.f32.mrb[26].mxu1  ;;  %v916_v36 = vpack.c.bf16 %v903_v7, %v902_v22 }
 0x2ca   : > { %v3985_v39 = vsub.f32 %v3863_v31, %v876_v26  ;;  %v877_v40 = vmul.f32 %v2852_v32, %v3932_v28  ;;  %v834_v49 = vpop.f32.mrb[27].mxu1 }
 0x2cb   : > { %v3989_v48 = vsub.f32 %v3859_v29, %v874_v25  ;;  %v875_v51 = vmul.f32 %v3932_v28, %v834_v49  ;;  %2861 = vmatprep.subr.bf16.mxu0 %v916_v36 }
 0x2cc   : > { %v3993_v53 = vsub.f32 %v3867_v33, %v877_v40  ;;  %2862 = vmatpush3.bf16.msra.mxu0 %v916_v36  ;;  %v908_v31 = vmul.f32 %v3985_v39, %v3985_v39 }
 0x2cd   : > { %v3996_v56 = vsub.f32 %v3861_v30, %v875_v51  ;;  %2863 = vmatprep.subr.bf16.mxu0 %v917_v23  ;;  %v906_v29 = vmul.f32 %v3989_v48, %v3989_v48 }
 0x2ce   : > { %v909_v18 = vmul.f32 %v3993_v53, %v3993_v53 }
 0x2cf   : > { %v907_v57 = vmul.f32 %v3996_v56, %v3996_v56  ;;  %v2855_v58 = vpop.f32.mrb[28].mxu1 }
 0x2d0   : > { %v880_v33 = vmul.f32 %v2855_v58, %v3932_v28  ;;  %v847_v16 = vpop.f32.mrb[29].mxu1  ;;  %2864 = vmatpush3.bf16.msra.mxu0 %v917_v23  ;;  %v919_v30 = vpack.c.bf16 %v909_v18, %v908_v31 }
 0x2d1   : > { %v878_v59 = vmul.f32 %v3932_v28, %v847_v16  ;;  %v2856_v20 = vpop.f32.mrb[30].mxu1  ;;  %v918_v60 = vpack.c.bf16 %v907_v57, %v906_v29  ;;  %v3171_v16 = vld [vmem:[%s3816_s26 + $0x18] sm:$0xff]  }
 0x2d2   : > { %v4009_v17 = vsub.f32 %v3875_v37, %v880_v33  ;;  %v881_v61 = vmul.f32 %v2856_v20, %v3932_v28  ;;  %v850_v62 = vpop.f32.mrb[31].mxu1  ;;  %v4044_v33 = vld [vmem:[#allocation7] sm:$0xff]   ;;  %v3174_v20 = vld [vmem:[%s3816_s26 + $0x68] sm:$0xff]  }
 0x2d3   : > { %v4013_v0 = vsub.f32 %v3869_v34, %v878_v59  ;;  %v879_v1 = vmul.f32 %v3932_v28, %v850_v62  ;;  %2865 = vmatprep.subr.bf16.mxu0 %v918_v60  ;;  %v3173_v59 = vld [vmem:[%s3816_s26 + $0x20] sm:$0xff]   ;;  %v3177_v62 = vld [vmem:[%s3816_s26 + $0x30] sm:$0xff]  }
 0x2d4   : > { %v4017_v3 = vsub.f32 %v3877_v38, %v881_v61  ;;  %2866 = vmatpush3.bf16.msra.mxu0 %v918_v60  ;;  %v912_v37 = vmul.f32 %v4009_v17, %v4009_v17  ;;  %v3175_v60 = vld [vmem:[%s3816_s26 + $0x28] sm:$0xff]   ;;  %v3176_v61 = vld [vmem:[%s3816_s26 + $0x70] sm:$0xff]  }
 0x2d5   : > { %v4020_v24 = vsub.f32 %v3871_v35, %v879_v1  ;;  %2867 = vmatprep.subr.bf16.mxu0 %v919_v30  ;;  %v910_v34 = vmul.f32 %v4013_v0, %v4013_v0 }
 0x2d6   : > { %v913_v6 = vmul.f32 %v4017_v3, %v4017_v3 }
 0x2d7   : > { %v911_v28 = vmul.f32 %v4020_v24, %v4020_v24 }
 0x2d8   : > { %2868 = vmatpush3.bf16.msra.mxu0 %v919_v30  ;;  %v921_v38 = vpack.c.bf16 %v913_v6, %v912_v37  ;;  %v3172_v30 = vld [vmem:[%s3816_s26 + $0x60] sm:$0xff]  }
 0x2d9   : > { %v920_v22 = vpack.c.bf16 %v911_v28, %v910_v34 }
 0x2db   : > { %2869 = vmatprep.subr.bf16.mxu0 %v920_v22 }
 0x2dc   : > { %2870 = vmatpush3.bf16.msra.mxu0 %v920_v22 }
 0x2dd   : > { %2871 = vmatprep.subr.bf16.mxu0 %v921_v38 }
 0x2e0   : > { %2872 = vmatpush3.bf16.msra.mxu0 %v921_v38 }
 0x2e3   : > { %2874 = vmatmul.mubr.bf16.vlgmr.msra.gmra.mrb[0].mxu0 %v3883_v41 }
 0x2e4   : > { %2877 = vmatprep.mubr.bf16.mxu0 %v3885_v42 }
 0x2eb   : > { %2878 = vmatmul.mubr.bf16.gmra.mrb[4].mxu0 %v3889_v43 }
 0x2ec   : > { %2881 = vmatprep.mubr.bf16.mxu0 %v3891_v44 }
 0x2f3   : > { %2882 = vmatmul.mubr.bf16.gmra.mrb[8].mxu0 %v3895_v45 }
 0x2f4   : > { %2885 = vmatprep.mubr.bf16.mxu0 %v3897_v46 }
 0x2fb   : > { %2886 = vmatmul.mubr.bf16.gmra.mrb[12].mxu0 %v3901_v47 }
 0x2fc   : > { %2937 = vmatprep.mubr.bf16.mxu0 %v4044_v33 }
 0x3b6   : > { %v2875_v35 = vpop.f32.mrb[0].mxu0 }
 0x3b7   : > { %v956_v7 = vpop.f32.mrb[1].mxu0 }
 0x3b8   : > { %v2876_v8 = vpop.f32.mrb[2].mxu0 }
 0x3b9   : > { %v1020_v26 = vpack.c.bf16 %v2876_v8, %v2875_v35  ;;  %v959_v19 = vpop.f32.mrb[3].mxu0  ;;  %v1029_v35 = vsub.s32 0, %v3925_v21 }
 0x3ba   : > { %v1019_v23 = vpack.c.bf16 %v959_v19, %v956_v7 }
 0x3bb   : > { %v4063_v8 = vrot.slane %v3929_v27, %v1029_v35 }
 0x3bc   : > { %2889 = vmatprep.subr.bf16.mxu1 %v1019_v23 }
 0x3bd   : > { %2890 = vmatpush3.bf16.msra.mxu1 %v1019_v23 }
 0x3be   : > { %v2879_v41 = vpop.f32.mrb[4].mxu0  ;;  %2891 = vmatprep.subr.bf16.mxu1 %v1020_v26 }
 0x3bf   : > { %v972_v42 = vpop.f32.mrb[5].mxu0 }
 0x3c0   : > { %v2880_v43 = vpop.f32.mrb[6].mxu0 }
 0x3c1   : > { %v1022_v25 = vpack.c.bf16 %v2880_v43, %v2879_v41  ;;  %v975_v44 = vpop.f32.mrb[7].mxu0  ;;  %2892 = vmatpush3.bf16.msra.mxu1 %v1020_v26  ;;  %v1178_v43 = vsub.s32 1, %v3925_v21 }
 0x3c2   : > { %v1021_v45 = vpack.c.bf16 %v975_v44, %v972_v42 }
 0x3c4   : > { %2893 = vmatprep.subr.bf16.mxu1 %v1021_v45 }
 0x3c5   : > { %2894 = vmatpush3.bf16.msra.mxu1 %v1021_v45  ;;  %v1033_v45 = vmul.f32 %v4063_v8, %v3937_v50  ;;  %v1032_v50 = vmul.f32 %v4063_v8, %v3948_v55 }
 0x3c6   : > { %v2883_v46 = vpop.f32.mrb[8].mxu0  ;;  %2895 = vmatprep.subr.bf16.mxu1 %v1022_v25 }
 0x3c7   : > { %v988_v47 = vpop.f32.mrb[9].mxu0 }
 0x3c8   : > { %v2884_v32 = vpop.f32.mrb[10].mxu0 }
 0x3c9   : > { %v1024_v36 = vpack.c.bf16 %v2884_v32, %v2883_v46  ;;  %v991_v40 = vpop.f32.mrb[11].mxu0  ;;  %2896 = vmatpush3.bf16.msra.mxu1 %v1022_v25  ;;  %v1031_v32 = vmul.f32 %v4063_v8, %v3941_v52 }
 0x3ca   : > { %v1023_v49 = vpack.c.bf16 %v991_v40, %v988_v47  ;;  %v1034_v40 = vmul.f32 %v4063_v8, %v3945_v54 }
 0x3cc   : > { %2897 = vmatprep.subr.bf16.mxu1 %v1023_v49 }
 0x3cd   : > { %2898 = vmatpush3.bf16.msra.mxu1 %v1023_v49  ;;  %v4073_v49 = vrot.slane %v3929_v27, %v1178_v43 }
 0x3ce   : > { %v2887_v51 = vpop.f32.mrb[12].mxu0  ;;  %2899 = vmatprep.subr.bf16.mxu1 %v1024_v36 }
 0x3cf   : > { %v1004_v31 = vpop.f32.mrb[13].mxu0 }
 0x3d0   : > { %v2888_v18 = vpop.f32.mrb[14].mxu0 }
 0x3d1   : > { %v1026_v29 = vpack.c.bf16 %v2888_v18, %v2887_v51  ;;  %v1007_v57 = vpop.f32.mrb[15].mxu0  ;;  %2900 = vmatpush3.bf16.msra.mxu1 %v1024_v36 }
 0x3d2   : > { %v1025_v58 = vpack.c.bf16 %v1007_v57, %v1004_v31 }
 0x3d4   : > { %2901 = vmatprep.subr.bf16.mxu1 %v1025_v58 }
 0x3d5   : > { %2902 = vmatpush3.bf16.msra.mxu1 %v1025_v58 }
 0x3d6   : > { %2903 = vmatprep.subr.bf16.mxu1 %v1026_v29 }
 0x3d9   : > { %2904 = vmatpush3.bf16.msra.mxu1 %v1026_v29 }
 0x3dc   : > { %2906 = vmatmul.mubr.bf16.vlgmr.msra.gmra.mrb[32].mxu1 %v3904_v9  ;;  %v3164_v9 = vld [vmem:[%s3816_s26 + $0x40] sm:$0xff]  }
 0x3dd   : > { %2909 = vmatprep.mubr.bf16.mxu1 %v3906_v10  ;;  %v3165_v10 = vld [vmem:[%s3816_s26] sm:$0xff]   ;;  %2624 = vmatprep.subr.bf16.mxu1 %v3164_v9 }
 0x3de   : > { %2625 = vmatpush3.bf16.msra.mxu1 %v3165_v10 }
 0x3e4   : > { %2910 = vmatmul.mubr.bf16.gmra.mrb[36].mxu1 %v3910_v11  ;;  %v3166_v11 = vld [vmem:[%s3816_s26 + $0x48] sm:$0xff]  }
 0x3e5   : > { %2913 = vmatprep.mubr.bf16.mxu1 %v3912_v12  ;;  %v3167_v12 = vld [vmem:[%s3816_s26 + $0x8] sm:$0xff]   ;;  %2626 = vmatprep.subr.bf16.mxu1 %v3166_v11 }
 0x3e6   : > { %2627 = vmatpush3.bf16.msra.mxu1 %v3167_v12 }
 0x3ec   : > { %2914 = vmatmul.mubr.bf16.gmra.mrb[40].mxu1 %v3916_v13  ;;  %v3168_v13 = vld [vmem:[%s3816_s26 + $0x50] sm:$0xff]  }
 0x3ed   : > { %2917 = vmatprep.mubr.bf16.mxu1 %v3918_v14  ;;  %v3169_v14 = vld [vmem:[%s3816_s26 + $0x10] sm:$0xff]   ;;  %2628 = vmatprep.subr.bf16.mxu1 %v3168_v13 }
 0x3ee   : > { %2629 = vmatpush3.bf16.msra.mxu1 %v3169_v14 }
 0x3f4   : > { %2918 = vmatmul.mubr.bf16.gmra.mrb[44].mxu1 %v3922_v15  ;;  %v3170_v15 = vld [vmem:[%s3816_s26 + $0x58] sm:$0xff]  }
 0x3f5   : > { %2630 = vmatprep.subr.bf16.mxu1 %v3170_v15 }
 0x3f6   : > { %2631 = vmatpush3.bf16.msra.mxu1 %v3171_v16 }
 0x3f7   : > { %2632 = vmatprep.subr.bf16.mxu1 %v3172_v30  ;;  %v1037_v30 = vmul.f32 %v4063_v8, %v3961_v63  ;;  %v1036_v63 = vmul.f32 %v4063_v8, %v3972_v5 }
 0x3fa   : > { %2633 = vmatpush3.bf16.msra.mxu1 %v3173_v59 }
 0x3fb   : > { %2634 = vmatprep.subr.bf16.mxu1 %v3174_v20 }
 0x3fe   : > { %2635 = vmatpush3.bf16.msra.mxu1 %v3175_v60 }
 0x3ff   : > { %2636 = vmatprep.subr.bf16.mxu1 %v3176_v61  ;;  %v1035_v61 = vmul.f32 %v4063_v8, %v3965_v2 }
 0x402   : > { %2637 = vmatpush3.bf16.msra.mxu1 %v3177_v62 }
 0x4af   : > { %v2907_v1 = vpop.f32.mrb[32].mxu1 }
 0x4b0   : > { %v1090_v37 = vadd.f32 1e-05, %v2907_v1  ;;  %v1081_v6 = vpop.f32.mrb[33].mxu1 }
 0x4b1   : > { %v1082_v34 = vadd.f32 1e-05, %v1081_v6  ;;  %v2908_v28 = vpop.f32.mrb[34].mxu1 }
 0x4b2   : > { %3196 = vrsqrt.f32 %v1090_v37  ;;  %v1093_v38 = vadd.f32 1e-05, %v2908_v28  ;;  %v1084_v22 = vpop.f32.mrb[35].mxu1  ;;  %v1038_v37 = vmul.f32 %v4063_v8, %v3969_v4 }
 0x4b3   : > { %3198 = vrsqrt.f32 %v1082_v34  ;;  %v1085_v7 = vadd.f32 1e-05, %v1084_v22 }
 0x4b4   : > { %3200 = vrsqrt.f32 %v1093_v38 }
 0x4b5   : > { %3202 = vrsqrt.f32 %v1085_v7 }
 0x4b7   : > { %v2911_v26 = vpop.f32.mrb[36].mxu1 }
 0x4b8   : > { %v1106_v19 = vadd.f32 1e-05, %v2911_v26  ;;  %v1097_v23 = vpop.f32.mrb[37].mxu1 }
 0x4b9   : > { %v1098_v41 = vadd.f32 1e-05, %v1097_v23  ;;  %v2912_v42 = vpop.f32.mrb[38].mxu1 }
 0x4ba   : > { %3204 = vrsqrt.f32 %v1106_v19  ;;  %v1109_v25 = vadd.f32 1e-05, %v2912_v42  ;;  %v1100_v44 = vpop.f32.mrb[39].mxu1 }
 0x4bb   : > { %3206 = vrsqrt.f32 %v1098_v41  ;;  %v1101_v46 = vadd.f32 1e-05, %v1100_v44  ;;  %v1041_v44 = vmul.f32 %v4063_v8, %v3985_v39 }
 0x4bc   : > { %v3197_v47 = vpop.eup %3196  ;;  %3208 = vrsqrt.f32 %v1109_v25 }
 0x4bd   : > { %v3199_v36 = vpop.eup %3198  ;;  %3210 = vrsqrt.f32 %v1101_v46  ;;  %v1162_v51 = vmul.f32 %v3197_v47, %v1033_v45 }
 0x4be   : > { %v3201_v31 = vpop.eup %3200  ;;  %v1160_v18 = vmul.f32 %v3199_v36, %v1031_v32  ;;  %v1039_v32 = vmul.f32 %v4063_v8, %v3989_v48 }
 0x4bf   : > { %v3203_v29 = vpop.eup %3202  ;;  %v2915_v57 = vpop.f32.mrb[40].mxu1  ;;  %v1163_v58 = vmul.f32 %v3201_v31, %v1034_v40  ;;  %v1182_v54 = vadd.f32 %v4073_v49, %v1162_v51  ;;  %v1042_v51 = vmul.f32 %v4063_v8, %v3993_v53 }
 0x4c0   : > { %v1122_v9 = vadd.f32 1e-05, %v2915_v57  ;;  %v1113_v52 = vpop.f32.mrb[41].mxu1  ;;  %v1161_v10 = vmul.f32 %v3203_v29, %v1032_v50  ;;  %v1180_v16 = vadd.f32 %v4073_v49, %v1160_v18  ;;  %v1040_v50 = vmul.f32 %v4063_v8, %v3996_v56 }
 0x4c1   : > { %v1114_v11 = vadd.f32 1e-05, %v1113_v52  ;;  %v2916_v12 = vpop.f32.mrb[42].mxu1  ;;  %v1183_v13 = vadd.f32 %v4073_v49, %v1163_v58  ;;  %v1045_v56 = vmul.f32 %v4063_v8, %v4009_v17 }
 0x4c2   : > { %3212 = vrsqrt.f32 %v1122_v9  ;;  %v1125_v14 = vadd.f32 1e-05, %v2916_v12  ;;  %v1116_v15 = vpop.f32.mrb[43].mxu1  ;;  %v1181_v55 = vadd.f32 %v4073_v49, %v1161_v10  ;;  %v1043_v12 = vmul.f32 %v4063_v8, %v4013_v0 }
 0x4c3   : > { %3214 = vrsqrt.f32 %v1114_v11  ;;  %v1117_v59 = vadd.f32 1e-05, %v1116_v15  ;;  %v4083_v20 = vpack.c.bf16 %v1183_v13, %v1182_v54 }
 0x4c4   : > { %v3205_v60 = vpop.eup %3204  ;;  %3216 = vrsqrt.f32 %v1125_v14  ;;  %v1196_v62 = vpack.c.bf16 %v1181_v55, %v1180_v16  ;;  %v1046_v14 = vmul.f32 %v4063_v8, %v4017_v3  ;;  %v1044_v55 = vmul.f32 %v4063_v8, %v4020_v24 }
 0x4c5   : > { %v3207_v1 = vpop.eup %3206  ;;  %3218 = vrsqrt.f32 %v1117_v59  ;;  %v1166_v6 = vmul.f32 %v3205_v60, %v1037_v30 }
 0x4c6   : > { %v3209_v34 = vpop.eup %3208  ;;  %2921 = vmatprep.subr.bf16.mxu0 %v1196_v62  ;;  %1521 = vmatprep.mubr.bf16.mxu1 %v1196_v62  ;;  %v1164_v28 = vmul.f32 %v3207_v1, %v1035_v61  ;;  %v4137_v1 = vld [vmem:[#allocation7 + $0x8] sm:$0xff]  }
 0x4c7   : > { %v3211_v38 = vpop.eup %3210  ;;  %v2919_v22 = vpop.f32.mrb[44].mxu1  ;;  %2922 = vmatpush3.bf16.msra.mxu0 %v1196_v62  ;;  %v1167_v35 = vmul.f32 %v3209_v34, %v1038_v37  ;;  %v1186_v23 = vadd.f32 %v4073_v49, %v1166_v6  ;;  %v4139_v37 = vld [vmem:[#allocation7 + $0x10] sm:$0xff]   ;;  %v4143_v6 = vld [vmem:[#allocation7 + $0x18] sm:$0xff]   ;;  %v4149_v34 = vld [vmem:[#allocation7 + $0x28] sm:$0xff]  }
 0x4c8   : > { %v1138_v2 = vadd.f32 1e-05, %v2919_v22  ;;  %v1129_v7 = vpop.f32.mrb[45].mxu1  ;;  %2923 = vmatprep.subr.bf16.mxu0 %v4083_v20  ;;  %v1165_v26 = vmul.f32 %v3211_v38, %v1036_v63  ;;  %v1184_v43 = vadd.f32 %v4073_v49, %v1164_v28  ;;  %v4151_v63 = vld [vmem:[#allocation7 + $0x30] sm:$0xff]   ;;  %v4155_v28 = vld [vmem:[#allocation7 + $0x38] sm:$0xff]  }
 0x4c9   : > { %v1130_v19 = vadd.f32 1e-05, %v1129_v7  ;;  %v2920_v4 = vpop.f32.mrb[46].mxu1  ;;  %v1187_v41 = vadd.f32 %v4073_v49, %v1167_v35  ;;  %v3178_v38 = vld [vmem:[%s3816_s26 + $0x78] sm:$0xff]  }
 0x4ca   : > { %3220 = vrsqrt.f32 %v1138_v2  ;;  %v1141_v5 = vadd.f32 1e-05, %v2920_v4  ;;  %v1132_v42 = vpop.f32.mrb[47].mxu1  ;;  %v1185_v25 = vadd.f32 %v4073_v49, %v1165_v26  ;;  %v3179_v22 = vld [vmem:[%s3816_s26 + $0x38] sm:$0xff]   ;;  %2638 = vmatprep.subr.bf16.mxu1 %v3178_v38 }
 0x4cb   : > { %3222 = vrsqrt.f32 %v1130_v19  ;;  %v1133_v45 = vadd.f32 1e-05, %v1132_v42  ;;  %2924 = vmatpush3.bf16.msra.mxu0 %v4083_v20  ;;  %v4099_v46 = vpack.c.bf16 %v1187_v41, %v1186_v23  ;;  %2639 = vmatpush3.bf16.msra.mxu1 %v3179_v22 }
 0x4cc   : > { %v3213_v47 = vpop.eup %3212  ;;  %3224 = vrsqrt.f32 %v1141_v5  ;;  %v4103_v36 = vpack.c.bf16 %v1185_v25, %v1184_v43 }
 0x4cd   : > { %v3215_v40 = vpop.eup %3214  ;;  %3226 = vrsqrt.f32 %v1133_v45  ;;  %v1170_v31 = vmul.f32 %v3213_v47, %v1041_v44 }
 0x4ce   : > { %v3217_v39 = vpop.eup %3216  ;;  %2925 = vmatprep.subr.bf16.mxu0 %v4103_v36  ;;  %v1168_v18 = vmul.f32 %v3215_v40, %v1039_v32 }
 0x4cf   : > { %v3219_v29 = vpop.eup %3218  ;;  %2926 = vmatpush3.bf16.msra.mxu0 %v4103_v36  ;;  %v1171_v48 = vmul.f32 %v3217_v39, %v1042_v51  ;;  %v1190_v58 = vadd.f32 %v4073_v49, %v1170_v31 }
 0x4d0   : > { %2927 = vmatprep.subr.bf16.mxu0 %v4099_v46  ;;  %v1169_v57 = vmul.f32 %v3219_v29, %v1040_v50  ;;  %v1188_v9 = vadd.f32 %v4073_v49, %v1168_v18 }
 0x4d1   : > { %v1191_v53 = vadd.f32 %v4073_v49, %v1171_v48 }
 0x4d2   : > { %v1189_v52 = vadd.f32 %v4073_v49, %v1169_v57 }
 0x4d3   : > { %2928 = vmatpush3.bf16.msra.mxu0 %v4099_v46  ;;  %v4119_v10 = vpack.c.bf16 %v1191_v53, %v1190_v58 }
 0x4d4   : > { %v3221_v11 = vpop.eup %3220  ;;  %v4123_v54 = vpack.c.bf16 %v1189_v52, %v1188_v9 }
 0x4d5   : > { %v3223_v13 = vpop.eup %3222  ;;  %v1174_v15 = vmul.f32 %v3221_v11, %v1045_v56 }
 0x4d6   : > { %v3225_v16 = vpop.eup %3224  ;;  %2929 = vmatprep.subr.bf16.mxu0 %v4123_v54  ;;  %v1172_v17 = vmul.f32 %v3223_v13, %v1043_v12 }
 0x4d7   : > { %v3227_v30 = vpop.eup %3226  ;;  %2930 = vmatpush3.bf16.msra.mxu0 %v4123_v54  ;;  %v1175_v59 = vmul.f32 %v3225_v16, %v1046_v14  ;;  %v1194_v60 = vadd.f32 %v4073_v49, %v1174_v15 }
 0x4d8   : > { %2931 = vmatprep.subr.bf16.mxu0 %v4119_v10  ;;  %v1173_v0 = vmul.f32 %v3227_v30, %v1044_v55  ;;  %v1192_v3 = vadd.f32 %v4073_v49, %v1172_v17 }
 0x4d9   : > { %v1195_v61 = vadd.f32 %v4073_v49, %v1175_v59 }
 0x4da   : > { %v1193_v62 = vadd.f32 %v4073_v49, %v1173_v0  ;;  %v4145_v49 = vld [vmem:[#allocation7 + $0x20] sm:$0xff]  }
 0x4db   : > { %2932 = vmatpush3.bf16.msra.mxu0 %v4119_v10  ;;  %v1203_v24 = vpack.c.bf16 %v1195_v61, %v1194_v60 }
 0x4dc   : > { %v1202_v8 = vpack.c.bf16 %v1193_v62, %v1192_v3 }
 0x4de   : > { %2933 = vmatprep.subr.bf16.mxu0 %v1202_v8 }
 0x4df   : > { %2934 = vmatpush3.bf16.msra.mxu0 %v1202_v8 }
 0x4e0   : > { %2935 = vmatprep.subr.bf16.mxu0 %v1203_v24 }
 0x4e3   : > { %2936 = vmatpush3.bf16.msra.mxu0 %v1203_v24 }
 0x4e6   : > { %2938 = vmatmul.mubr.bf16.vlgmr.msra.gmra.mrb[16].mxu0 %v4137_v1 }
 0x4e7   : > { %2941 = vmatprep.mubr.bf16.mxu0 %v4139_v37 }
 0x4ee   : > { %2942 = vmatmul.mubr.bf16.gmra.mrb[20].mxu0 %v4143_v6 }
 0x4ef   : > { %2945 = vmatprep.mubr.bf16.mxu0 %v4145_v49 }
 0x4f6   : > { %2946 = vmatmul.mubr.bf16.gmra.mrb[24].mxu0 %v4149_v34 }
 0x4f7   : > { %2949 = vmatprep.mubr.bf16.mxu0 %v4151_v63 }
 0x4fe   : > { %2950 = vmatmul.mubr.bf16.gmra.mrb[28].mxu0 %v4155_v28 }
 0x4ff   : > { %2969 = vmatprep.mubr.bf16.mxu0 %v4044_v33 }
 0x5b9   : > { %v2939_v35 = vpop.f32.mrb[16].mxu0 }
 0x5ba   : > { %v1286_v2 = vpop.f32.mrb[17].mxu0 }
 0x5bb   : > { %v2940_v7 = vpop.f32.mrb[18].mxu0 }
 0x5bc   : > { %v1350_v26 = vpack.c.bf16 %v2940_v7, %v2939_v35  ;;  %v1289_v19 = vpop.f32.mrb[19].mxu0 }
 0x5bd   : > { %v1349_v4 = vpack.c.bf16 %v1289_v19, %v1286_v2 }
 0x5bf   : > { %1522 = vmatmul.mubr.bf16.vlgmr.msra.gmra.mrb[48].mxu1 %v1349_v4 }
 0x5c0   : > { %1529 = vmatprep.mubr.bf16.mxu1 %v4083_v20 }
 0x5c1   : > { %v2943_v23 = vpop.f32.mrb[20].mxu0 }
 0x5c2   : > { %v1302_v41 = vpop.f32.mrb[21].mxu0 }
 0x5c3   : > { %v2944_v5 = vpop.f32.mrb[22].mxu0 }
 0x5c4   : > { %v1352_v42 = vpack.c.bf16 %v2944_v5, %v2943_v23  ;;  %v1305_v43 = vpop.f32.mrb[23].mxu0 }
 0x5c5   : > { %v1351_v25 = vpack.c.bf16 %v1305_v43, %v1302_v41 }
 0x5c7   : > { %1530 = vmatmul.mubr.bf16.gmra.mrb[52].mxu1 %v1350_v26 }
 0x5c8   : > { %1537 = vmatprep.mubr.bf16.mxu1 %v4103_v36  ;;  %v1391_v36 = vsub.s32 3, %v3925_v21 }
 0x5c9   : > { %v2947_v33 = vpop.f32.mrb[24].mxu0 }
 0x5ca   : > { %v1318_v44 = vpop.f32.mrb[25].mxu0  ;;  %v4168_v29 = vrot.slane %v3929_v27, %v1391_v36 }
 0x5cb   : > { %v2948_v45 = vpop.f32.mrb[26].mxu0 }
 0x5cc   : > { %v1354_v47 = vpack.c.bf16 %v2948_v45, %v2947_v33  ;;  %v1321_v32 = vpop.f32.mrb[27].mxu0 }
 0x5cd   : > { %v1353_v40 = vpack.c.bf16 %v1321_v32, %v1318_v44 }
 0x5cf   : > { %1538 = vmatmul.mubr.bf16.gmra.mrb[56].mxu1 %v1351_v25 }
 0x5d0   : > { %1545 = vmatprep.mubr.bf16.mxu1 %v4099_v46 }
 0x5d1   : > { %v2951_v51 = vpop.f32.mrb[28].mxu0 }
 0x5d2   : > { %v1334_v20 = vpop.f32.mrb[29].mxu0 }
 0x5d3   : > { %v2952_v31 = vpop.f32.mrb[30].mxu0 }
 0x5d4   : > { %v1356_v39 = vpack.c.bf16 %v2952_v31, %v2951_v51  ;;  %v1337_v50 = vpop.f32.mrb[31].mxu0 }
 0x5d5   : > { %v1355_v18 = vpack.c.bf16 %v1337_v50, %v1334_v20 }
 0x5d7   : > { %1546 = vmatmul.mubr.bf16.gmra.mrb[60].mxu1 %v1352_v42 }
 0x5d8   : > { %1553 = vmatprep.mubr.bf16.mxu1 %v4123_v54 }
 0x5df   : > { %1554 = vmatmul.mubr.bf16.gmra.mrb[64].mxu1 %v1353_v40 }
 0x5e0   : > { %1561 = vmatprep.mubr.bf16.mxu1 %v4119_v10 }
 0x5e7   : > { %1562 = vmatmul.mubr.bf16.gmra.mrb[68].mxu1 %v1354_v47 }
 0x5e8   : > { %1569 = vmatprep.mubr.bf16.mxu1 %v1202_v8 }
 0x5ef   : > { %1570 = vmatmul.mubr.bf16.gmra.mrb[72].mxu1 %v1355_v18 }
 0x5f0   : > { %1577 = vmatprep.mubr.bf16.mxu1 %v1203_v24 }
 0x5f7   : > { %1578 = vmatmul.mubr.bf16.gmra.mrb[76].mxu1 %v1356_v39 }
 0x692   : > { %v2640_v46 = vpop.f32.mrb[48].mxu1 }
 0x693   : > { %v2641_v48 = vpop.f32.mrb[49].mxu1 }
 0x694   : > { %v2642_v57 = vadd.f32 %v2641_v48, %v2640_v46  ;;  %v2643_v58 = vpop.f32.mrb[50].mxu1 }
 0x695   : > { %v2644_v53 = vpop.f32.mrb[51].mxu1 }
 0x696   : > { %v1524_v9 = vadd.f32 %v2642_v57, %v4168_v29  ;;  %v2645_v52 = vadd.f32 %v2644_v53, %v2643_v58 }
 0x698   : > { %v1602_v56 = vmul.f32 0.1, %v1524_v9  ;;  %v1527_v10 = vadd.f32 %v2645_v52, %v4168_v29  ;;  %vm1586_vm0 = vcmp.gt.f32.partialorder %v1524_v9, 0.0 }
 0x69a   : > { %vm1587_vm1 = vcmp.gt.f32.partialorder %v1527_v10, 0.0  ;;  %v1603_v11 = vmul.f32 0.1, %v1527_v10  ;;  %v2646_v12 = vpop.f32.mrb[52].mxu1  ;;  %v1618_v15 = vsel %vm1586_vm0, %v1524_v9, %v1602_v56  ;;  %vm3516_vm0 = vmmov (!%p2529_p0), 0  }
 0x69b   : > { %v2647_v54 = vpop.f32.mrb[53].mxu1 }
 0x69c   : > { %v2648_v13 = vadd.f32 %v2647_v54, %v2646_v12  ;;  %v2649_v14 = vpop.f32.mrb[54].mxu1  ;;  %v1619_v27 = vsel %vm1587_vm1, %v1527_v10, %v1603_v11 }
 0x69d   : > { %v2650_v16 = vpop.f32.mrb[55].mxu1  ;;  %v4172_v55 = vpack.c.bf16 %v1619_v27, %v1618_v15 }
 0x69e   : > { %v1532_v17 = vadd.f32 %v2648_v13, %v4168_v29  ;;  %v2651_v30 = vadd.f32 %v2650_v16, %v2649_v14 }
 0x69f   : > { %2953 = vmatprep.subr.bf16.mxu0 %v4172_v55 }
 0x6a0   : > { %v1604_v59 = vmul.f32 0.1, %v1532_v17  ;;  %v1535_v0 = vadd.f32 %v2651_v30, %v4168_v29  ;;  %2954 = vmatpush3.bf16.msra.mxu0 %v4172_v55  ;;  %vm1588_vm2 = vcmp.gt.f32.partialorder %v1532_v17, 0.0 }
 0x6a2   : > { %vm1589_vm3 = vcmp.gt.f32.partialorder %v1535_v0, 0.0  ;;  %v1605_v60 = vmul.f32 0.1, %v1535_v0  ;;  %v2652_v61 = vpop.f32.mrb[56].mxu1  ;;  %v1620_v8 = vsel %vm1588_vm2, %v1532_v17, %v1604_v59 }
 0x6a3   : > { %v2653_v3 = vpop.f32.mrb[57].mxu1 }
 0x6a4   : > { %v2654_v62 = vadd.f32 %v2653_v3, %v2652_v61  ;;  %v2655_v24 = vpop.f32.mrb[58].mxu1  ;;  %v1621_v38 = vsel %vm1589_vm3, %v1535_v0, %v1605_v60 }
 0x6a5   : > { %v2656_v22 = vpop.f32.mrb[59].mxu1  ;;  %v4178_v35 = vpack.c.bf16 %v1621_v38, %v1620_v8 }
 0x6a6   : > { %v1540_v2 = vadd.f32 %v2654_v62, %v4168_v29  ;;  %v2657_v7 = vadd.f32 %v2656_v22, %v2655_v24 }
 0x6a7   : > { %2955 = vmatprep.subr.bf16.mxu0 %v4178_v35 }
 0x6a8   : > { %v1606_v26 = vmul.f32 0.1, %v1540_v2  ;;  %v1543_v19 = vadd.f32 %v2657_v7, %v4168_v29  ;;  %2956 = vmatpush3.bf16.msra.mxu0 %v4178_v35  ;;  %vm1590_vm4 = vcmp.gt.f32.partialorder %v1540_v2, 0.0 }
 0x6aa   : > { %vm1591_vm5 = vcmp.gt.f32.partialorder %v1543_v19, 0.0  ;;  %v1607_v4 = vmul.f32 0.1, %v1543_v19  ;;  %v2658_v23 = vpop.f32.mrb[60].mxu1  ;;  %v1622_v43 = vsel %vm1590_vm4, %v1540_v2, %v1606_v26 }
 0x6ab   : > { %v2659_v41 = vpop.f32.mrb[61].mxu1 }
 0x6ac   : > { %v2660_v5 = vadd.f32 %v2659_v41, %v2658_v23  ;;  %v2661_v42 = vpop.f32.mrb[62].mxu1  ;;  %v1623_v25 = vsel %vm1591_vm5, %v1543_v19, %v1607_v4 }
 0x6ad   : > { %v2662_v33 = vpop.f32.mrb[63].mxu1  ;;  %v4184_v44 = vpack.c.bf16 %v1623_v25, %v1622_v43 }
 0x6ae   : > { %v1548_v45 = vadd.f32 %v2660_v5, %v4168_v29  ;;  %v2663_v47 = vadd.f32 %v2662_v33, %v2661_v42 }
 0x6af   : > { %2957 = vmatprep.subr.bf16.mxu0 %v4184_v44 }
 0x6b0   : > { %v1608_v32 = vmul.f32 0.1, %v1548_v45  ;;  %v1551_v40 = vadd.f32 %v2663_v47, %v4168_v29  ;;  %2958 = vmatpush3.bf16.msra.mxu0 %v4184_v44  ;;  %vm1592_vm6 = vcmp.gt.f32.partialorder %v1548_v45, 0.0 }
 0x6b2   : > { %vm1593_vm7 = vcmp.gt.f32.partialorder %v1551_v40, 0.0  ;;  %v1609_v51 = vmul.f32 0.1, %v1551_v40  ;;  %v2664_v20 = vpop.f32.mrb[64].mxu1  ;;  %v1624_v18 = vsel %vm1592_vm6, %v1548_v45, %v1608_v32 }
 0x6b3   : > { %v2665_v31 = vpop.f32.mrb[65].mxu1 }
 0x6b4   : > { %v2666_v39 = vadd.f32 %v2665_v31, %v2664_v20  ;;  %v2667_v50 = vpop.f32.mrb[66].mxu1  ;;  %v1625_v36 = vsel %vm1593_vm7, %v1551_v40, %v1609_v51 }
 0x6b5   : > { %v2668_v46 = vpop.f32.mrb[67].mxu1  ;;  %v4190_v48 = vpack.c.bf16 %v1625_v36, %v1624_v18  ;;  %v3181_v18 = vld [vmem:[%s3816_s26 + $0x80] sm:$0xff]   ;;  %v3183_v36 = vld [vmem:[%s3816_s26 + $0x88] sm:$0xff]  }
 0x6b6   : > { %v1556_v57 = vadd.f32 %v2666_v39, %v4168_v29  ;;  %v2669_v58 = vadd.f32 %v2668_v46, %v2667_v50  ;;  %v3180_v50 = vld [vmem:[%s3816_s26 + $0xc0] sm:$0xff]   ;;  %v3184_v46 = vld [vmem:[%s3816_s26 + $0xd0] sm:$0xff]  }
 0x6b7   : > { %2959 = vmatprep.subr.bf16.mxu0 %v4190_v48 }
 0x6b8   : > { %v1610_v53 = vmul.f32 0.1, %v1556_v57  ;;  %v1559_v9 = vadd.f32 %v2669_v58, %v4168_v29  ;;  %2960 = vmatpush3.bf16.msra.mxu0 %v4190_v48  ;;  %vm1594_vm8 = vcmp.gt.f32.partialorder %v1556_v57, 0.0  ;;  %v3186_v58 = vld [vmem:[%s3816_s26 + $0xd8] sm:$0xff]  }
 0x6ba   : > { %vm1595_vm9 = vcmp.gt.f32.partialorder %v1559_v9, 0.0  ;;  %v1611_v52 = vmul.f32 0.1, %v1559_v9  ;;  %v2670_v56 = vpop.f32.mrb[68].mxu1  ;;  %v1626_v54 = vsel %vm1594_vm8, %v1556_v57, %v1610_v53  ;;  %v3185_v57 = vld [vmem:[%s3816_s26 + $0x90] sm:$0xff]   ;;  %v3189_v53 = vld [vmem:[%s3816_s26 + $0xa0] sm:$0xff]  }
 0x6bb   : > { %v2671_v10 = vpop.f32.mrb[69].mxu1 }
 0x6bc   : > { %v2672_v11 = vadd.f32 %v2671_v10, %v2670_v56  ;;  %v2673_v12 = vpop.f32.mrb[70].mxu1  ;;  %v1627_v13 = vsel %vm1595_vm9, %v1559_v9, %v1611_v52  ;;  %v3190_v9 = vld [vmem:[%s3816_s26 + $0xe8] sm:$0xff]   ;;  %v3194_v56 = vld [vmem:[%s3816_s26 + $0xf8] sm:$0xff]  }
 0x6bd   : > { %v2674_v14 = vpop.f32.mrb[71].mxu1  ;;  %v4196_v15 = vpack.c.bf16 %v1627_v13, %v1626_v54  ;;  %v3191_v52 = vld [vmem:[%s3816_s26 + $0xa8] sm:$0xff]   ;;  %v3195_v10 = vld [vmem:[%s3816_s26 + $0xb8] sm:$0xff]  }
 0x6be   : > { %v1564_v27 = vadd.f32 %v2672_v11, %v4168_v29  ;;  %v2675_v16 = vadd.f32 %v2674_v14, %v2673_v12 }
 0x6bf   : > { %2961 = vmatprep.subr.bf16.mxu0 %v4196_v15 }
 0x6c0   : > { %v1612_v17 = vmul.f32 0.1, %v1564_v27  ;;  %v1567_v30 = vadd.f32 %v2675_v16, %v4168_v29  ;;  %2962 = vmatpush3.bf16.msra.mxu0 %v4196_v15  ;;  %vm1596_vm10 = vcmp.gt.f32.partialorder %v1564_v27, 0.0 }
 0x6c2   : > { %vm1597_vm11 = vcmp.gt.f32.partialorder %v1567_v30, 0.0  ;;  %v1613_v59 = vmul.f32 0.1, %v1567_v30  ;;  %v2676_v0 = vpop.f32.mrb[72].mxu1  ;;  %v1628_v62 = vsel %vm1596_vm10, %v1564_v27, %v1612_v17 }
 0x6c3   : > { %v2677_v60 = vpop.f32.mrb[73].mxu1 }
 0x6c4   : > { %v2678_v61 = vadd.f32 %v2677_v60, %v2676_v0  ;;  %v2679_v3 = vpop.f32.mrb[74].mxu1  ;;  %v1629_v24 = vsel %vm1597_vm11, %v1567_v30, %v1613_v59 }
 0x6c5   : > { %v2680_v8 = vpop.f32.mrb[75].mxu1  ;;  %v4202_v38 = vpack.c.bf16 %v1629_v24, %v1628_v62 }
 0x6c6   : > { %v1572_v22 = vadd.f32 %v2678_v61, %v4168_v29  ;;  %v2681_v2 = vadd.f32 %v2680_v8, %v2679_v3 }
 0x6c7   : > { %2963 = vmatprep.subr.bf16.mxu0 %v4202_v38 }
 0x6c8   : > { %v1614_v7 = vmul.f32 0.1, %v1572_v22  ;;  %v1575_v26 = vadd.f32 %v2681_v2, %v4168_v29  ;;  %2964 = vmatpush3.bf16.msra.mxu0 %v4202_v38  ;;  %vm1598_vm12 = vcmp.gt.f32.partialorder %v1572_v22, 0.0 }
 0x6ca   : > { %vm1599_vm13 = vcmp.gt.f32.partialorder %v1575_v26, 0.0  ;;  %v1615_v19 = vmul.f32 0.1, %v1575_v26  ;;  %v2682_v4 = vpop.f32.mrb[76].mxu1  ;;  %v1630_v42 = vsel %vm1598_vm12, %v1572_v22, %v1614_v7  ;;  %v3228_v7 = vld [vmem:[%s3831_s27] sm:$0xff] }
 0x6cb   : > { %v2683_v23 = vpop.f32.mrb[77].mxu1 }
 0x6cc   : > { %v2684_v41 = vadd.f32 %v2683_v23, %v2682_v4  ;;  %v2685_v5 = vpop.f32.mrb[78].mxu1  ;;  %v1631_v43 = vsel %vm1599_vm13, %v1575_v26, %v1615_v19 }
 0x6cd   : > { %v2686_v25 = vpop.f32.mrb[79].mxu1  ;;  %v4208_v33 = vpack.c.bf16 %v1631_v43, %v1630_v42 }
 0x6ce   : > { %v1580_v45 = vadd.f32 %v2684_v41, %v4168_v29  ;;  %v2687_v47 = vadd.f32 %v2686_v25, %v2685_v5  ;;  %v3229_v5 = vld [vmem:[#allocation2] sm:$0xff]  ;;  %v3230_v25 = vld [vmem:[#allocation2 + $0x8] sm:$0xff] }
 0x6cf   : > { %2965 = vmatprep.subr.bf16.mxu0 %v4208_v33 }
 0x6d0   : > { %v1616_v32 = vmul.f32 0.1, %v1580_v45  ;;  %v1583_v40 = vadd.f32 %v2687_v47, %v4168_v29  ;;  %2966 = vmatpush3.bf16.msra.mxu0 %v4208_v33  ;;  %vm1600_vm14 = vcmp.gt.f32.partialorder %v1580_v45, 0.0  ;;  %v3182_v29 = vld [vmem:[%s3816_s26 + $0xc8] sm:$0xff]  }
 0x6d2   : > { %vm1601_vm15 = vcmp.gt.f32.partialorder %v1583_v40, 0.0  ;;  %v1617_v51 = vmul.f32 0.1, %v1583_v40  ;;  %v1632_v20 = vsel %vm1600_vm14, %v1580_v45, %v1616_v32 }
 0x6d4   : > { %v1633_v31 = vsel %vm1601_vm15, %v1583_v40, %v1617_v51 }
 0x6d5   : > { %v4214_v39 = vpack.c.bf16 %v1633_v31, %v1632_v20  ;;  %v3231_v31 = vld [vmem:[#allocation2 + $0x10] sm:$0xff] }
 0x6d7   : > { %2967 = vmatprep.subr.bf16.mxu0 %v4214_v39 }
 0x6d8   : > { %2968 = vmatpush3.bf16.msra.mxu0 %v4214_v39 }
 0x6d9   : > { %2704 = vmatprep.subr.bf16.mxu0 %v3180_v50 }
 0x6db   : > { %2970 = vmatmul.mubr.bf16.vlgmr.msra.gmra.mrb[32].mxu0 %v4137_v1  ;;  %v3187_v1 = vld [vmem:[%s3816_s26 + $0x98] sm:$0xff]  }
 0x6dc   : > { %2973 = vmatprep.mubr.bf16.mxu0 %v4139_v37  ;;  %2705 = vmatpush3.bf16.msra.mxu0 %v3181_v18  ;;  %v3188_v37 = vld [vmem:[%s3816_s26 + $0xe0] sm:$0xff]   ;;  %v3232_v18 = vld [vmem:[#allocation2 + $0x18] sm:$0xff] }
 0x6dd   : > { %2706 = vmatprep.subr.bf16.mxu0 %v3182_v29 }
 0x6e0   : > { %2707 = vmatpush3.bf16.msra.mxu0 %v3183_v36 }
 0x6e1   : > { %2708 = vmatprep.subr.bf16.mxu0 %v3184_v46 }
 0x6e3   : > { %2974 = vmatmul.mubr.bf16.gmra.mrb[36].mxu0 %v4143_v6  ;;  %v3192_v6 = vld [vmem:[%s3816_s26 + $0xf0] sm:$0xff]  }
 0x6e4   : > { %2977 = vmatprep.mubr.bf16.mxu0 %v4145_v49  ;;  %2709 = vmatpush3.bf16.msra.mxu0 %v3185_v57  ;;  %v3193_v49 = vld [vmem:[%s3816_s26 + $0xb0] sm:$0xff]  }
 0x6e5   : > { %2710 = vmatprep.subr.bf16.mxu0 %v3186_v58 }
 0x6e8   : > { %2711 = vmatpush3.bf16.msra.mxu0 %v3187_v1 }
 0x6e9   : > { %2712 = vmatprep.subr.bf16.mxu0 %v3188_v37 }
 0x6eb   : > { %2978 = vmatmul.mubr.bf16.gmra.mrb[40].mxu0 %v4149_v34 }
 0x6ec   : > { %2981 = vmatprep.mubr.bf16.mxu0 %v4151_v63  ;;  %2713 = vmatpush3.bf16.msra.mxu0 %v3189_v53 }
 0x6ed   : > { %2714 = vmatprep.subr.bf16.mxu0 %v3190_v9  ;;  %v3233_v9 = vld [vmem:[#allocation2 + $0x20] sm:$0xff] }
 0x6f0   : > { %2715 = vmatpush3.bf16.msra.mxu0 %v3191_v52 }
 0x6f1   : > { %2716 = vmatprep.subr.bf16.mxu0 %v3192_v6 }
 0x6f3   : > { %2982 = vmatmul.mubr.bf16.gmra.mrb[44].mxu0 %v4155_v28 }
 0x6f4   : > { %1912 = vmatprep.mubr.bf16.mxu0 %v4172_v55  ;;  %2717 = vmatpush3.bf16.msra.mxu0 %v3193_v49  ;;  %v3234_v49 = vld [vmem:[#allocation2 + $0x28] sm:$0xff] }
 0x6f5   : > { %2718 = vmatprep.subr.bf16.mxu0 %v3194_v56 }
 0x6f8   : > { %2719 = vmatpush3.bf16.msra.mxu0 %v3195_v10 }
 0x7ae   : > { %v2971_v11 = vpop.f32.mrb[32].mxu0 }
 0x7af   : > { %v1676_v34 = vpop.f32.mrb[33].mxu0 }
 0x7b0   : > { %v2972_v12 = vpop.f32.mrb[34].mxu0 }
 0x7b1   : > { %v1740_v63 = vpack.c.bf16 %v2972_v12, %v2971_v11  ;;  %v1679_v54 = vpop.f32.mrb[35].mxu0 }
 0x7b2   : > { %v1739_v13 = vpack.c.bf16 %v1679_v54, %v1676_v34 }
 0x7b4   : > { %1913 = vmatmul.mubr.bf16.vlgmr.msra.gmra.mrb[48].mxu0 %v1739_v13 }
 0x7b5   : > { %1920 = vmatprep.mubr.bf16.mxu0 %v4178_v35 }
 0x7b6   : > { %v2975_v14 = vpop.f32.mrb[36].mxu0 }
 0x7b7   : > { %v1692_v27 = vpop.f32.mrb[37].mxu0 }
 0x7b8   : > { %v2976_v16 = vpop.f32.mrb[38].mxu0 }
 0x7b9   : > { %v1742_v28 = vpack.c.bf16 %v2976_v16, %v2975_v14  ;;  %v1695_v17 = vpop.f32.mrb[39].mxu0  ;;  %v3235_v14 = vld [vmem:[#allocation2 + $0x30] sm:$0xff] }
 0x7ba   : > { %v1741_v55 = vpack.c.bf16 %v1695_v17, %v1692_v27 }
 0x7bc   : > { %1921 = vmatmul.mubr.bf16.gmra.mrb[52].mxu0 %v1740_v63 }
 0x7bd   : > { %1928 = vmatprep.mubr.bf16.mxu0 %v4184_v44  ;;  %v1782_v44 = vsub.s32 4, %v3925_v21 }
 0x7be   : > { %v2979_v30 = vpop.f32.mrb[40].mxu0 }
 0x7bf   : > { %v1708_v59 = vpop.f32.mrb[41].mxu0  ;;  %v4251_v26 = vrot.slane %v3228_v7, %v1782_v44 }
 0x7c0   : > { %v2980_v0 = vpop.f32.mrb[42].mxu0 }
 0x7c1   : > { %v1744_v60 = vpack.c.bf16 %v2980_v0, %v2979_v30  ;;  %v1711_v61 = vpop.f32.mrb[43].mxu0 }
 0x7c2   : > { %v1743_v3 = vpack.c.bf16 %v1711_v61, %v1708_v59 }
 0x7c4   : > { %1929 = vmatmul.mubr.bf16.gmra.mrb[56].mxu0 %v1741_v55 }
 0x7c5   : > { %1936 = vmatprep.mubr.bf16.mxu0 %v4190_v48 }
 0x7c6   : > { %v2983_v62 = vpop.f32.mrb[44].mxu0 }
 0x7c7   : > { %v1724_v35 = vpop.f32.mrb[45].mxu0 }
 0x7c8   : > { %v2984_v24 = vpop.f32.mrb[46].mxu0 }
 0x7c9   : > { %v1746_v8 = vpack.c.bf16 %v2984_v24, %v2983_v62  ;;  %v1727_v22 = vpop.f32.mrb[47].mxu0  ;;  %v3237_v62 = vld [vmem:[#allocation2 + $0x40] sm:$0xff] }
 0x7ca   : > { %v1745_v2 = vpack.c.bf16 %v1727_v22, %v1724_v35 }
 0x7cc   : > { %1937 = vmatmul.mubr.bf16.gmra.mrb[60].mxu0 %v1742_v28  ;;  %v3236_v28 = vld [vmem:[#allocation2 + $0x38] sm:$0xff] }
 0x7cd   : > { %1944 = vmatprep.mubr.bf16.mxu0 %v4196_v15 }
 0x7d4   : > { %1945 = vmatmul.mubr.bf16.gmra.mrb[64].mxu0 %v1743_v3 }
 0x7d5   : > { %1952 = vmatprep.mubr.bf16.mxu0 %v4202_v38 }
 0x7dc   : > { %1953 = vmatmul.mubr.bf16.gmra.mrb[68].mxu0 %v1744_v60 }
 0x7dd   : > { %1960 = vmatprep.mubr.bf16.mxu0 %v4208_v33 }
 0x7e4   : > { %1961 = vmatmul.mubr.bf16.gmra.mrb[72].mxu0 %v1745_v2 }
 0x7e5   : > { %1968 = vmatprep.mubr.bf16.mxu0 %v4214_v39 }
 0x7ec   : > { %1969 = vmatmul.mubr.bf16.gmra.mrb[76].mxu0 %v1746_v8  ;;  %v3238_v8 = vld [vmem:[#allocation2 + $0x48] sm:$0xff] }
 0x887   : > { %v2720_v48 = vpop.f32.mrb[48].mxu0 }
 0x888   : > { %v2721_v19 = vpop.f32.mrb[49].mxu0 }
 0x889   : > { %v2722_v4 = vadd.f32 %v2721_v19, %v2720_v48  ;;  %v2723_v23 = vpop.f32.mrb[50].mxu0 }
 0x88a   : > { %v2724_v15 = vpop.f32.mrb[51].mxu0 }
 0x88b   : > { %v1915_v41 = vadd.f32 %v2722_v4, %v4251_v26  ;;  %v2725_v38 = vadd.f32 %v2724_v15, %v2723_v23  ;;  %v3239_v15 = vld [vmem:[#allocation2 + $0x50] sm:$0xff] }
 0x88d   : > { %v1977_v42 = vadd.f32 %v3229_v5, %v1915_v41  ;;  %v1918_v43 = vadd.f32 %v2725_v38, %v4251_v26  ;;  %v3240_v5 = vld [vmem:[#allocation2 + $0x58] sm:$0xff] }
 0x88f   : > { %1993 = vst [vmem:[#allocation2] sm:$0xff] %v1977_v42  ;;  %v1978_v33 = vadd.f32 %v3230_v25, %v1918_v43  ;;  %v2726_v45 = vpop.f32.mrb[52].mxu0 }
 0x890   : > { %v2727_v21 = vpop.f32.mrb[53].mxu0 }
 0x891   : > { %1994 = vst [vmem:[#allocation2 + $0x8] sm:$0xff] %v1978_v33  ;;  %v2728_v47 = vadd.f32 %v2727_v21, %v2726_v45  ;;  %v2729_v32 = vpop.f32.mrb[54].mxu0 }
 0x892   : > { %v2730_v40 = vpop.f32.mrb[55].mxu0 }
 0x893   : > { %v1923_v51 = vadd.f32 %v2728_v47, %v4251_v26  ;;  %v2731_v20 = vadd.f32 %v2730_v40, %v2729_v32  ;;  %v3241_v40 = vld [vmem:[#allocation2 + $0x60] sm:$0xff] }
 0x895   : > { %v1979_v39 = vadd.f32 %v3231_v31, %v1923_v51  ;;  %v1926_v50 = vadd.f32 %v2731_v20, %v4251_v26  ;;  %v3242_v31 = vld [vmem:[#allocation2 + $0x68] sm:$0xff] }
 0x897   : > { %1995 = vst [vmem:[#allocation2 + $0x10] sm:$0xff] %v1979_v39  ;;  %v1980_v29 = vadd.f32 %v3232_v18, %v1926_v50  ;;  %v2732_v36 = vpop.f32.mrb[56].mxu0 }
 0x898   : > { %v2733_v46 = vpop.f32.mrb[57].mxu0 }
 0x899   : > { %1996 = vst [vmem:[#allocation2 + $0x18] sm:$0xff] %v1980_v29  ;;  %v2734_v57 = vadd.f32 %v2733_v46, %v2732_v36  ;;  %v2735_v58 = vpop.f32.mrb[58].mxu0 }
 0x89a   : > { %v2736_v1 = vpop.f32.mrb[59].mxu0 }
 0x89b   : > { %v1931_v37 = vadd.f32 %v2734_v57, %v4251_v26  ;;  %v2737_v53 = vadd.f32 %v2736_v1, %v2735_v58  ;;  %v3243_v1 = vld [vmem:[#allocation2 + $0x70] sm:$0xff] }
 0x89d   : > { %v1981_v52 = vadd.f32 %v3233_v9, %v1931_v37  ;;  %v1934_v6 = vadd.f32 %v2737_v53, %v4251_v26  ;;  %v3244_v9 = vld [vmem:[#allocation2 + $0x78] sm:$0xff] }
 0x89f   : > { %1997 = vst [vmem:[#allocation2 + $0x20] sm:$0xff] %v1981_v52  ;;  %v1982_v56 = vadd.f32 %v3234_v49, %v1934_v6  ;;  %v2738_v10 = vpop.f32.mrb[60].mxu0  ;;  %v3245_v6 = vld [vmem:[#allocation13] sm:$0xff] (!%p2529_p0)   ;;  %v3246_v49 = vld [vmem:[#allocation13 + $0x8] sm:$0xff] (!%p2529_p0)  }
 0x8a0   : > { %v2739_v11 = vpop.f32.mrb[61].mxu0  ;;  %2985 = vmatprep.subr.bf16.mxu0 (!%p2529_p0), %v3245_v6 }
 0x8a1   : > { %1998 = vst [vmem:[#allocation2 + $0x28] sm:$0xff] %v1982_v56  ;;  %v2740_v34 = vadd.f32 %v2739_v11, %v2738_v10  ;;  %v2741_v12 = vpop.f32.mrb[62].mxu0  ;;  %2986 = vmatpush3.bf16.msra.mxu0 (!%p2529_p0), %v3245_v6  ;;  %v3247_v56 = vld [vmem:[#allocation13 + $0x10] sm:$0xff] (!%p2529_p0)   ;;  %v3248_v10 = vld [vmem:[#allocation13 + $0x18] sm:$0xff] (!%p2529_p0)   ;;  %v2013_v11 = vld [vmem:[#allocation2] sm:$0xff] (!%p2529_p0) }
 0x8a2   : > { %v2742_v63 = vpop.f32.mrb[63].mxu0  ;;  %2987 = vmatprep.subr.bf16.mxu0 (!%p2529_p0), %v3246_v49 }
 0x8a3   : > { %v1939_v54 = vadd.f32 %v2740_v34, %v4251_v26  ;;  %v2743_v13 = vadd.f32 %v2742_v63, %v2741_v12  ;;  %v2014_v34 = vld [vmem:[#allocation2 + $0x8] sm:$0xff] (!%p2529_p0) }
 0x8a4   : > { %v2029_v12 = vpack.c.bf16 (!%p2529_p0), %v2014_v34, %v2013_v11  ;;  %v3250_v63 = vld [vmem:[#allocation13 + $0x28] sm:$0xff] (!%p2529_p0)  }
 0x8a5   : > { %v1983_v27 = vadd.f32 %v3235_v14, %v1939_v54  ;;  %v1942_v16 = vadd.f32 %v2743_v13, %v4251_v26  ;;  %2988 = vmatpush3.bf16.msra.mxu0 (!%p2529_p0), %v3246_v49  ;;  %v3251_v54 = vld [vmem:[#allocation13 + $0x30] sm:$0xff] (!%p2529_p0)   ;;  %v3252_v13 = vld [vmem:[#allocation13 + $0x38] sm:$0xff] (!%p2529_p0)  }
 0x8a6   : > { %2989 = vmatprep.subr.bf16.mxu0 (!%p2529_p0), %v3247_v56  ;;  %3001 = vmatprep.mubr.bf16.mxu0 (!%p2529_p0), %v2029_v12  ;;  %v2015_v14 = vld [vmem:[#allocation2 + $0x10] sm:$0xff] (!%p2529_p0) }
 0x8a7   : > { %1999 = vst [vmem:[#allocation2 + $0x30] sm:$0xff] %v1983_v27  ;;  %v1984_v17 = vadd.f32 %v3236_v28, %v1942_v16  ;;  %v2744_v55 = vpop.f32.mrb[64].mxu0  ;;  %v2016_v27 = vld [vmem:[#allocation2 + $0x18] sm:$0xff] (!%p2529_p0)  ;;  %v2017_v16 = vld [vmem:[#allocation2 + $0x20] sm:$0xff] (!%p2529_p0) }
 0x8a8   : > { %v2745_v30 = vpop.f32.mrb[65].mxu0  ;;  %v2018_v28 = vld [vmem:[#allocation2 + $0x28] sm:$0xff] (!%p2529_p0) }
 0x8a9   : > { %2000 = vst [vmem:[#allocation2 + $0x38] sm:$0xff] %v1984_v17  ;;  %v2746_v59 = vadd.f32 %v2745_v30, %v2744_v55  ;;  %v2747_v0 = vpop.f32.mrb[66].mxu0  ;;  %2990 = vmatpush3.bf16.msra.mxu0 (!%p2529_p0), %v3247_v56  ;;  %v2030_v17 = vpack.c.bf16 (!%p2529_p0), %v2016_v27, %v2015_v14  ;;  %v2031_v55 = vpack.c.bf16 (!%p2529_p0), %v2018_v28, %v2017_v16 }
 0x8aa   : > { %v2748_v60 = vpop.f32.mrb[67].mxu0  ;;  %2991 = vmatprep.subr.bf16.mxu0 (!%p2529_p0), %v3248_v10 }
 0x8ab   : > { %v1947_v61 = vadd.f32 %v2746_v59, %v4251_v26  ;;  %v2749_v3 = vadd.f32 %v2748_v60, %v2747_v0 }
 0x8ad   : > { %v1985_v35 = vadd.f32 %v3237_v62, %v1947_v61  ;;  %v1950_v24 = vadd.f32 %v2749_v3, %v4251_v26  ;;  %2992 = vmatpush3.bf16.msra.mxu0 (!%p2529_p0), %v3248_v10 }
 0x8ae   : > { %v2019_v30 = vld [vmem:[#allocation2 + $0x30] sm:$0xff] (!%p2529_p0) }
 0x8af   : > { %2001 = vst [vmem:[#allocation2 + $0x40] sm:$0xff] %v1985_v35  ;;  %v1986_v22 = vadd.f32 %v3238_v8, %v1950_v24  ;;  %v2750_v2 = vpop.f32.mrb[68].mxu0 }
 0x8b0   : > { %v2751_v44 = vpop.f32.mrb[69].mxu0  ;;  %v2020_v59 = vld [vmem:[#allocation2 + $0x38] sm:$0xff] (!%p2529_p0) }
 0x8b1   : > { %2002 = vst [vmem:[#allocation2 + $0x48] sm:$0xff] %v1986_v22  ;;  %v2752_v48 = vadd.f32 %v2751_v44, %v2750_v2  ;;  %v2753_v7 = vpop.f32.mrb[70].mxu0  ;;  %v2032_v61 = vpack.c.bf16 (!%p2529_p0), %v2020_v59, %v2019_v30 }
 0x8b2   : > { %v2754_v19 = vpop.f32.mrb[71].mxu0 }
 0x8b3   : > { %v1955_v4 = vadd.f32 %v2752_v48, %v4251_v26  ;;  %v2755_v23 = vadd.f32 %v2754_v19, %v2753_v7  ;;  %v3515_v19 = vmov (!%p2529_p0), 0.0  }
 0x8b4   : > { %3017 = vmatprep.subr.bf16.mxu1 (!%p2529_p0), %v3515_v19  ;;  %3033 = vmatprep.mubr.msk.bf16.mxu1 (!%p2529_p0), %vm3516_vm0, %v3515_v19 }
 0x8b5   : > { %v1987_v41 = vadd.f32 %v3239_v15, %v1955_v4  ;;  %v1958_v38 = vadd.f32 %v2755_v23, %v4251_v26  ;;  %v4275_v4 = vld [vmem:[%s4346_s7] ss:$0 sm:$0xff] (!%p2529_p0) }
 0x8b6   : > { %v2021_v0 = vld [vmem:[#allocation2 + $0x40] sm:$0xff] (!%p2529_p0) }
 0x8b7   : > { %2003 = vst [vmem:[#allocation2 + $0x50] sm:$0xff] %v1987_v41  ;;  %v1988_v42 = vadd.f32 %v3240_v5, %v1958_v38  ;;  %v2756_v43 = vpop.f32.mrb[72].mxu0 }
 0x8b8   : > { %v2757_v25 = vpop.f32.mrb[73].mxu0  ;;  %v2022_v60 = vld [vmem:[#allocation2 + $0x48] sm:$0xff] (!%p2529_p0) }
 0x8b9   : > { %2004 = vst [vmem:[#allocation2 + $0x58] sm:$0xff] %v1988_v42  ;;  %v2758_v33 = vadd.f32 %v2757_v25, %v2756_v43  ;;  %v2759_v45 = vpop.f32.mrb[74].mxu0  ;;  %v2033_v3 = vpack.c.bf16 (!%p2529_p0), %v2022_v60, %v2021_v0 }
 0x8ba   : > { %v2760_v21 = vpop.f32.mrb[75].mxu0 }
 0x8bb   : > { %v1963_v47 = vadd.f32 %v2758_v33, %v4251_v26  ;;  %v2761_v32 = vadd.f32 %v2760_v21, %v2759_v45 }
 0x8bd   : > { %v1989_v51 = vadd.f32 %v3241_v40, %v1963_v47  ;;  %v1966_v20 = vadd.f32 %v2761_v32, %v4251_v26 }
 0x8be   : > { %v2023_v62 = vld [vmem:[#allocation2 + $0x50] sm:$0xff] (!%p2529_p0) }
 0x8bf   : > { %2005 = vst [vmem:[#allocation2 + $0x60] sm:$0xff] %v1989_v51  ;;  %v1990_v39 = vadd.f32 %v3242_v31, %v1966_v20  ;;  %v2762_v50 = vpop.f32.mrb[76].mxu0 }
 0x8c0   : > { %v2763_v18 = vpop.f32.mrb[77].mxu0  ;;  %v2024_v35 = vld [vmem:[#allocation2 + $0x58] sm:$0xff] (!%p2529_p0) }
 0x8c1   : > { %2006 = vst [vmem:[#allocation2 + $0x68] sm:$0xff] %v1990_v39  ;;  %v2764_v29 = vadd.f32 %v2763_v18, %v2762_v50  ;;  %v2765_v36 = vpop.f32.mrb[78].mxu0  ;;  %v2034_v22 = vpack.c.bf16 (!%p2529_p0), %v2024_v35, %v2023_v62 }
 0x8c2   : > { %v2766_v46 = vpop.f32.mrb[79].mxu0 }
 0x8c3   : > { %v1971_v57 = vadd.f32 %v2764_v29, %v4251_v26  ;;  %v2767_v58 = vadd.f32 %v2766_v46, %v2765_v36  ;;  %2012 = sbr.rel (%p2529_p0) target bundleno = 2762 (0xaca), region = 92 }
 0x8c5   : > { %v1991_v37 = vadd.f32 %v3243_v1, %v1971_v57  ;;  %v1974_v53 = vadd.f32 %v2767_v58, %v4251_v26  ;;  %v3249_v26 = vld [vmem:[#allocation13 + $0x20] sm:$0xff] (!%p2529_p0)  }
 0x8c6   : > { %2993 = vmatprep.subr.bf16.mxu0 (!%p2529_p0), %v3249_v26  ;;  %v2025_v24 = vld [vmem:[#allocation2 + $0x60] sm:$0xff] (!%p2529_p0) }
 0x8c7   : > { %2007 = vst [vmem:[#allocation2 + $0x70] sm:$0xff] %v1991_v37  ;;  %v1992_v52 = vadd.f32 %v3244_v9, %v1974_v53  ;;  %2994 = vmatpush3.bf16.msra.mxu0 (!%p2529_p0), %v3249_v26 }
 0x8c8   : > { %2995 = vmatprep.subr.bf16.mxu0 (!%p2529_p0), %v3250_v63  ;;  %v2026_v8 = vld [vmem:[#allocation2 + $0x68] sm:$0xff] (!%p2529_p0) }
 0x8c9   : > { %2008 = vst [vmem:[#allocation2 + $0x78] sm:$0xff] %v1992_v52  ;;  %v2035_v2 = vpack.c.bf16 (!%p2529_p0), %v2026_v8, %v2025_v24 }
 0x8cb   : > { %2996 = vmatpush3.bf16.msra.mxu0 %v3250_v63 }
 0x8cc   : > { %2997 = vmatprep.subr.bf16.mxu0 %v3251_v54 }
 0x8ce   : > { %v2027_v44 = vld [vmem:[#allocation2 + $0x70] sm:$0xff] }
 0x8cf   : > { %2998 = vmatpush3.bf16.msra.mxu0 %v3251_v54 }
 0x8d0   : > { %2999 = vmatprep.subr.bf16.mxu0 %v3252_v13  ;;  %v2028_v48 = vld [vmem:[#allocation2 + $0x78] sm:$0xff] }
 0x8d1   : > { %v2036_v7 = vpack.c.bf16 %v2028_v48, %v2027_v44 }
 0x8d3   : > { %3000 = vmatpush3.bf16.msra.mxu0 %v3252_v13 }
 0x8d6   : > { %3002 = vmatmul.mubr.bf16.vlgmr.msra.gmra.mrb[0].mxu0 %v2030_v17 }
 0x8d7   : > { %3005 = vmatprep.mubr.bf16.mxu0 %v2031_v55 }
 0x8de   : > { %3006 = vmatmul.mubr.bf16.gmra.mrb[4].mxu0 %v2032_v61 }
 0x8df   : > { %3009 = vmatprep.mubr.bf16.mxu0 %v2033_v3 }
 0x8e6   : > { %3010 = vmatmul.mubr.bf16.gmra.mrb[8].mxu0 %v2034_v22 }
 0x8e7   : > { %3013 = vmatprep.mubr.bf16.mxu0 %v2035_v2 }
 0x8ee   : > { %3014 = vmatmul.mubr.bf16.gmra.mrb[12].mxu0 %v2036_v7 }
 0x9a9   : > { %v3003_v23 = vpop.f32.mrb[0].mxu0 }
 0x9aa   : > { %v2151_v15 = vadd.f32 %v3003_v23, %v4275_v4  ;;  %v2142_v41 = vpop.f32.mrb[1].mxu0 }
 0x9ab   : > { %v2143_v38 = vadd.f32 %v4275_v4, %v2142_v41  ;;  %v3004_v5 = vpop.f32.mrb[2].mxu0 }
 0x9ac   : > { %v2223_v42 = vmul.f32 0.1, %v2151_v15  ;;  %v2154_v43 = vadd.f32 %v3004_v5, %v4275_v4  ;;  %v2145_v25 = vpop.f32.mrb[3].mxu0  ;;  %vm2207_vm1 = vcmp.gt.f32.partialorder %v2151_v15, 0.0 }
 0x9ad   : > { %v2221_v33 = vmul.f32 0.1, %v2143_v38  ;;  %v2146_v45 = vadd.f32 %v4275_v4, %v2145_v25  ;;  %vm2205_vm3 = vcmp.gt.f32.partialorder %v2143_v38, 0.0 }
 0x9ae   : > { %vm2208_vm2 = vcmp.gt.f32.partialorder %v2154_v43, 0.0  ;;  %v2224_v21 = vmul.f32 0.1, %v2154_v43  ;;  %v2239_v32 = vsel %vm2207_vm1, %v2151_v15, %v2223_v42 }
 0x9af   : > { %v2222_v47 = vmul.f32 0.1, %v2146_v45  ;;  %vm2206_vm4 = vcmp.gt.f32.partialorder %v2146_v45, 0.0  ;;  %v2237_v20 = vsel %vm2205_vm3, %v2143_v38, %v2221_v33 }
 0x9b0   : > { %v2240_v40 = vsel %vm2208_vm2, %v2154_v43, %v2224_v21  ;;  %v2263_v21 = vstv %s2262_s24 }
 0x9b1   : > { %v3007_v51 = vpop.f32.mrb[4].mxu0  ;;  %v2238_v31 = vsel %vm2206_vm4, %v2146_v45, %v2222_v47  ;;  %v2255_v39 = vpack.c.bf16 %v2240_v40, %v2239_v32 }
 0x9b2   : > { %v2167_v50 = vadd.f32 %v3007_v51, %v4275_v4  ;;  %v2254_v18 = vpack.c.bf16 %v2238_v31, %v2237_v20  ;;  %v2158_v29 = vpop.f32.mrb[5].mxu0 }
 0x9b3   : > { %v2159_v36 = vadd.f32 %v4275_v4, %v2158_v29  ;;  %v3008_v46 = vpop.f32.mrb[6].mxu0 }
 0x9b4   : > { %vm2211_vm5 = vcmp.gt.f32.partialorder %v2167_v50, 0.0  ;;  %v2227_v57 = vmul.f32 0.1, %v2167_v50  ;;  %3018 = vmatpush3.bf16.xpose.msra.mxu1 %v2254_v18  ;;  %v2170_v58 = vadd.f32 %v3008_v46, %v4275_v4  ;;  %v2161_v1 = vpop.f32.mrb[7].mxu0 }
 0x9b5   : > { %vm2209_vm6 = vcmp.gt.f32.partialorder %v2159_v36, 0.0  ;;  %v2225_v37 = vmul.f32 0.1, %v2159_v36  ;;  %v2162_v53 = vadd.f32 %v4275_v4, %v2161_v1  ;;  %3019 = vmatprep.subr.bf16.mxu1 %v3515_v19 }
 0x9b6   : > { %vm2212_vm7 = vcmp.gt.f32.partialorder %v2170_v58, 0.0  ;;  %v2228_v9 = vmul.f32 0.1, %v2170_v58  ;;  %v2243_v52 = vsel %vm2211_vm5, %v2167_v50, %v2227_v57 }
 0x9b7   : > { %vm2210_vm8 = vcmp.gt.f32.partialorder %v2162_v53, 0.0  ;;  %v2226_v6 = vmul.f32 0.1, %v2162_v53  ;;  %v2241_v49 = vsel %vm2209_vm6, %v2159_v36, %v2225_v37 }
 0x9b8   : > { %v2244_v56 = vsel %vm2212_vm7, %v2170_v58, %v2228_v9 }
 0x9b9   : > { %v3011_v10 = vpop.f32.mrb[8].mxu0  ;;  %v2242_v11 = vsel %vm2210_vm8, %v2162_v53, %v2226_v6  ;;  %v2257_v34 = vpack.c.bf16 %v2244_v56, %v2243_v52 }
 0x9ba   : > { %v2183_v12 = vadd.f32 %v3011_v10, %v4275_v4  ;;  %v2256_v26 = vpack.c.bf16 %v2242_v11, %v2241_v49  ;;  %v2174_v63 = vpop.f32.mrb[9].mxu0 }
 0x9bb   : > { %v2175_v54 = vadd.f32 %v4275_v4, %v2174_v63  ;;  %v3012_v13 = vpop.f32.mrb[10].mxu0 }
 0x9bc   : > { %3020 = vmatpush3.bf16.xpose.msra.mxu1 %v2255_v39  ;;  %vm2215_vm9 = vcmp.gt.f32.partialorder %v2183_v12, 0.0  ;;  %v2231_v14 = vmul.f32 0.1, %v2183_v12  ;;  %v2186_v27 = vadd.f32 %v3012_v13, %v4275_v4  ;;  %v2177_v16 = vpop.f32.mrb[11].mxu0 }
 0x9bd   : > { %3021 = vmatprep.subr.bf16.mxu1 %v3515_v19  ;;  %vm2213_vm10 = vcmp.gt.f32.partialorder %v2175_v54, 0.0  ;;  %v2229_v28 = vmul.f32 0.1, %v2175_v54  ;;  %v2178_v17 = vadd.f32 %v4275_v4, %v2177_v16 }
 0x9be   : > { %vm2216_vm11 = vcmp.gt.f32.partialorder %v2186_v27, 0.0  ;;  %v2232_v55 = vmul.f32 0.1, %v2186_v27  ;;  %v2247_v30 = vsel %vm2215_vm9, %v2183_v12, %v2231_v14 }
 0x9bf   : > { %vm2214_vm12 = vcmp.gt.f32.partialorder %v2178_v17, 0.0  ;;  %v2230_v59 = vmul.f32 0.1, %v2178_v17  ;;  %v2245_v0 = vsel %vm2213_vm10, %v2175_v54, %v2229_v28 }
 0x9c0   : > { %v2248_v60 = vsel %vm2216_vm11, %v2186_v27, %v2232_v55 }
 0x9c1   : > { %v3015_v61 = vpop.f32.mrb[12].mxu0  ;;  %v2246_v3 = vsel %vm2214_vm12, %v2178_v17, %v2230_v59  ;;  %v2259_v62 = vpack.c.bf16 %v2248_v60, %v2247_v30 }
 0x9c2   : > { %v2199_v35 = vadd.f32 %v3015_v61, %v4275_v4  ;;  %v2258_v24 = vpack.c.bf16 %v2246_v3, %v2245_v0  ;;  %v2190_v8 = vpop.f32.mrb[13].mxu0 }
 0x9c3   : > { %v2191_v22 = vadd.f32 %v4275_v4, %v2190_v8  ;;  %v3016_v2 = vpop.f32.mrb[14].mxu0 }
 0x9c4   : > { %3022 = vmatpush3.bf16.xpose.msra.mxu1 %v2256_v26  ;;  %vm2219_vm13 = vcmp.gt.f32.partialorder %v2199_v35, 0.0  ;;  %v2235_v44 = vmul.f32 0.1, %v2199_v35  ;;  %v2202_v48 = vadd.f32 %v3016_v2, %v4275_v4  ;;  %v2193_v7 = vpop.f32.mrb[15].mxu0 }
 0x9c5   : > { %3023 = vmatprep.subr.bf16.mxu1 %v3515_v19  ;;  %vm2217_vm14 = vcmp.gt.f32.partialorder %v2191_v22, 0.0  ;;  %v2233_v23 = vmul.f32 0.1, %v2191_v22  ;;  %v2194_v15 = vadd.f32 %v4275_v4, %v2193_v7  ;;  %v2253_v4 = vld [vmem:[%s4347_s8] sm:$0x1] }
 0x9c6   : > { %vm2220_vm15 = vcmp.gt.f32.partialorder %v2202_v48, 0.0  ;;  %v2236_v41 = vmul.f32 0.1, %v2202_v48  ;;  %v2251_v38 = vsel %vm2219_vm13, %v2199_v35, %v2235_v44 }
 0x9c7   : > { %vm2218_vm0 = vcmp.gt.f32.partialorder %v2194_v15, 0.0  ;;  %v2234_v5 = vmul.f32 0.1, %v2194_v15  ;;  %v2249_v42 = vsel %vm2217_vm14, %v2191_v22, %v2233_v23 }
 0x9c8   : > { %v2252_v43 = vsel %vm2220_vm15, %v2202_v48, %v2236_v41 }
 0x9c9   : > { %v2250_v25 = vsel %vm2218_vm0, %v2194_v15, %v2234_v5  ;;  %v2261_v33 = vpack.c.bf16 %v2252_v43, %v2251_v38 }
 0x9ca   : > { %v2260_v45 = vpack.c.bf16 %v2250_v25, %v2249_v42 }
 0x9cc   : > { %3024 = vmatpush3.bf16.xpose.msra.mxu1 %v2257_v34 }
 0x9cd   : > { %3025 = vmatprep.subr.bf16.mxu1 %v3515_v19 }
 0x9d4   : > { %3026 = vmatpush3.bf16.xpose.msra.mxu1 %v2258_v24 }
 0x9d5   : > { %3027 = vmatprep.subr.bf16.mxu1 %v3515_v19 }
 0x9dc   : > { %3028 = vmatpush3.bf16.xpose.msra.mxu1 %v2259_v62 }
 0x9dd   : > { %3029 = vmatprep.subr.bf16.mxu1 %v3515_v19 }
 0x9e4   : > { %3030 = vmatpush3.bf16.xpose.msra.mxu1 %v2260_v45 }
 0x9e5   : > { %3031 = vmatprep.subr.bf16.mxu1 %v3515_v19 }
 0x9ec   : > { %3032 = vmatpush3.bf16.xpose.msra.mxu1 %v2261_v33 }
 0x9f3   : > { %3034 = vmatmul.mubr.bf16.vlgmr.msra.gmra.mrb[0].mxu1 %v2253_v4 }
 0xac6   : > { %v2298_v47 = vpop.f32.mrb[0].mxu1 }
 0xac7   : > { %v2299_v32 = vadd.f32 %v2298_v47, %v2263_v21  ;;  %v3035_v40 = vpop.f32.mrb[1].mxu1 }
 0xac8   : > { %v2301_v51 = vpop.f32.mrb[2].mxu1 }
 0xac9   : > { %2304 = vst [vmem:[#allocation14] sm:$0x1] %v2299_v32  ;;  %v3036_v20 = vpop.f32.mrb[3].mxu1 }
 0xaca PF: > { %p3094_p2 = scmp.eq.s32.totalorder %s3595_s9, 1  ;;  %s3517_s28 = smov [#allocation14]  }
 0xacb   : > { %s2312_s23 = sshll.u32 %s3517_s28, 4  ;;  %s2313_s23 = int_to_ptr.vmem [resolvable:$true] %s2312_s23 }
 0xacc   : > { %s3423_s20 = scalar_lea.vmem %s2313_s23, 16  ;;  %s3429_s1 = scalar_lea.vmem %s2313_s23, 32 }
 0xacd   : > { %p3424_p11 = scmp.ne.s32.totalorder %s2313_s23, %s3423_s20  ;;  %p3430_p7 = scmp.lt.s32.totalorder %s2313_s23, %s2313_s23 }
 0xace   : > { %p3431_p10 = scmp.lt.s32.totalorder %s3429_s1, %s3423_s20 }
 0xacf   : > { %p3425_p13 = pnand %p3424_p11, %p3094_p2 }
 0xad0   : > { %p3432_p1 = por %p3431_p10, %p3430_p7 }
 0xad1   : > { %p3426_p3 = pneg %p3425_p13 }
 0xad3   : > { %p3433_p8 = pnand %p3432_p1, %p3426_p3 }
 0xad5   : > { %3436 = shalt.err (!%p3433_p8)
}
 0xad6   : > { %s3437_s26 = scalar_lea.hbm %s4349_s10, 16 }
 0xad7   : > { %p3438_p4 = scmp.ne.s32.totalorder %s4349_s10, %s3437_s26  ;;  %p3443_p9 = scmp.lt.u32.totalorder %s3437_s26, %s4349_s10 }
 0xad9   : > { %p3439_p5 = pnand %p3438_p4, %p3094_p2 }
 0xadb   : > { %p3440_p6 = pneg %p3439_p5 }
 0xadd   : > { %p3445_p12 = pnand %p3443_p9, %p3440_p6 }
 0xadf   : > { %3448 = shalt.err (!%p3445_p12)
}
 0xae0   : > { %3060 = dma.vmem_to_hbm [thread:$0]  (%p3094_p2), %s2313_s23, 16, %s4349_s10, [#allocation6]  }
 0xae1   : > { %3486 = dma.done.wait (%p3094_p2), [#allocation6], 16  }
 0xae2   : > { %3488 = vsyncadd (%p3094_p2), [#allocation6], 4294967280 }
 0xae3 PF: > { %p22_p0 = scmp.ge.s32.totalorder %s3722_s29, 4   ;;  %s4377_s15 = smov %s3495_s16 }
 0xae4   : > { %s4378_s16 = smov %s3499_s17  ;;  %s4379_s17 = smov %s3753_s12 }
 0xae5   : > { %s4380_s18 = smov %s3722_s29  ;;  %24 = sbr.rel (!%p22_p0) target bundleno = 8 (0x8), region = 128 }
 0xaec   :  { %2325 = vsyncpa [#allocation5], 1 }
 0xaed   :  { %2327 = vsyncpa [#allocation5 + $0x1], 1 }
 0xaee   :  { %2328 = vsyncpa [#allocation8], 1 }
 0xaef   :  { %2329 = vsyncpa [#allocation11], 1 }
 0xaf0   :  { %2330 = vsyncpa [#allocation6], 1 }
 0xaf1   :  { %2332 = vsyncpa [#allocation6 + $0x1], 1 }

</bundles_post_ra>
